<compile_context>
chip_gen: v7x
topology: tpu7x:2x2x1
jax: 0.10.0
libtpu: 0.0.40
codegen_flags: <defaults>
</compile_context>

<pallas_src>
import jax
import jax.numpy as jnp
from jax.experimental import pallas as pl
from jax.experimental.pallas import tpu as pltpu


def _round_up(x, m):
    return ((x + m - 1) // m) * m


def prior_decoder_kernel(x_ref, w1_ref, b1_ref, w2_ref, b2_ref, w3_ref, b3_ref,
                         out_ref, h2_ref):
    # fc1 + ReLU and fc2 + ReLU only once per batch block (column index j == 0);
    # the bf16 h2 activation persists in VMEM scratch across the column axis.
    @pl.when(pl.program_id(1) == 0)
    def _():
        h1 = jnp.dot(x_ref[...], w1_ref[...], preferred_element_type=jnp.float32)
        h1 = jnp.maximum(h1 + b1_ref[...], 0.0).astype(jnp.bfloat16)
        h2 = jnp.dot(h1, w2_ref[...], preferred_element_type=jnp.float32)
        h2_ref[...] = jnp.maximum(h2 + b2_ref[...], 0.0).astype(jnp.bfloat16)

    # fc3 (no activation) on the current output-column block.
    h3 = jnp.dot(h2_ref[...], w3_ref[...], preferred_element_type=jnp.float32)
    out_ref[...] = (h3 + b3_ref[...]).astype(out_ref.dtype)


def prior_decoder_forward(embedding, params, n_pts):
    """embedding: (B, emb_dim) float32, params already prepared -> (B, n_pts, 3) f32."""
    w1, b1, w2, b2, w3, b3 = params          # weights bf16 (in,out), biases f32 (1,out)
    B, emb_dim = embedding.shape
    h1d = w1.shape[1]
    h2d = w2.shape[1]
    out_dim = 3 * n_pts
    out_dim_p = w3.shape[1]                  # lane-padded in prepare_params

    # Output-column tile: single block when small, else 2048-lane tiles
    # (prepare_params guarantees out_dim_p % TN == 0).
    TN = out_dim_p if out_dim_p <= 2048 else 2048
    n_col = out_dim_p // TN

    # Batch tile: multiple of 16 (bf16 sublane packing); aim for >= 2 grid
    # steps whenever B > 16 so v7x's second TensorCore is used; cap at 512.
    TB = min(512, max(16, _round_up(pl.cdiv(B, 2), 16)))
    B_pad = _round_up(B, TB)

    x = embedding.astype(jnp.bfloat16)
    if B_pad != B:
        x = jnp.pad(x, ((0, B_pad - B), (0, 0)))

    grid = (B_pad // TB, n_col)

    # Resident (never re-DMA'd) blocks only need a single buffer.
    resident = pl.Buffered(1)
    w3_mode = resident if n_col == 1 else None   # w3/b3 vary with j when tiled

    out_flat = pl.pallas_call(
        prior_decoder_kernel,
        out_shape=jax.ShapeDtypeStruct((B_pad, out_dim_p), jnp.float32),
        grid_spec=pltpu.PrefetchScalarGridSpec(
            num_scalar_prefetch=0,
            grid=grid,
            in_specs=[
                pl.BlockSpec((TB, emb_dim), lambda i, j: (i, 0)),            # x rows
                pl.BlockSpec((emb_dim, h1d), lambda i, j: (0, 0),
                             pipeline_mode=resident),                        # w1
                pl.BlockSpec((1, h1d), lambda i, j: (0, 0),
                             pipeline_mode=resident),                        # b1
                pl.BlockSpec((h1d, h2d), lambda i, j: (0, 0),
                             pipeline_mode=resident),                        # w2
                pl.BlockSpec((1, h2d), lambda i, j: (0, 0),
                             pipeline_mode=resident),                        # b2
                pl.BlockSpec((h2d, TN), lambda i, j: (0, j),
                             pipeline_mode=w3_mode),                         # w3 cols
                pl.BlockSpec((1, TN), lambda i, j: (0, j),
                             pipeline_mode=w3_mode),                         # b3 cols
            ],
            out_specs=pl.BlockSpec((TB, TN), lambda i, j: (i, j)),
            scratch_shapes=[pltpu.VMEM((TB, h2d), jnp.bfloat16)],            # h2
        ),
        compiler_params=pltpu.CompilerParams(
            dimension_semantics=("parallel", "arbitrary"),   # batch across TCs
            vmem_limit_bytes=32 * 1024 * 1024,               # headroom on v7x
        ),
    )(x, w1, b1, w2, b2, w3, b3)

    # drop batch/lane padding, then torch: out3.view(bs, -1, 3)
    return out_flat[:B, :out_dim].reshape(B, n_pts, 3)


def init_params(key, emb_dim, n_pts):
    """Deterministic synthetic weights, shapes as implied by nn.Linear.

    Stored as (in, out) for the x @ W convention; weights bf16, biases f32.
    """
    k1, k2, k3, k4, k5, k6 = jax.random.split(key, 6)
    h1, h2, out_dim = 512, 1024, 3 * n_pts
    w1 = (jax.random.normal(k1, (emb_dim, h1), jnp.float32) * 0.05).astype(jnp.bfloat16)
    b1 = jax.random.normal(k2, (1, h1), jnp.float32) * 0.05
    w2 = (jax.random.normal(k3, (h1, h2), jnp.float32) * 0.05).astype(jnp.bfloat16)
    b2 = jax.random.normal(k4, (1, h2), jnp.float32) * 0.05
    w3 = (jax.random.normal(k5, (h2, out_dim), jnp.float32) * 0.05).astype(jnp.bfloat16)
    b3 = jax.random.normal(k6, (1, out_dim), jnp.float32) * 0.05
    return (w1, b1, w2, b2, w3, b3)


def prepare_params(params, n_pts):
    """One-time param prep: lane-pad fc3 to a multiple of the column tile.

    Done outside the forward so the padded w3 copy is not re-materialized in
    HBM on every call.
    """
    w1, b1, w2, b2, w3, b3 = params
    out_dim = 3 * n_pts
    TN = 2048 if out_dim > 2048 else _round_up(out_dim, 128)
    out_dim_p = _round_up(out_dim, TN)
    if out_dim_p != out_dim:
        w3 = jnp.pad(w3, ((0, 0), (0, out_dim_p - out_dim)))
        b3 = jnp.pad(b3, ((0, 0), (0, out_dim_p - out_dim)))
    return (w1, b1, w2, b2, w3, b3)


def reference_forward(embedding, params, n_pts):
    """Pure-JAX reference mirroring the kernel's bf16-operand / f32-accum math."""
    w1, b1, w2, b2, w3, b3 = params
    f32 = jnp.float32
    x = embedding.astype(jnp.bfloat16).astype(f32)
    h1 = jax.nn.relu(x @ w1.astype(f32) + b1).astype(jnp.bfloat16).astype(f32)
    h2 = jax.nn.relu(h1 @ w2.astype(f32) + b2).astype(jnp.bfloat16).astype(f32)
    h3 = h2 @ w3.astype(f32) + b3
    return h3[:, : 3 * n_pts].reshape(embedding.shape[0], n_pts, 3)


if __name__ == "__main__":
    B = 8          # batch
    emb_dim = 32   # embedding dimension
    n_pts = 256    # fc3 out = 768 (single lane-aligned column block)

    key = jax.random.PRNGKey(0)
    k_x, k_p = jax.random.split(key)
    embedding = jax.random.normal(k_x, (B, emb_dim), jnp.float32)
    params = prepare_params(init_params(k_p, emb_dim, n_pts), n_pts)

    out = prior_decoder_forward(embedding, params, n_pts)
    out = jax.block_until_ready(out)

    ref = reference_forward(embedding, params, n_pts)
    assert out.shape == (B, n_pts, 3)
    assert jnp.allclose(out, ref, atol=1e-2, rtol=1e-2)

    print("KERNEL_OK")
</pallas_src>

<mosaic_0001>
module attributes {stable_mosaic.version = 11 : i64} {
  func.func @prior_decoder_kernel(%arg0: i32, %arg1: i32, %arg2: memref<16x32xbf16, #tpu.memory_space<vmem>>, %arg3: memref<32x512xbf16, #tpu.memory_space<vmem>>, %arg4: memref<1x512xf32, #tpu.memory_space<vmem>>, %arg5: memref<512x1024xbf16, #tpu.memory_space<vmem>>, %arg6: memref<1x1024xf32, #tpu.memory_space<vmem>>, %arg7: memref<1024x768xbf16, #tpu.memory_space<vmem>>, %arg8: memref<1x768xf32, #tpu.memory_space<vmem>>, %arg9: memref<16x768xf32, #tpu.memory_space<vmem>>, %arg10: memref<16x1024xbf16, #tpu.memory_space<vmem>>) attributes {dimension_semantics = [#tpu.dimension_semantics<parallel>, #tpu.dimension_semantics<arbitrary>], iteration_bounds = array<i64: 1, 1>, scalar_prefetch = 0 : i64, scratch_operands = 1 : i64, tpu.core_type = #tpu.core_type<tc>, window_params = [{transform_indices = @transform_0, window_bounds = array<i64: 16, 32>}, {pipeline_mode = #tpu.pipeline_mode<synchronous>, transform_indices = @transform_1, window_bounds = array<i64: 32, 512>}, {pipeline_mode = #tpu.pipeline_mode<synchronous>, transform_indices = @transform_2, window_bounds = array<i64: 1, 512>}, {pipeline_mode = #tpu.pipeline_mode<synchronous>, transform_indices = @transform_3, window_bounds = array<i64: 512, 1024>}, {pipeline_mode = #tpu.pipeline_mode<synchronous>, transform_indices = @transform_4, window_bounds = array<i64: 1, 1024>}, {pipeline_mode = #tpu.pipeline_mode<synchronous>, transform_indices = @transform_5, window_bounds = array<i64: 1024, 768>}, {pipeline_mode = #tpu.pipeline_mode<synchronous>, transform_indices = @transform_6, window_bounds = array<i64: 1, 768>}, {transform_indices = @transform_7, window_bounds = array<i64: 16, 768>}]} {
    %c0_i32 = arith.constant 0 : i32
    %0 = arith.cmpi eq, %arg1, %c0_i32 : i32
    %1 = arith.extui %0 : i1 to i32
    %c0_i32_0 = arith.constant 0 : i32
    %2 = arith.cmpi ne, %1, %c0_i32_0 : i32
    scf.if %2 {
      %c0_8 = arith.constant 0 : index
      %c0_9 = arith.constant 0 : index
      %10 = vector.load %arg2[%c0_8, %c0_9] : memref<16x32xbf16, #tpu.memory_space<vmem>>, vector<16x32xbf16>
      %c0_10 = arith.constant 0 : index
      %c0_11 = arith.constant 0 : index
      %11 = vector.load %arg3[%c0_10, %c0_11] : memref<32x512xbf16, #tpu.memory_space<vmem>>, vector<32x512xbf16>
      %cst_12 = arith.constant dense<0.000000e+00> : vector<16x512xf32>
      %12 = tpu.matmul %10, %11, %cst_12 {dimension_numbers = #tpu.dot_dimension_numbers<[1], [0], [0], [1], [0, 0, 1, 1], [], []>} : vector<16x32xbf16>, vector<32x512xbf16>, vector<16x512xf32> -> vector<16x512xf32>
      %c0_13 = arith.constant 0 : index
      %c0_14 = arith.constant 0 : index
      %13 = vector.load %arg4[%c0_13, %c0_14] : memref<1x512xf32, #tpu.memory_space<vmem>>, vector<1x512xf32>
      %14 = vector.broadcast %13 : vector<1x512xf32> to vector<16x512xf32>
      %15 = arith.addf %12, %14 : vector<16x512xf32>
      %cst_15 = arith.constant 0.000000e+00 : f32
      %16 = vector.broadcast %cst_15 : f32 to vector<16x512xf32>
      %17 = arith.maximumf %15, %16 : vector<16x512xf32>
      %18 = arith.truncf %17 : vector<16x512xf32> to vector<16x512xbf16>
      %c0_16 = arith.constant 0 : index
      %c0_17 = arith.constant 0 : index
      %19 = vector.load %arg5[%c0_16, %c0_17] : memref<512x1024xbf16, #tpu.memory_space<vmem>>, vector<512x1024xbf16>
      %cst_18 = arith.constant dense<0.000000e+00> : vector<16x1024xf32>
      %20 = tpu.matmul %18, %19, %cst_18 {dimension_numbers = #tpu.dot_dimension_numbers<[1], [0], [0], [1], [0, 0, 1, 1], [], []>} : vector<16x512xbf16>, vector<512x1024xbf16>, vector<16x1024xf32> -> vector<16x1024xf32>
      %c0_19 = arith.constant 0 : index
      %c0_20 = arith.constant 0 : index
      %21 = vector.load %arg6[%c0_19, %c0_20] : memref<1x1024xf32, #tpu.memory_space<vmem>>, vector<1x1024xf32>
      %22 = vector.broadcast %21 : vector<1x1024xf32> to vector<16x1024xf32>
      %23 = arith.addf %20, %22 : vector<16x1024xf32>
      %cst_21 = arith.constant 0.000000e+00 : f32
      %24 = vector.broadcast %cst_21 : f32 to vector<16x1024xf32>
      %25 = arith.maximumf %23, %24 : vector<16x1024xf32>
      %26 = arith.truncf %25 : vector<16x1024xf32> to vector<16x1024xbf16>
      %c0_22 = arith.constant 0 : index
      %c0_23 = arith.constant 0 : index
      %27 = vector.load %arg10[%c0_22, %c0_23] : memref<16x1024xbf16, #tpu.memory_space<vmem>>, vector<16x1024xbf16>
      tpu.vector_store %arg10[%c0_22, %c0_23], %26 {strides = array<i32>} : memref<16x1024xbf16, #tpu.memory_space<vmem>>, vector<16x1024xbf16>,
    } else {
    }
    %c0 = arith.constant 0 : index
    %c0_1 = arith.constant 0 : index
    %3 = vector.load %arg10[%c0, %c0_1] : memref<16x1024xbf16, #tpu.memory_space<vmem>>, vector<16x1024xbf16>
    %c0_2 = arith.constant 0 : index
    %c0_3 = arith.constant 0 : index
    %4 = vector.load %arg7[%c0_2, %c0_3] : memref<1024x768xbf16, #tpu.memory_space<vmem>>, vector<1024x768xbf16>
    %cst = arith.constant dense<0.000000e+00> : vector<16x768xf32>
    %5 = tpu.matmul %3, %4, %cst {dimension_numbers = #tpu.dot_dimension_numbers<[1], [0], [0], [1], [0, 0, 1, 1], [], []>} : vector<16x1024xbf16>, vector<1024x768xbf16>, vector<16x768xf32> -> vector<16x768xf32>
    %c0_4 = arith.constant 0 : index
    %c0_5 = arith.constant 0 : index
    %6 = vector.load %arg8[%c0_4, %c0_5] : memref<1x768xf32, #tpu.memory_space<vmem>>, vector<1x768xf32>
    %7 = vector.broadcast %6 : vector<1x768xf32> to vector<16x768xf32>
    %8 = arith.addf %5, %7 : vector<16x768xf32>
    %c0_6 = arith.constant 0 : index
    %c0_7 = arith.constant 0 : index
    %9 = vector.load %arg9[%c0_6, %c0_7] : memref<16x768xf32, #tpu.memory_space<vmem>>, vector<16x768xf32>
    tpu.vector_store %arg9[%c0_6, %c0_7], %8 {strides = array<i32>} : memref<16x768xf32, #tpu.memory_space<vmem>>, vector<16x768xf32>,
    return
  }
  func.func @transform_0(%arg0: i32, %arg1: i32) -> (i32, i32) {
    %c0_i32 = arith.constant 0 : i32
    %c0_i32_0 = arith.constant 0 : i32
    return %arg0, %c0_i32 : i32, i32
  }
  func.func @transform_1(%arg0: i32, %arg1: i32) -> (i32, i32) {
    %c0_i32 = arith.constant 0 : i32
    %c0_i32_0 = arith.constant 0 : i32
    %c0_i32_1 = arith.constant 0 : i32
    return %c0_i32, %c0_i32_0 : i32, i32
  }
  func.func @transform_2(%arg0: i32, %arg1: i32) -> (i32, i32) {
    %c0_i32 = arith.constant 0 : i32
    %c0_i32_0 = arith.constant 0 : i32
    %c0_i32_1 = arith.constant 0 : i32
    return %c0_i32, %c0_i32_0 : i32, i32
  }
  func.func @transform_3(%arg0: i32, %arg1: i32) -> (i32, i32) {
    %c0_i32 = arith.constant 0 : i32
    %c0_i32_0 = arith.constant 0 : i32
    %c0_i32_1 = arith.constant 0 : i32
    return %c0_i32, %c0_i32_0 : i32, i32
  }
  func.func @transform_4(%arg0: i32, %arg1: i32) -> (i32, i32) {
    %c0_i32 = arith.constant 0 : i32
    %c0_i32_0 = arith.constant 0 : i32
    %c0_i32_1 = arith.constant 0 : i32
    return %c0_i32, %c0_i32_0 : i32, i32
  }
  func.func @transform_5(%arg0: i32, %arg1: i32) -> (i32, i32) {
    %c0_i32 = arith.constant 0 : i32
    %c0_i32_0 = arith.constant 0 : i32
    return %c0_i32, %arg1 : i32, i32
  }
  func.func @transform_6(%arg0: i32, %arg1: i32) -> (i32, i32) {
    %c0_i32 = arith.constant 0 : i32
    %c0_i32_0 = arith.constant 0 : i32
    return %c0_i32, %arg1 : i32, i32
  }
  func.func @transform_7(%arg0: i32, %arg1: i32) -> (i32, i32) {
    %c0_i32 = arith.constant 0 : i32
    return %arg0, %arg1 : i32, i32
  }
}

</mosaic_0001>

<bundles_post_ra>
// kernel: tpu_custom_call.1
= control target key start
LH: loop header
LB: loop body
LE: loop exit
PB: predicated region body
PF: predicated region fallthrough
CT: control target
= control target key end

     0   :  { %12 = vsyncpa [#allocation4], 0  ;;  %s6951_s0 = inlined_call_operand.hbm [shape: bf16[16,32], index: 0, kind: input, shape index: {}]   ;;  %s6952_s1 = inlined_call_operand.hbm [shape: bf16[32,512], index: 1, kind: input, shape index: {}]   ;;  %s6953_s2 = inlined_call_operand.hbm [shape: f32[1,512], index: 2, kind: input, shape index: {}]   ;;  %s6954_s3 = inlined_call_operand.hbm [shape: bf16[512,1024], index: 3, kind: input, shape index: {}]   ;;  %s6955_s4 = inlined_call_operand.hbm [shape: f32[1,1024], index: 4, kind: input, shape index: {}]   ;;  %s6956_s5 = inlined_call_operand.hbm [shape: bf16[1024,768], index: 5, kind: input, shape index: {}]   ;;  %s6957_s6 = inlined_call_operand.hbm [shape: f32[1,768], index: 6, kind: input, shape index: {}]   ;;  %s6958_s7 = inlined_call_operand.hbm [shape: f32[16,768], index: 7, kind: output, shape index: {}]  }
   0x1   :  { %13 = vsyncpa [#allocation7], 0 }
   0x2   :  { %14 = vsyncpa [#allocation10], 0 }
   0x3   :  { %15 = vsyncpa [#allocation13], 0 }
   0x4   :  { %16 = vsyncpa [#allocation5], 0  ;;  %s6672_s24 = smov [#allocation6]   ;;  %s6486_s28 = scalar_lea.hbm %s6952_s1, 1024 }
   0x5   :  { %s34_s25 = sshll.u32 %s6672_s24, 4  ;;  %p6487_p0 = scmp.ne.s32.totalorder %s6952_s1, %s6486_s28  ;;  %s35_s25 = int_to_ptr.vmem [resolvable:$true] %s34_s25 }
   0x6   :  { %p6490_p1 = scmp.lt.u32.totalorder %s6486_s28, %s6952_s1 }
   0x8   :  { %p6492_p2 = pnand %p6490_p1, %p6487_p0 }
   0xa   :  { %6495 = shalt.err (!%p6492_p2)
}
   0xb   :  { %s6496_s10 = scalar_lea.vmem %s35_s25, 1024  ;;  %p6501_p4 = scmp.lt.s32.totalorder %s35_s25, %s35_s25 }
   0xc   :  { %p6497_p3 = scmp.ne.s32.totalorder %s35_s25, %s6496_s10  ;;  %p6502_p5 = scmp.lt.s32.totalorder %s6496_s10, %s6496_s10 }
   0xe   :  { %p6503_p6 = por %p6502_p5, %p6501_p4 }
  0x10   :  { %p6504_p7 = pnand %p6503_p6, %p6497_p3 }
  0x12   :  { %6507 = shalt.err (!%p6504_p7)
}
  0x13   :  { %s6673_s11 = smov 256   ;;  %s6674_s12 = smov 16  }
  0x14   :  { %40 = dma.hbm_to_vmem [thread:$0]  %s6952_s1, 1024, %s35_s25, [#allocation7], %s6673_s11, %s6673_s11, %s6674_s12  }
  0x15   :  { %s6675_s15 = smov [#allocation9]   ;;  %s6508_s19 = scalar_lea.hbm %s6954_s3, 32768 }
  0x16   :  { %s56_s16 = sshll.u32 %s6675_s15, 4  ;;  %p6509_p8 = scmp.ne.s32.totalorder %s6954_s3, %s6508_s19  ;;  %s57_s16 = int_to_ptr.vmem [resolvable:$true] %s56_s16 }
  0x17   :  { %p6512_p9 = scmp.lt.u32.totalorder %s6508_s19, %s6954_s3 }
  0x19   :  { %p6514_p10 = pnand %p6512_p9, %p6509_p8 }
  0x1b   :  { %6517 = shalt.err (!%p6514_p10)
}
  0x1c   :  { %s6518_s24 = scalar_lea.vmem %s57_s16, 32768  ;;  %p6523_p12 = scmp.lt.s32.totalorder %s57_s16, %s57_s16 }
  0x1d   :  { %p6519_p11 = scmp.ne.s32.totalorder %s57_s16, %s6518_s24  ;;  %p6524_p13 = scmp.lt.s32.totalorder %s6518_s24, %s6518_s24 }
  0x1f   :  { %p6525_p0 = por %p6524_p13, %p6523_p12 }
  0x21   :  { %p6526_p1 = pnand %p6525_p0, %p6519_p11 }
  0x23   :  { %6529 = shalt.err (!%p6526_p1)
}
  0x24   :  { %s6676_s1 = smov 512   ;;  %s6677_s25 = smov 32  }
  0x25   :  { %62 = dma.hbm_to_vmem [thread:$0]  %s6954_s3, 32768, %s57_s16, [#allocation10], %s6676_s1, %s6676_s1, %s6677_s25  }
  0x26   :  { %s6678_s28 = smov [#allocation12]   ;;  %s6530_s9 = scalar_lea.hbm %s6956_s5, 49152 }
  0x27   :  { %s78_s29 = sshll.u32 %s6678_s28, 4  ;;  %p6531_p2 = scmp.ne.s32.totalorder %s6956_s5, %s6530_s9  ;;  %s79_s29 = int_to_ptr.vmem [resolvable:$true] %s78_s29 }
  0x28   :  { %p6534_p3 = scmp.lt.u32.totalorder %s6530_s9, %s6956_s5 }
  0x2a   :  { %p6536_p4 = pnand %p6534_p3, %p6531_p2 }
  0x2c   :  { %6539 = shalt.err (!%p6536_p4)
}
  0x2d   :  { %s6540_s14 = scalar_lea.vmem %s79_s29, 49152  ;;  %p6545_p6 = scmp.lt.s32.totalorder %s79_s29, %s79_s29 }
  0x2e   :  { %p6541_p5 = scmp.ne.s32.totalorder %s79_s29, %s6540_s14  ;;  %p6546_p7 = scmp.lt.s32.totalorder %s6540_s14, %s6540_s14 }
  0x30   :  { %p6547_p8 = por %p6546_p7, %p6545_p6 }
  0x32   :  { %p6548_p9 = pnand %p6547_p8, %p6541_p5 }
  0x34   :  { %6551 = shalt.err (!%p6548_p9)
}
  0x35   :  { %s6679_s3 = smov 384   ;;  %s6680_s15 = smov 24  }
  0x36   :  { %84 = dma.hbm_to_vmem [thread:$0]  %s6956_s5, 49152, %s79_s29, [#allocation13], %s6679_s3, %s6679_s3, %s6680_s15  }
  0x37   :  { %s6681_s18 = smov [#allocation3]   ;;  %s6552_s22 = scalar_lea.hbm %s6951_s0, 128 }
  0x38   :  { %s22_s19 = sshll.u32 %s6681_s18, 4  ;;  %p6553_p10 = scmp.ne.s32.totalorder %s6951_s0, %s6552_s22  ;;  %s23_s19 = int_to_ptr.vmem [resolvable:$true] %s22_s19 }
  0x39   :  { %p6556_p11 = scmp.lt.u32.totalorder %s6552_s22, %s6951_s0 }
  0x3b   :  { %p6558_p12 = pnand %p6556_p11, %p6553_p10 }
  0x3d   :  { %6561 = shalt.err (!%p6558_p12)
}
  0x3e   :  { %s6562_s26 = scalar_lea.vmem %s23_s19, 128  ;;  %p6567_p0 = scmp.lt.s32.totalorder %s23_s19, %s23_s19 }
  0x3f   :  { %p6563_p13 = scmp.ne.s32.totalorder %s23_s19, %s6562_s26  ;;  %p6568_p1 = scmp.lt.s32.totalorder %s6562_s26, %s6562_s26 }
  0x41   :  { %p6569_p2 = por %p6568_p1, %p6567_p0 }
  0x43   :  { %p6570_p3 = pnand %p6569_p2, %p6563_p13 }
  0x45   :  { %6573 = shalt.err (!%p6570_p3)
}
  0x46   :  { %s6682_s5 = smov 64   ;;  %s6683_s27 = smov 4  }
  0x47   :  { %28 = dma.hbm_to_vmem [thread:$0]  %s6951_s0, 128, %s23_s19, [#allocation4], %s6682_s5, %s6682_s5, %s6683_s27  }
  0x48   :  { %s6684_s30 = smov [#allocation8]   ;;  %s6685_s9 = smov [#allocation11]  }
  0x49   :  { %s47_s8 = sshll.u32 %s6684_s30, 4  ;;  %s69_s10 = sshll.u32 %s6685_s9, 4  ;;  %s48_s8 = int_to_ptr.vmem [resolvable:$true] %s47_s8  ;;  %s70_s10 = int_to_ptr.vmem [resolvable:$true] %s69_s10 }
  0x4a   :  { %s6574_s13 = scalar_lea.hbm %s6953_s2, 64 }
  0x4b   :  { %p6575_p4 = scmp.ne.s32.totalorder %s6953_s2, %s6574_s13  ;;  %p6578_p5 = scmp.lt.u32.totalorder %s6574_s13, %s6953_s2 }
  0x4d   :  { %p6580_p6 = pnand %p6578_p5, %p6575_p4 }
  0x4f   :  { %6583 = shalt.err (!%p6580_p6)
}
  0x50   :  { %s6584_s0 = scalar_lea.vmem %s48_s8, 64  ;;  %p6589_p8 = scmp.lt.s32.totalorder %s48_s8, %s48_s8 }
  0x51   :  { %p6585_p7 = scmp.ne.s32.totalorder %s48_s8, %s6584_s0  ;;  %p6590_p9 = scmp.lt.s32.totalorder %s6584_s0, %s6584_s0 }
  0x53   :  { %p6591_p10 = por %p6590_p9, %p6589_p8 }
  0x55   :  { %p6592_p11 = pnand %p6591_p10, %p6585_p7 }
  0x57   :  { %6595 = shalt.err (!%p6592_p11)
}
  0x58   :  { %50 = dma.hbm_to_vmem [thread:$0]  %s6953_s2, 64, %s48_s8, [#allocation7]  }
  0x59   :  { %s6596_s21 = scalar_lea.hbm %s6955_s4, 128 }
  0x5a   :  { %p6597_p12 = scmp.ne.s32.totalorder %s6955_s4, %s6596_s21  ;;  %p6600_p13 = scmp.lt.u32.totalorder %s6596_s21, %s6955_s4 }
  0x5c   :  { %p6602_p0 = pnand %p6600_p13, %p6597_p12 }
  0x5e   :  { %6605 = shalt.err (!%p6602_p0)
}
  0x5f   :  { %s6606_s25 = scalar_lea.vmem %s70_s10, 128  ;;  %p6611_p2 = scmp.lt.s32.totalorder %s70_s10, %s70_s10 }
  0x60   :  { %p6607_p1 = scmp.ne.s32.totalorder %s70_s10, %s6606_s25  ;;  %p6612_p3 = scmp.lt.s32.totalorder %s6606_s25, %s6606_s25 }
  0x62   :  { %p6613_p4 = por %p6612_p3, %p6611_p2 }
  0x64   :  { %p6614_p5 = pnand %p6613_p4, %p6607_p1 }
  0x66   :  { %6617 = shalt.err (!%p6614_p5)
}
  0x67   :  { %72 = dma.hbm_to_vmem [thread:$0]  %s6955_s4, 128, %s70_s10, [#allocation10]  }
  0x68   :  { %s6686_s5 = smov [#allocation14]   ;;  %s6618_s30 = scalar_lea.hbm %s6957_s6, 96 }
  0x69   :  { %s91_s27 = sshll.u32 %s6686_s5, 4  ;;  %p6619_p6 = scmp.ne.s32.totalorder %s6957_s6, %s6618_s30  ;;  %s92_s27 = int_to_ptr.vmem [resolvable:$true] %s91_s27 }
  0x6a   :  { %p6622_p7 = scmp.lt.u32.totalorder %s6618_s30, %s6957_s6 }
  0x6c   :  { %p6624_p8 = pnand %p6622_p7, %p6619_p6 }
  0x6e   :  { %6627 = shalt.err (!%p6624_p8)
}
  0x6f   :  { %s6628_s13 = scalar_lea.vmem %s92_s27, 96  ;;  %p6633_p10 = scmp.lt.s32.totalorder %s92_s27, %s92_s27 }
  0x70   :  { %p6629_p9 = scmp.ne.s32.totalorder %s92_s27, %s6628_s13  ;;  %p6634_p11 = scmp.lt.s32.totalorder %s6628_s13, %s6628_s13 }
  0x72   :  { %p6635_p12 = por %p6634_p11, %p6633_p10 }
  0x74   :  { %p6636_p13 = pnand %p6635_p12, %p6629_p9 }
  0x76   :  { %6639 = shalt.err (!%p6636_p13)
}
  0x77   :  { %94 = dma.hbm_to_vmem [thread:$0]  %s6957_s6, 96, %s92_s27, [#allocation13]  }
  0x78   :  { %6662 = dma.done.wait [#allocation4], 128  }
  0x79   :  { %6663 = vsyncadd [#allocation4], 4294967168 }
  0x7a   :  { %6664 = dma.done.wait [#allocation7], 1088  }
  0x7b   :  { %6665 = vsyncadd [#allocation7], 4294966208 }
  0x7c   :  { %6666 = dma.done.wait [#allocation10], 32896  }
  0x7d   :  { %6667 = vsyncadd [#allocation10], 4294934400 }
  0x7e   :  { %6668 = dma.done.wait [#allocation13], 49248  }
  0x7f   :  { %6669 = vsyncadd [#allocation13], 4294918048  ;;  %v6687_v0 = vmov 0   ;;  %v5896_v1 = vld [vmem:[#allocation6 + $0x4] ss:$16 sps:$4 sm:$0xff]   ;;  %v5902_v8 = vld [vmem:[#allocation3] sm:$0xff]  }
  0x80   :  { %234 = vmatprep.mubr.bf16.mxu0 %v6687_v0  ;;  %277 = vmatprep.mubr.bf16.mxu1 %v6687_v0  ;;  %v5898_v2 = vld [vmem:[#allocation6] ss:$16 sps:$4 sm:$0xff]   ;;  %v5899_v3 = vld [vmem:[#allocation6 + $0x24] ss:$16 sps:$4 sm:$0xff]   ;;  %v5903_v5 = vld [vmem:[#allocation6 + $0xc] ss:$16 sps:$4 sm:$0xff]  }
  0x81   :  { %202 = vmatprep.subr.bf16.mxu0 %v5896_v1  ;;  %v5901_v4 = vld [vmem:[#allocation6 + $0x20] ss:$16 sps:$4 sm:$0xff]   ;;  %v5905_v6 = vld [vmem:[#allocation6 + $0x8] ss:$16 sps:$4 sm:$0xff]   ;;  %v5906_v7 = vld [vmem:[#allocation6 + $0x2c] ss:$16 sps:$4 sm:$0xff]   ;;  %245 = vmatprep.subr.bf16.mxu1 %v5903_v5 }
  0x82   :  { %203 = vmatpush1.bf16.msra.mxu0 %v5898_v2  ;;  %v300_v9 = vld [vmem:[#allocation9] sm:$0xff]  ;;  %vm198_vm0 = vcmask 261120   ;;  %246 = vmatpush1.bf16.msra.mxu1 %v5905_v6  ;;  %v302_v12 = vld [vmem:[#allocation9 + $0x10] sm:$0xff]  ;;  %s6688_s6 = smov [#allocation15]  }
  0x83   :  { %204 = vmatprep.subr.bf16.mxu0 %v5899_v3  ;;  %v304_v10 = vld [vmem:[#allocation9 + $0x20] sm:$0xff]  ;;  %v306_v13 = vld [vmem:[#allocation9 + $0x30] sm:$0xff]  ;;  %247 = vmatprep.subr.bf16.mxu1 %v5906_v7  ;;  %s5131_s14 = sshll.u32 %s6688_s6, 4  ;;  %s5132_s14 = int_to_ptr.vmem [resolvable:$true] %s5131_s14 }
  0x84   :  { %v5908_v11 = vld [vmem:[#allocation6 + $0x28] ss:$16 sps:$4 sm:$0xff]   ;;  %v5158_v14 = vcombine.high %v300_v9, %v304_v10  ;;  %v5161_v15 = vcombine.low %v302_v12, %v306_v13  ;;  %v5162_v16 = vcombine.high %v302_v12, %v306_v13  ;;  %v5157_v24 = vcombine.low %v300_v9, %v304_v10  ;;  %s6640_s3 = scalar_lea.vmem %s5132_s14, 1536  ;;  %p6645_p1 = scmp.lt.s32.totalorder %s5132_s14, %s5132_s14 }
  0x85   :  { %v310_v17 = vld [vmem:[#allocation9 + $0x50] sm:$0xff]  ;;  %v308_v19 = vld [vmem:[#allocation9 + $0x40] sm:$0xff]  ;;  %p6641_p0 = scmp.ne.s32.totalorder %s5132_s14, %s6640_s3  ;;  %p6646_p2 = scmp.lt.s32.totalorder %s6640_s3, %s6640_s3 }
  0x86   :  { %205 = vmatpush1.bf16.msra.mxu0 %v5901_v4  ;;  %v314_v18 = vld [vmem:[#allocation9 + $0x70] sm:$0xff]  ;;  %v312_v20 = vld [vmem:[#allocation9 + $0x60] sm:$0xff]  ;;  %248 = vmatpush1.bf16.msra.mxu1 %v5908_v11 }
  0x87   :  { %v5170_v21 = vcombine.high %v310_v17, %v314_v18  ;;  %v318_v22 = vld [vmem:[#allocation9 + $0x90] sm:$0xff]  ;;  %2050 = vmatprep.subr.bf16.mxu0 %v5162_v16  ;;  %v5169_v25 = vcombine.low %v310_v17, %v314_v18  ;;  %1878 = vmatprep.subr.bf16.mxu1 %v5158_v14  ;;  %v5166_v26 = vcombine.high %v308_v19, %v312_v20  ;;  %v316_v27 = vld [vmem:[#allocation9 + $0x80] sm:$0xff]  ;;  %p6647_p3 = por %p6646_p2, %p6645_p1 }
  0x88   :  { %v322_v23 = vld [vmem:[#allocation9 + $0xb0] sm:$0xff]  ;;  %v320_v29 = vld [vmem:[#allocation9 + $0xa0] sm:$0xff]  ;;  %v5165_v32 = vcombine.low %v308_v19, %v312_v20 }
  0x89   :  { %5155 = vmatmul.mubr.msk.bf16.vlgmr.msra.gmra.mrb[0].mxu0 %vm198_vm0, %v5902_v8  ;;  %v5178_v28 = vcombine.high %v318_v22, %v322_v23  ;;  %v326_v30 = vld [vmem:[#allocation9 + $0xd0] sm:$0xff]  ;;  %5156 = vmatmul.mubr.msk.bf16.vlgmr.msra.gmra.mrb[0].mxu1 %vm198_vm0, %v5902_v8  ;;  %v5177_v33 = vcombine.low %v318_v22, %v322_v23  ;;  %v5174_v34 = vcombine.high %v316_v27, %v320_v29  ;;  %v324_v35 = vld [vmem:[#allocation9 + $0xc0] sm:$0xff]  ;;  %p6648_p4 = pnand %p6647_p3, %p6641_p0 }
  0x8a   :  { %2051 = vmatpush1.bf16.msra.mxu0 %v5161_v15  ;;  %v330_v31 = vld [vmem:[#allocation9 + $0xf0] sm:$0xff]  ;;  %1879 = vmatpush1.bf16.msra.mxu1 %v5157_v24  ;;  %v328_v37 = vld [vmem:[#allocation9 + $0xe0] sm:$0xff]  ;;  %v5173_v40 = vcombine.low %v316_v27, %v320_v29 }
  0x8b   :  { %2052 = vmatprep.subr.bf16.mxu0 %v5170_v21  ;;  %1880 = vmatprep.subr.bf16.mxu1 %v5166_v26  ;;  %v5186_v36 = vcombine.high %v326_v30, %v330_v31  ;;  %v334_v38 = vld [vmem:[#allocation9 + $0x110] sm:$0xff]  ;;  %v5185_v41 = vcombine.low %v326_v30, %v330_v31  ;;  %v5182_v42 = vcombine.high %v324_v35, %v328_v37  ;;  %v332_v43 = vld [vmem:[#allocation9 + $0x100] sm:$0xff] }
  0x8c   :  { %v338_v39 = vld [vmem:[#allocation9 + $0x130] sm:$0xff]  ;;  %v336_v45 = vld [vmem:[#allocation9 + $0x120] sm:$0xff]  ;;  %v5181_v48 = vcombine.low %v324_v35, %v328_v37 }
  0x8d   :  { %v5194_v44 = vcombine.high %v334_v38, %v338_v39  ;;  %v342_v46 = vld [vmem:[#allocation9 + $0x150] sm:$0xff]  ;;  %v5193_v49 = vcombine.low %v334_v38, %v338_v39  ;;  %v5190_v50 = vcombine.high %v332_v43, %v336_v45  ;;  %v340_v51 = vld [vmem:[#allocation9 + $0x140] sm:$0xff]  ;;  %v5189_v56 = vcombine.low %v332_v43, %v336_v45 }
  0x8e   :  { %2053 = vmatpush1.bf16.msra.mxu0 %v5169_v25  ;;  %1881 = vmatpush1.bf16.msra.mxu1 %v5165_v32  ;;  %v346_v47 = vld [vmem:[#allocation9 + $0x170] sm:$0xff]  ;;  %v344_v52 = vld [vmem:[#allocation9 + $0x160] sm:$0xff] }
  0x8f   :  { %2054 = vmatprep.subr.bf16.mxu0 %v5178_v28  ;;  %1882 = vmatprep.subr.bf16.mxu1 %v5174_v34  ;;  %v5202_v53 = vcombine.high %v342_v46, %v346_v47  ;;  %v350_v54 = vld [vmem:[#allocation9 + $0x190] sm:$0xff]  ;;  %v5201_v57 = vcombine.low %v342_v46, %v346_v47  ;;  %v348_v58 = vld [vmem:[#allocation9 + $0x180] sm:$0xff]  ;;  %v5198_v62 = vcombine.high %v340_v51, %v344_v52 }
  0x90   :  { %v354_v55 = vld [vmem:[#allocation9 + $0x1b0] sm:$0xff]  ;;  %v352_v59 = vld [vmem:[#allocation9 + $0x1a0] sm:$0xff]  ;;  %v5197_v0 = vcombine.low %v340_v51, %v344_v52 }
  0x91   :  { %v358_v60 = vld [vmem:[#allocation9 + $0x1d0] sm:$0xff]  ;;  %v5210_v63 = vcombine.high %v350_v54, %v354_v55  ;;  %v5209_v1 = vcombine.low %v350_v54, %v354_v55  ;;  %v356_v2 = vld [vmem:[#allocation9 + $0x1c0] sm:$0xff]  ;;  %v5206_v6 = vcombine.high %v348_v58, %v352_v59  ;;  %v5205_v8 = vcombine.low %v348_v58, %v352_v59 }
  0x92   :  { %2055 = vmatpush1.bf16.msra.mxu0 %v5177_v33  ;;  %1883 = vmatpush1.bf16.msra.mxu1 %v5173_v40  ;;  %v362_v61 = vld [vmem:[#allocation9 + $0x1f0] sm:$0xff]  ;;  %v360_v3 = vld [vmem:[#allocation9 + $0x1e0] sm:$0xff] }
  0x93   :  { %2056 = vmatprep.subr.bf16.mxu0 %v5186_v36  ;;  %1884 = vmatprep.subr.bf16.mxu1 %v5182_v42  ;;  %v366_v4 = vld [vmem:[#allocation9 + $0x210] sm:$0xff]  ;;  %v5218_v7 = vcombine.high %v358_v60, %v362_v61  ;;  %v5217_v9 = vcombine.low %v358_v60, %v362_v61  ;;  %v364_v10 = vld [vmem:[#allocation9 + $0x200] sm:$0xff]  ;;  %v5214_v14 = vcombine.high %v356_v2, %v360_v3 }
  0x94   :  { %v370_v5 = vld [vmem:[#allocation9 + $0x230] sm:$0xff]  ;;  %v368_v11 = vld [vmem:[#allocation9 + $0x220] sm:$0xff]  ;;  %v5213_v16 = vcombine.low %v356_v2, %v360_v3 }
  0x95   :  { %v374_v12 = vld [vmem:[#allocation9 + $0x250] sm:$0xff]  ;;  %v5226_v15 = vcombine.high %v366_v4, %v370_v5  ;;  %v5225_v17 = vcombine.low %v366_v4, %v370_v5  ;;  %v372_v18 = vld [vmem:[#allocation9 + $0x240] sm:$0xff]  ;;  %v5222_v22 = vcombine.high %v364_v10, %v368_v11  ;;  %v5221_v24 = vcombine.low %v364_v10, %v368_v11 }
  0x96   :  { %2057 = vmatpush1.bf16.msra.mxu0 %v5185_v41  ;;  %1885 = vmatpush1.bf16.msra.mxu1 %v5181_v48  ;;  %v378_v13 = vld [vmem:[#allocation9 + $0x270] sm:$0xff]  ;;  %v376_v19 = vld [vmem:[#allocation9 + $0x260] sm:$0xff] }
  0x97   :  { %2058 = vmatprep.subr.bf16.mxu0 %v5194_v44  ;;  %1886 = vmatprep.subr.bf16.mxu1 %v5190_v50  ;;  %v382_v20 = vld [vmem:[#allocation9 + $0x290] sm:$0xff]  ;;  %v5234_v23 = vcombine.high %v374_v12, %v378_v13  ;;  %v5233_v25 = vcombine.low %v374_v12, %v378_v13  ;;  %v380_v26 = vld [vmem:[#allocation9 + $0x280] sm:$0xff]  ;;  %v5230_v30 = vcombine.high %v372_v18, %v376_v19 }
  0x98   :  { %v386_v21 = vld [vmem:[#allocation9 + $0x2b0] sm:$0xff]  ;;  %v384_v27 = vld [vmem:[#allocation9 + $0x2a0] sm:$0xff]  ;;  %v5229_v32 = vcombine.low %v372_v18, %v376_v19  ;;  %v133_v18 = vlaneseq }
  0x99   :  { %v390_v28 = vld [vmem:[#allocation9 + $0x2d0] sm:$0xff]  ;;  %v5242_v31 = vcombine.high %v382_v20, %v386_v21  ;;  %v5241_v33 = vcombine.low %v382_v20, %v386_v21  ;;  %v388_v34 = vld [vmem:[#allocation9 + $0x2c0] sm:$0xff]  ;;  %v5238_v38 = vcombine.high %v380_v26, %v384_v27  ;;  %v5237_v40 = vcombine.low %v380_v26, %v384_v27  ;;  %v131_v21 = vld [vmem:[#allocation8] sm:$0xf] }
  0x9a   :  { %2059 = vmatpush1.bf16.msra.mxu0 %v5193_v49  ;;  %1887 = vmatpush1.bf16.msra.mxu1 %v5189_v56  ;;  %v394_v29 = vld [vmem:[#allocation9 + $0x2f0] sm:$0xff]  ;;  %v392_v35 = vld [vmem:[#allocation9 + $0x2e0] sm:$0xff]  ;;  %v6821_v19 = vshrl.u32 %v133_v18, 7 }
  0x9b   :  { %2060 = vmatprep.subr.bf16.mxu0 %v5202_v53  ;;  %1888 = vmatprep.subr.bf16.mxu1 %v5198_v62  ;;  %v398_v36 = vld [vmem:[#allocation9 + $0x310] sm:$0xff]  ;;  %v5250_v39 = vcombine.high %v390_v28, %v394_v29  ;;  %v5249_v41 = vcombine.low %v390_v28, %v394_v29  ;;  %v396_v42 = vld [vmem:[#allocation9 + $0x300] sm:$0xff]  ;;  %v5246_v46 = vcombine.high %v388_v34, %v392_v35 }
  0x9c   :  { %v402_v37 = vld [vmem:[#allocation9 + $0x330] sm:$0xff]  ;;  %v400_v43 = vld [vmem:[#allocation9 + $0x320] sm:$0xff]  ;;  %v5245_v48 = vcombine.low %v388_v34, %v392_v35  ;;  %v6824_v20 = vsub.s32 0, %v6821_v19  ;;  %v6835_v26 = vsub.s32 3, %v6821_v19 }
  0x9d   :  { %v406_v44 = vld [vmem:[#allocation9 + $0x350] sm:$0xff]  ;;  %v5258_v47 = vcombine.high %v398_v36, %v402_v37  ;;  %v5257_v49 = vcombine.low %v398_v36, %v402_v37  ;;  %v404_v50 = vld [vmem:[#allocation9 + $0x340] sm:$0xff]  ;;  %v5254_v52 = vcombine.high %v396_v42, %v400_v43  ;;  %v5253_v54 = vcombine.low %v396_v42, %v400_v43 }
  0x9e   :  { %2061 = vmatpush1.bf16.msra.mxu0 %v5201_v57  ;;  %1889 = vmatpush1.bf16.msra.mxu1 %v5197_v0  ;;  %v410_v45 = vld [vmem:[#allocation9 + $0x370] sm:$0xff]  ;;  %v408_v51 = vld [vmem:[#allocation9 + $0x360] sm:$0xff] }
  0x9f   :  { %2062 = vmatprep.subr.bf16.mxu0 %v5210_v63  ;;  %1890 = vmatprep.subr.bf16.mxu1 %v5206_v6  ;;  %v5266_v53 = vcombine.high %v406_v44, %v410_v45  ;;  %v5265_v55 = vcombine.low %v406_v44, %v410_v45  ;;  %v5262_v56 = vcombine.high %v404_v50, %v408_v51  ;;  %v412_v58 = vld [vmem:[#allocation9 + $0x380] sm:$0xff]  ;;  %v414_v60 = vld [vmem:[#allocation9 + $0x390] sm:$0xff] }
  0xa0   :  { %v5261_v57 = vcombine.low %v404_v50, %v408_v51  ;;  %v416_v59 = vld [vmem:[#allocation9 + $0x3a0] sm:$0xff]  ;;  %v418_v62 = vld [vmem:[#allocation9 + $0x3b0] sm:$0xff] }
  0xa1   :  { %v5270_v61 = vcombine.high %v412_v58, %v416_v59  ;;  %v5269_v63 = vcombine.low %v412_v58, %v416_v59  ;;  %v5273_v0 = vcombine.low %v414_v60, %v418_v62  ;;  %v420_v2 = vld [vmem:[#allocation9 + $0x3c0] sm:$0xff]  ;;  %v422_v4 = vld [vmem:[#allocation9 + $0x3d0] sm:$0xff] }
  0xa2   :  { %2063 = vmatpush1.bf16.msra.mxu0 %v5209_v1  ;;  %1891 = vmatpush1.bf16.msra.mxu1 %v5205_v8  ;;  %v5274_v1 = vcombine.high %v414_v60, %v418_v62  ;;  %v424_v3 = vld [vmem:[#allocation9 + $0x3e0] sm:$0xff]  ;;  %v426_v6 = vld [vmem:[#allocation9 + $0x3f0] sm:$0xff] }
  0xa3   :  { %2064 = vmatprep.subr.bf16.mxu0 %v5218_v7  ;;  %1892 = vmatprep.subr.bf16.mxu1 %v5214_v14  ;;  %v5278_v5 = vcombine.high %v420_v2, %v424_v3  ;;  %v5277_v7 = vcombine.low %v420_v2, %v424_v3  ;;  %v5281_v8 = vcombine.low %v422_v4, %v426_v6  ;;  %v6817_v10 = vld [vmem:[#allocation9 + $0x400] sm:$0xff]  ;;  %v430_v12 = vld [vmem:[#allocation9 + $0x410] sm:$0xff] }
  0xa4   :  { %v432_v11 = vld [vmem:[#allocation9 + $0x420] sm:$0xff]  ;;  %v434_v14 = vld [vmem:[#allocation9 + $0x430] sm:$0xff] }
  0xa5   :  { %v5286_v13 = vcombine.high %v6817_v10, %v432_v11  ;;  %v440_v45 = vld [vmem:[#allocation9 + $0x460] sm:$0xff]  ;;  %v446_v62 = vld [vmem:[#allocation9 + $0x490] sm:$0xff] }
  0xa6   :  { %2065 = vmatpush1.bf16.msra.mxu0 %v5217_v9  ;;  %1893 = vmatpush1.bf16.msra.mxu1 %v5213_v16  ;;  %v5282_v9 = vcombine.high %v422_v4, %v426_v6  ;;  %v5289_v16 = vcombine.low %v430_v12, %v434_v14  ;;  %v444_v59 = vld [vmem:[#allocation9 + $0x480] sm:$0xff]  ;;  %v466_v18 = vld [vmem:[#allocation9 + $0x530] sm:$0xff] }
  0xa7   :  { %2066 = vmatprep.subr.bf16.mxu0 %v5226_v15  ;;  %1894 = vmatprep.subr.bf16.mxu1 %v5222_v22  ;;  %v5285_v15 = vcombine.low %v6817_v10, %v432_v11  ;;  %v6827_v22 = vsub.s32 1, %v6821_v19  ;;  %v458_v10 = vld [vmem:[#allocation9 + $0x4f0] sm:$0xff] }
  0xaa   :  { %2067 = vmatpush1.bf16.msra.mxu0 %v5225_v17  ;;  %1895 = vmatpush1.bf16.msra.mxu1 %v5221_v24  ;;  %v5290_v17 = vcombine.high %v430_v12, %v434_v14  ;;  %v6831_v24 = vsub.s32 2, %v6821_v19 }
  0xab   :  { %2068 = vmatprep.subr.bf16.mxu0 %v5234_v23  ;;  %1896 = vmatprep.subr.bf16.mxu1 %v5230_v30  ;;  %v136_v23 = vrot.slane %v131_v21, %v6824_v20 }
  0xac   :  { %v144_v30 = vrot.slane %v131_v21, %v6831_v24 }
  0xae   :  { %2069 = vmatpush1.bf16.msra.mxu0 %v5233_v25  ;;  %1897 = vmatpush1.bf16.msra.mxu1 %v5229_v32  ;;  %v140_v25 = vrot.slane %v131_v21, %v6827_v22 }
  0xaf   :  { %2070 = vmatprep.subr.bf16.mxu0 %v5242_v31  ;;  %1898 = vmatprep.subr.bf16.mxu1 %v5238_v38 }
  0xb2   :  { %2071 = vmatpush1.bf16.msra.mxu0 %v5241_v33  ;;  %1899 = vmatpush1.bf16.msra.mxu1 %v5237_v40  ;;  %v148_v33 = vrot.slane %v131_v21, %v6835_v26  ;;  %v436_v40 = vld [vmem:[#allocation9 + $0x440] sm:$0xff] }
  0xb3   :  { %2072 = vmatprep.subr.bf16.mxu0 %v5250_v39  ;;  %1900 = vmatprep.subr.bf16.mxu1 %v5246_v46  ;;  %v438_v46 = vld [vmem:[#allocation9 + $0x450] sm:$0xff]  ;;  %v5293_v2 = vcombine.low %v436_v40, %v440_v45 }
  0xb6   :  { %2073 = vmatpush1.bf16.msra.mxu0 %v5249_v41  ;;  %1901 = vmatpush1.bf16.msra.mxu1 %v5245_v48 }
  0xb7   :  { %2074 = vmatprep.subr.bf16.mxu0 %v5258_v47  ;;  %1902 = vmatprep.subr.bf16.mxu1 %v5254_v52  ;;  %v442_v47 = vld [vmem:[#allocation9 + $0x470] sm:$0xff] }
  0xb8   :  { %v5298_v58 = vcombine.high %v438_v46, %v442_v47  ;;  %v5297_v3 = vcombine.low %v438_v46, %v442_v47  ;;  %v486_v46 = vld [vmem:[#allocation9 + $0x5d0] sm:$0xff] }
  0xb9   :  { %v490_v47 = vld [vmem:[#allocation9 + $0x5f0] sm:$0xff] }
  0xba   :  { %2075 = vmatpush1.bf16.msra.mxu0 %v5257_v49  ;;  %1903 = vmatpush1.bf16.msra.mxu1 %v5253_v54 }
  0xbb   :  { %2076 = vmatprep.subr.bf16.mxu0 %v5266_v53  ;;  %1904 = vmatprep.subr.bf16.mxu1 %v5262_v56 }
  0xbe   :  { %2077 = vmatpush1.bf16.msra.mxu0 %v5265_v55  ;;  %1905 = vmatpush1.bf16.msra.mxu1 %v5261_v57  ;;  %v5294_v57 = vcombine.high %v436_v40, %v440_v45  ;;  %v488_v45 = vld [vmem:[#allocation9 + $0x5e0] sm:$0xff] }
  0xbf   :  { %1906 = vmatprep.subr.bf16.mxu1 %v5270_v61  ;;  %2078 = vmatprep.subr.bf16.mxu0 %v5274_v1  ;;  %v448_v61 = vld [vmem:[#allocation9 + $0x4a0] sm:$0xff] }
  0xc0   :  { %v5301_v11 = vcombine.low %v444_v59, %v448_v61 }
  0xc2   :  { %1907 = vmatpush1.bf16.msra.mxu1 %v5269_v63  ;;  %2079 = vmatpush1.bf16.msra.mxu0 %v5273_v0  ;;  %v450_v63 = vld [vmem:[#allocation9 + $0x4b0] sm:$0xff] }
  0xc3   :  { %1908 = vmatprep.subr.bf16.mxu1 %v5278_v5  ;;  %2080 = vmatprep.subr.bf16.mxu0 %v5282_v9  ;;  %v5302_v5 = vcombine.high %v444_v59, %v448_v61  ;;  %v5306_v6 = vcombine.high %v446_v62, %v450_v63  ;;  %v454_v9 = vld [vmem:[#allocation9 + $0x4d0] sm:$0xff]  ;;  %v5305_v12 = vcombine.low %v446_v62, %v450_v63  ;;  %v500_v62 = vld [vmem:[#allocation9 + $0x640] sm:$0xff] }
  0xc4   :  { %v5314_v14 = vcombine.high %v454_v9, %v458_v10  ;;  %v5345_v59 = vcombine.low %v486_v46, %v490_v47  ;;  %v504_v63 = vld [vmem:[#allocation9 + $0x660] sm:$0xff] }
  0xc6   :  { %1909 = vmatpush1.bf16.msra.mxu1 %v5277_v7  ;;  %2081 = vmatpush1.bf16.msra.mxu0 %v5281_v8  ;;  %v452_v7 = vld [vmem:[#allocation9 + $0x4c0] sm:$0xff] }
  0xc7   :  { %1921 = vmatprep.subr.bf16.mxu1 %v5286_v13  ;;  %2093 = vmatprep.subr.bf16.mxu0 %v5290_v17  ;;  %v456_v8 = vld [vmem:[#allocation9 + $0x4e0] sm:$0xff]  ;;  %v462_v17 = vld [vmem:[#allocation9 + $0x510] sm:$0xff] }
  0xc8   :  { %v5310_v13 = vcombine.high %v452_v7, %v456_v8  ;;  %v5309_v21 = vcombine.low %v452_v7, %v456_v8  ;;  %v508_v8 = vld [vmem:[#allocation9 + $0x680] sm:$0xff] }
 0x15c   :  { %v236_v27 = vpop.f32.mrb[0].mxu0  ;;  %v279_v37 = vpop.f32.mrb[0].mxu1 }
 0x15d   :  { %v237_v28 = vadd.f32 %v236_v27, %v136_v23  ;;  %v238_v29 = vpop.f32.mrb[1].mxu0  ;;  %v280_v41 = vadd.f32 %v279_v37, %v144_v30  ;;  %v281_v42 = vpop.f32.mrb[1].mxu1  ;;  %v5322_v27 = vcombine.high %v462_v17, %v466_v18  ;;  %v480_v37 = vld [vmem:[#allocation9 + $0x5a0] sm:$0xff] }
 0x15e   :  { %v239_v31 = vadd.f32 %v238_v29, %v140_v25  ;;  %v240_v32 = vpop.f32.mrb[2].mxu0  ;;  %v282_v48 = vadd.f32 %v281_v42, %v148_v33  ;;  %v283_v49 = vpop.f32.mrb[2].mxu1  ;;  %v472_v29 = vld [vmem:[#allocation9 + $0x560] sm:$0xff] }
 0x15f   :  { %v241_v34 = vadd.f32 %v240_v32, %v136_v23  ;;  %v242_v35 = vpop.f32.mrb[3].mxu0  ;;  %v288_v38 = vmax.f32 %v237_v28, 0.0  ;;  %v290_v51 = vmax.f32 %v280_v41, 0.0  ;;  %v284_v52 = vadd.f32 %v283_v49, %v144_v30  ;;  %v285_v53 = vpop.f32.mrb[3].mxu1  ;;  %v468_v28 = vld [vmem:[#allocation9 + $0x540] sm:$0xff]  ;;  %v470_v30 = vld [vmem:[#allocation9 + $0x550] sm:$0xff] }
 0x160   :  { %v243_v36 = vadd.f32 %v242_v35, %v140_v25  ;;  %v289_v43 = vmax.f32 %v239_v31, 0.0  ;;  %v291_v55 = vmax.f32 %v282_v48, 0.0  ;;  %v286_v56 = vadd.f32 %v285_v53, %v148_v33  ;;  %v474_v31 = vld [vmem:[#allocation9 + $0x570] sm:$0xff]  ;;  %v492_v53 = vld [vmem:[#allocation9 + $0x600] sm:$0xff] }
 0x161   :  { %v292_v39 = vmax.f32 %v241_v34, 0.0  ;;  %v294_v60 = vmax.f32 %v284_v52, 0.0  ;;  %v5313_v23 = vcombine.low %v454_v9, %v458_v10  ;;  %v5321_v33 = vcombine.low %v462_v17, %v466_v18  ;;  %v512_v9 = vld [vmem:[#allocation9 + $0x6a0] sm:$0xff]  ;;  %v510_v10 = vld [vmem:[#allocation9 + $0x690] sm:$0xff] }
 0x162   :  { %v293_v44 = vmax.f32 %v243_v36, 0.0  ;;  %v295_v0 = vmax.f32 %v286_v56, 0.0  ;;  %v5326_v34 = vcombine.high %v468_v28, %v472_v29  ;;  %v5330_v35 = vcombine.high %v470_v30, %v474_v31  ;;  %v476_v36 = vld [vmem:[#allocation9 + $0x580] sm:$0xff]  ;;  %v494_v56 = vld [vmem:[#allocation9 + $0x610] sm:$0xff] }
 0x163   :  { %v6839_v50 = vpack.c.bf16 %v292_v39, %v288_v38  ;;  %v6847_v1 = vpack.c.bf16 %v294_v60, %v290_v51  ;;  %v478_v38 = vld [vmem:[#allocation9 + $0x590] sm:$0xff]  ;;  %v5325_v40 = vcombine.low %v468_v28, %v472_v29  ;;  %v5329_v41 = vcombine.low %v470_v30, %v474_v31  ;;  %v520_v17 = vld [vmem:[#allocation9 + $0x6e0] sm:$0xff] }
 0x164   :  { %v6841_v54 = vpack.c.bf16 %v293_v44, %v289_v43  ;;  %v6849_v4 = vpack.c.bf16 %v295_v0, %v291_v55  ;;  %v482_v39 = vld [vmem:[#allocation9 + $0x5b0] sm:$0xff]  ;;  %v5334_v42 = vcombine.high %v476_v36, %v480_v37  ;;  %v484_v44 = vld [vmem:[#allocation9 + $0x5c0] sm:$0xff]  ;;  %v5333_v48 = vcombine.low %v476_v36, %v480_v37 }
 0x165   :  { %v5338_v43 = vcombine.high %v478_v38, %v482_v39  ;;  %v5337_v49 = vcombine.low %v478_v38, %v482_v39  ;;  %v5342_v51 = vcombine.high %v484_v44, %v488_v45  ;;  %v5346_v52 = vcombine.high %v486_v46, %v490_v47  ;;  %v496_v55 = vld [vmem:[#allocation9 + $0x620] sm:$0xff]  ;;  %v502_v0 = vld [vmem:[#allocation9 + $0x650] sm:$0xff] }
 0x166   :  { %1910 = vmatprep.mubr.bf16.mxu1 %v6841_v54  ;;  %2082 = vmatprep.mubr.bf16.mxu0 %v6841_v54  ;;  %v5350_v60 = vcombine.high %v492_v53, %v496_v55  ;;  %v518_v18 = vld [vmem:[#allocation9 + $0x6d0] sm:$0xff]  ;;  %v524_v29 = vld [vmem:[#allocation9 + $0x700] sm:$0xff] }
 0x167   :  { %1911 = vmatmul.mubr.bf16.vlgmr.msra.gmra.mrb[4].mxu1 %v6839_v50  ;;  %2083 = vmatmul.mubr.bf16.vlgmr.msra.gmra.mrb[4].mxu0 %v6839_v50  ;;  %v528_v30 = vld [vmem:[#allocation9 + $0x720] sm:$0xff]  ;;  %v526_v31 = vld [vmem:[#allocation9 + $0x710] sm:$0xff] }
 0x168   :  { %1922 = vmatpush1.bf16.msra.mxu1 %v5285_v15  ;;  %2094 = vmatpush1.bf16.msra.mxu0 %v5289_v16  ;;  %v460_v15 = vld [vmem:[#allocation9 + $0x500] sm:$0xff]  ;;  %v534_v39 = vld [vmem:[#allocation9 + $0x750] sm:$0xff] }
 0x169   :  { %1923 = vmatprep.subr.bf16.mxu1 %v5294_v57  ;;  %2095 = vmatprep.subr.bf16.mxu0 %v5298_v58  ;;  %v464_v16 = vld [vmem:[#allocation9 + $0x520] sm:$0xff]  ;;  %v498_v57 = vld [vmem:[#allocation9 + $0x630] sm:$0xff]  ;;  %v5341_v58 = vcombine.low %v484_v44, %v488_v45 }
 0x16a   :  { %1953 = vmatprep.mubr.bf16.mxu1 %v6849_v4  ;;  %2125 = vmatprep.mubr.bf16.mxu0 %v6849_v4  ;;  %v5318_v25 = vcombine.high %v460_v15, %v464_v16  ;;  %v5317_v32 = vcombine.low %v460_v15, %v464_v16  ;;  %v5354_v61 = vcombine.high %v494_v56, %v498_v57  ;;  %v516_v16 = vld [vmem:[#allocation9 + $0x6c0] sm:$0xff]  ;;  %v542_v47 = vld [vmem:[#allocation9 + $0x790] sm:$0xff] }
 0x16b   :  { %v532_v37 = vld [vmem:[#allocation9 + $0x740] sm:$0xff] }
 0x16c   :  { %1924 = vmatpush1.bf16.msra.mxu1 %v5293_v2  ;;  %2096 = vmatpush1.bf16.msra.mxu0 %v5297_v3  ;;  %v506_v2 = vld [vmem:[#allocation9 + $0x670] sm:$0xff]  ;;  %v5349_v3 = vcombine.low %v492_v53, %v496_v55  ;;  %v536_v38 = vld [vmem:[#allocation9 + $0x760] sm:$0xff] }
 0x16d   :  { %1925 = vmatprep.subr.bf16.mxu1 %v5302_v5  ;;  %2097 = vmatprep.subr.bf16.mxu0 %v5306_v6  ;;  %v5353_v5 = vcombine.low %v494_v56, %v498_v57  ;;  %v5358_v6 = vcombine.high %v500_v62, %v504_v63  ;;  %v5362_v7 = vcombine.high %v502_v0, %v506_v2  ;;  %v540_v45 = vld [vmem:[#allocation9 + $0x780] sm:$0xff]  ;;  %v550_v57 = vld [vmem:[#allocation9 + $0x7d0] sm:$0xff] }
 0x16e   :  { %v544_v46 = vld [vmem:[#allocation9 + $0x7a0] sm:$0xff] }
 0x16f   :  { %v548_v55 = vld [vmem:[#allocation9 + $0x7c0] sm:$0xff] }
 0x170   :  { %1926 = vmatpush1.bf16.msra.mxu1 %v5301_v11  ;;  %2098 = vmatpush1.bf16.msra.mxu0 %v5305_v12  ;;  %v514_v11 = vld [vmem:[#allocation9 + $0x6b0] sm:$0xff]  ;;  %v5357_v12 = vcombine.low %v500_v62, %v504_v63  ;;  %v552_v56 = vld [vmem:[#allocation9 + $0x7e0] sm:$0xff]  ;;  %v301_v63 = vld [vmem:[#allocation9 + $0x8] sm:$0xff] }
 0x171   :  { %1927 = vmatprep.subr.bf16.mxu1 %v5310_v13  ;;  %2099 = vmatprep.subr.bf16.mxu0 %v5314_v14  ;;  %v5361_v13 = vcombine.low %v502_v0, %v506_v2  ;;  %v5366_v14 = vcombine.high %v508_v8, %v512_v9  ;;  %v5370_v15 = vcombine.high %v510_v10, %v514_v11  ;;  %v305_v0 = vld [vmem:[#allocation9 + $0x28] sm:$0xff] }
 0x172   :  { %v5405_v2 = vcombine.low %v548_v55, %v552_v56 }
 0x174   :  { %1928 = vmatpush1.bf16.msra.mxu1 %v5309_v21  ;;  %2100 = vmatpush1.bf16.msra.mxu0 %v5313_v23  ;;  %v522_v21 = vld [vmem:[#allocation9 + $0x6f0] sm:$0xff]  ;;  %v5365_v23 = vcombine.low %v508_v8, %v512_v9  ;;  %v5159_v8 = vcombine.low %v301_v63, %v305_v0 }
 0x175   :  { %1929 = vmatprep.subr.bf16.mxu1 %v5318_v25  ;;  %2101 = vmatprep.subr.bf16.mxu0 %v5322_v27  ;;  %v5369_v25 = vcombine.low %v510_v10, %v514_v11  ;;  %v5374_v27 = vcombine.high %v516_v16, %v520_v17  ;;  %v5378_v28 = vcombine.high %v518_v18, %v522_v21  ;;  %v317_v10 = vld [vmem:[#allocation9 + $0x88] sm:$0xff] }
 0x176   :  { %v321_v11 = vld [vmem:[#allocation9 + $0xa8] sm:$0xff] }
 0x178   :  { %1930 = vmatpush1.bf16.msra.mxu1 %v5317_v32  ;;  %2102 = vmatpush1.bf16.msra.mxu0 %v5321_v33  ;;  %v530_v32 = vld [vmem:[#allocation9 + $0x730] sm:$0xff]  ;;  %v5373_v33 = vcombine.low %v516_v16, %v520_v17  ;;  %v5175_v16 = vcombine.low %v317_v10, %v321_v11 }
 0x179   :  { %1931 = vmatprep.subr.bf16.mxu1 %v5326_v34  ;;  %2103 = vmatprep.subr.bf16.mxu0 %v5330_v35  ;;  %v5377_v34 = vcombine.low %v518_v18, %v522_v21  ;;  %v5382_v35 = vcombine.high %v524_v29, %v528_v30  ;;  %v5386_v36 = vcombine.high %v526_v31, %v530_v32  ;;  %v333_v18 = vld [vmem:[#allocation9 + $0x108] sm:$0xff] }
 0x17a   :  { %v337_v21 = vld [vmem:[#allocation9 + $0x128] sm:$0xff] }
 0x17c   :  { %1932 = vmatpush1.bf16.msra.mxu1 %v5325_v40  ;;  %2104 = vmatpush1.bf16.msra.mxu0 %v5329_v41  ;;  %v538_v40 = vld [vmem:[#allocation9 + $0x770] sm:$0xff]  ;;  %v5381_v41 = vcombine.low %v524_v29, %v528_v30  ;;  %v5191_v29 = vcombine.low %v333_v18, %v337_v21 }
 0x17d   :  { %1933 = vmatprep.subr.bf16.mxu1 %v5334_v42  ;;  %2105 = vmatprep.subr.bf16.mxu0 %v5338_v43  ;;  %v5385_v42 = vcombine.low %v526_v31, %v530_v32  ;;  %v5390_v43 = vcombine.high %v532_v37, %v536_v38  ;;  %v5394_v44 = vcombine.high %v534_v39, %v538_v40  ;;  %v349_v31 = vld [vmem:[#allocation9 + $0x188] sm:$0xff] }
 0x17e   :  { %v353_v32 = vld [vmem:[#allocation9 + $0x1a8] sm:$0xff] }
 0x180   :  { %1934 = vmatpush1.bf16.msra.mxu1 %v5333_v48  ;;  %2106 = vmatpush1.bf16.msra.mxu0 %v5337_v49  ;;  %v546_v48 = vld [vmem:[#allocation9 + $0x7b0] sm:$0xff]  ;;  %v5389_v49 = vcombine.low %v532_v37, %v536_v38  ;;  %v5207_v37 = vcombine.low %v349_v31, %v353_v32 }
 0x181   :  { %1935 = vmatprep.subr.bf16.mxu1 %v5342_v51  ;;  %2107 = vmatprep.subr.bf16.mxu0 %v5346_v52  ;;  %v5393_v51 = vcombine.low %v534_v39, %v538_v40  ;;  %v5398_v52 = vcombine.high %v540_v45, %v544_v46  ;;  %v5402_v53 = vcombine.high %v542_v47, %v546_v48  ;;  %v365_v39 = vld [vmem:[#allocation9 + $0x208] sm:$0xff] }
 0x182   :  { %v369_v40 = vld [vmem:[#allocation9 + $0x228] sm:$0xff] }
 0x184   :  { %1936 = vmatpush1.bf16.msra.mxu1 %v5341_v58  ;;  %2108 = vmatpush1.bf16.msra.mxu0 %v5345_v59  ;;  %v554_v58 = vld [vmem:[#allocation9 + $0x7f0] sm:$0xff]  ;;  %v5397_v59 = vcombine.low %v540_v45, %v544_v46  ;;  %v5911_v45 = vld [vmem:[#allocation12 + $0x4] ss:$24 sps:$4 sm:$0xff]   ;;  %v5223_v46 = vcombine.low %v365_v39, %v369_v40 }
 0x185   :  { %1937 = vmatprep.subr.bf16.mxu1 %v5350_v60  ;;  %2109 = vmatprep.subr.bf16.mxu0 %v5354_v61  ;;  %v5401_v60 = vcombine.low %v542_v47, %v546_v48  ;;  %v5406_v61 = vcombine.high %v548_v55, %v552_v56  ;;  %v5410_v62 = vcombine.high %v550_v57, %v554_v58  ;;  %v5909_v47 = vld [vmem:[#allocation12] ss:$24 sps:$4 sm:$0xff]   ;;  %v5912_v55 = vld [vmem:[#allocation12 + $0x30] ss:$24 sps:$4 sm:$0xff]  }
 0x188   :  { %1938 = vmatpush1.bf16.msra.mxu1 %v5349_v3  ;;  %2110 = vmatpush1.bf16.msra.mxu0 %v5353_v5  ;;  %v5409_v3 = vcombine.low %v550_v57, %v554_v58  ;;  %v5160_v5 = vcombine.high %v301_v63, %v305_v0  ;;  %v389_v57 = vld [vmem:[#allocation9 + $0x2c8] sm:$0xff] }
 0x189   :  { %1939 = vmatprep.subr.bf16.mxu1 %v5358_v6  ;;  %2111 = vmatprep.subr.bf16.mxu0 %v5362_v7  ;;  %v309_v6 = vld [vmem:[#allocation9 + $0x48] sm:$0xff] }
 0x18a   :  { %v313_v7 = vld [vmem:[#allocation9 + $0x68] sm:$0xff] }
 0x18b   :  { %v5168_v9 = vcombine.high %v309_v6, %v313_v7  ;;  %v393_v58 = vld [vmem:[#allocation9 + $0x2e8] sm:$0xff] }
 0x18c   :  { %1940 = vmatpush1.bf16.msra.mxu1 %v5357_v12  ;;  %2112 = vmatpush1.bf16.msra.mxu0 %v5361_v13  ;;  %v5167_v12 = vcombine.low %v309_v6, %v313_v7  ;;  %v5176_v13 = vcombine.high %v317_v10, %v321_v11  ;;  %v397_v63 = vld [vmem:[#allocation9 + $0x308] sm:$0xff] }
 0x18d   :  { %1941 = vmatprep.subr.bf16.mxu1 %v5366_v14  ;;  %2113 = vmatprep.subr.bf16.mxu0 %v5370_v15  ;;  %v325_v14 = vld [vmem:[#allocation9 + $0xc8] sm:$0xff] }
 0x18e   :  { %v329_v15 = vld [vmem:[#allocation9 + $0xe8] sm:$0xff] }
 0x18f   :  { %v5184_v17 = vcombine.high %v325_v14, %v329_v15  ;;  %v401_v0 = vld [vmem:[#allocation9 + $0x328] sm:$0xff] }
 0x190   :  { %1942 = vmatpush1.bf16.msra.mxu1 %v5365_v23  ;;  %2114 = vmatpush1.bf16.msra.mxu0 %v5369_v25  ;;  %v5183_v23 = vcombine.low %v325_v14, %v329_v15  ;;  %v5192_v25 = vcombine.high %v333_v18, %v337_v21  ;;  %v5256_v6 = vcombine.high %v397_v63, %v401_v0  ;;  %v405_v7 = vld [vmem:[#allocation9 + $0x348] sm:$0xff]  ;;  %v5926_v15 = vld [vmem:[#allocation12 + $0xf4] ss:$24 sps:$4 sm:$0xff]  }
 0x191   :  { %1943 = vmatprep.subr.bf16.mxu1 %v5374_v27  ;;  %2115 = vmatprep.subr.bf16.mxu0 %v5378_v28  ;;  %v341_v27 = vld [vmem:[#allocation9 + $0x148] sm:$0xff]  ;;  %v5255_v10 = vcombine.low %v397_v63, %v401_v0 }
 0x192   :  { %v345_v28 = vld [vmem:[#allocation9 + $0x168] sm:$0xff] }
 0x193   :  { %v5200_v30 = vcombine.high %v341_v27, %v345_v28  ;;  %v5921_v11 = vld [vmem:[#allocation12 + $0xc0] ss:$24 sps:$4 sm:$0xff]   ;;  %v5947_v0 = vld [vmem:[#allocation12 + $0x244] ss:$24 sps:$4 sm:$0xff]  }
 0x194   :  { %1944 = vmatpush1.bf16.msra.mxu1 %v5373_v33  ;;  %2116 = vmatpush1.bf16.msra.mxu0 %v5377_v34  ;;  %v5199_v33 = vcombine.low %v341_v27, %v345_v28  ;;  %v5208_v34 = vcombine.high %v349_v31, %v353_v32  ;;  %v417_v14 = vld [vmem:[#allocation9 + $0x3a8] sm:$0xff]  ;;  %v5932_v32 = vld [vmem:[#allocation12 + $0x154] ss:$24 sps:$4 sm:$0xff]  }
 0x195   :  { %1945 = vmatprep.subr.bf16.mxu1 %v5382_v35  ;;  %2117 = vmatprep.subr.bf16.mxu0 %v5386_v36  ;;  %v357_v35 = vld [vmem:[#allocation9 + $0x1c8] sm:$0xff] }
 0x196   :  { %v361_v36 = vld [vmem:[#allocation9 + $0x1e8] sm:$0xff] }
 0x197   :  { %v5216_v38 = vcombine.high %v357_v35, %v361_v36  ;;  %v421_v21 = vld [vmem:[#allocation9 + $0x3c8] sm:$0xff] }
 0x198   :  { %1946 = vmatpush1.bf16.msra.mxu1 %v5381_v41  ;;  %2118 = vmatpush1.bf16.msra.mxu0 %v5385_v42  ;;  %v5215_v41 = vcombine.low %v357_v35, %v361_v36  ;;  %v5224_v42 = vcombine.high %v365_v39, %v369_v40  ;;  %v5927_v28 = vld [vmem:[#allocation12 + $0x120] ss:$24 sps:$4 sm:$0xff]  }
 0x199   :  { %1947 = vmatprep.subr.bf16.mxu1 %v5390_v43  ;;  %2119 = vmatprep.subr.bf16.mxu0 %v5394_v44  ;;  %v373_v43 = vld [vmem:[#allocation9 + $0x248] sm:$0xff] }
 0x19a   :  { %v377_v44 = vld [vmem:[#allocation9 + $0x268] sm:$0xff] }
 0x19b   :  { %v5232_v48 = vcombine.high %v373_v43, %v377_v44  ;;  %v433_v31 = vld [vmem:[#allocation9 + $0x428] sm:$0xff] }
 0x19c   :  { %1948 = vmatpush1.bf16.msra.mxu1 %v5389_v49  ;;  %2120 = vmatpush1.bf16.msra.mxu0 %v5393_v51  ;;  %v381_v49 = vld [vmem:[#allocation9 + $0x288] sm:$0xff] }
 0x19d   :  { %1949 = vmatprep.subr.bf16.mxu1 %v5398_v52  ;;  %2121 = vmatprep.subr.bf16.mxu0 %v5402_v53  ;;  %v385_v51 = vld [vmem:[#allocation9 + $0x2a8] sm:$0xff]  ;;  %v5914_v52 = vld [vmem:[#allocation12 + $0x34] ss:$24 sps:$4 sm:$0xff]   ;;  %v5231_v53 = vcombine.low %v373_v43, %v377_v44 }
 0x19e   :  { %v5240_v56 = vcombine.high %v381_v49, %v385_v51  ;;  %v437_v36 = vld [vmem:[#allocation9 + $0x448] sm:$0xff]  ;;  %v5938_v44 = vld [vmem:[#allocation12 + $0x1b4] ss:$24 sps:$4 sm:$0xff]  }
 0x19f   :  { %v5933_v40 = vld [vmem:[#allocation12 + $0x180] ss:$24 sps:$4 sm:$0xff]  }
 0x1a0   :  { %1950 = vmatpush1.bf16.msra.mxu1 %v5397_v59  ;;  %2122 = vmatpush1.bf16.msra.mxu0 %v5401_v60  ;;  %v5917_v59 = vld [vmem:[#allocation12 + $0x64] ss:$24 sps:$4 sm:$0xff]   ;;  %v5239_v60 = vcombine.low %v381_v49, %v385_v51 }
 0x1a1   :  { %1951 = vmatprep.subr.bf16.mxu1 %v5406_v61  ;;  %2123 = vmatprep.subr.bf16.mxu0 %v5410_v62  ;;  %v5915_v61 = vld [vmem:[#allocation12 + $0x60] ss:$24 sps:$4 sm:$0xff]   ;;  %v5248_v62 = vcombine.high %v389_v57, %v393_v58  ;;  %v5941_v51 = vld [vmem:[#allocation12 + $0x1e4] ss:$24 sps:$4 sm:$0xff]  }
 0x1a2   :  { %v449_v43 = vld [vmem:[#allocation9 + $0x4a8] sm:$0xff] }
 0x1a3   :  { %v457_v49 = vld [vmem:[#allocation9 + $0x4e8] sm:$0xff] }
 0x1a4   :  { %1952 = vmatpush1.bf16.msra.mxu1 %v5405_v2  ;;  %2124 = vmatpush1.bf16.msra.mxu0 %v5409_v3  ;;  %v5920_v2 = vld [vmem:[#allocation12 + $0x94] ss:$24 sps:$4 sm:$0xff]   ;;  %v5247_v3 = vcombine.low %v389_v57, %v393_v58  ;;  %v465_v57 = vld [vmem:[#allocation9 + $0x528] sm:$0xff] }
 0x1a5   :  { %1964 = vmatprep.subr.bf16.mxu1 %v5160_v5  ;;  %4598 = vmatprep.subr.bf16.mxu0 %v5911_v45  ;;  %v5918_v5 = vld [vmem:[#allocation12 + $0x90] ss:$24 sps:$4 sm:$0xff]   ;;  %v5944_v58 = vld [vmem:[#allocation12 + $0x214] ss:$24 sps:$4 sm:$0xff]   ;;  %v473_v63 = vld [vmem:[#allocation9 + $0x568] sm:$0xff] }
 0x1a7   :  { %1954 = vmatmul.mubr.bf16.vlgmr.msra.gmra.mrb[4].mxu1 %v6847_v1  ;;  %2126 = vmatmul.mubr.bf16.vlgmr.msra.gmra.mrb[4].mxu0 %v6847_v1 }
 0x1a8   :  { %1965 = vmatpush1.bf16.msra.mxu1 %v5159_v8  ;;  %1996 = vmatprep.mubr.bf16.mxu1 %v6841_v54  ;;  %v409_v8 = vld [vmem:[#allocation9 + $0x368] sm:$0xff] }
 0x1a9   :  { %1966 = vmatprep.subr.bf16.mxu1 %v5168_v9  ;;  %4599 = vmatpush1.bf16.msra.mxu0 %v5909_v47  ;;  %v5923_v9 = vld [vmem:[#allocation12 + $0xc4] ss:$24 sps:$4 sm:$0xff]  }
 0x1aa   :  { %4600 = vmatprep.subr.bf16.mxu0 %v5914_v52 }
 0x1ac   :  { %1967 = vmatpush1.bf16.msra.mxu1 %v5167_v12  ;;  %v5264_v12 = vcombine.high %v405_v7, %v409_v8 }
 0x1ad   :  { %1968 = vmatprep.subr.bf16.mxu1 %v5176_v13  ;;  %4601 = vmatpush1.bf16.msra.mxu0 %v5912_v55  ;;  %v413_v13 = vld [vmem:[#allocation9 + $0x388] sm:$0xff] }
 0x1ae   :  { %4602 = vmatprep.subr.bf16.mxu0 %v5917_v59  ;;  %v5272_v18 = vcombine.high %v413_v13, %v417_v14  ;;  %v5271_v27 = vcombine.low %v413_v13, %v417_v14  ;;  %v489_v13 = vld [vmem:[#allocation9 + $0x5e8] sm:$0xff] }
 0x1af   :  { %v5953_v14 = vld [vmem:[#allocation12 + $0x2a4] ss:$24 sps:$4 sm:$0xff]  }
 0x1b0   :  { %1969 = vmatpush1.bf16.msra.mxu1 %v5175_v16  ;;  %v5263_v16 = vcombine.low %v405_v7, %v409_v8  ;;  %v481_v7 = vld [vmem:[#allocation9 + $0x5a8] sm:$0xff]  ;;  %v5950_v8 = vld [vmem:[#allocation12 + $0x274] ss:$24 sps:$4 sm:$0xff]  }
 0x1b1   :  { %1970 = vmatprep.subr.bf16.mxu1 %v5184_v17  ;;  %4603 = vmatpush1.bf16.msra.mxu0 %v5915_v61  ;;  %v5924_v17 = vld [vmem:[#allocation12 + $0xf0] ss:$24 sps:$4 sm:$0xff]  }
 0x1b2   :  { %4604 = vmatprep.subr.bf16.mxu0 %v5920_v2 }
 0x1b4   :  { %1971 = vmatpush1.bf16.msra.mxu1 %v5183_v23  ;;  %v425_v23 = vld [vmem:[#allocation9 + $0x3e8] sm:$0xff] }
 0x1b5   :  { %1972 = vmatprep.subr.bf16.mxu1 %v5192_v25  ;;  %4605 = vmatpush1.bf16.msra.mxu0 %v5918_v5  ;;  %v5929_v25 = vld [vmem:[#allocation12 + $0x124] ss:$24 sps:$4 sm:$0xff]  }
 0x1b6   :  { %4606 = vmatprep.subr.bf16.mxu0 %v5923_v9 }
 0x1b8   :  { %1973 = vmatpush1.bf16.msra.mxu1 %v5191_v29  ;;  %v5280_v29 = vcombine.high %v421_v21, %v425_v23 }
 0x1b9   :  { %1974 = vmatprep.subr.bf16.mxu1 %v5200_v30  ;;  %4607 = vmatpush1.bf16.msra.mxu0 %v5921_v11  ;;  %v429_v30 = vld [vmem:[#allocation9 + $0x408] sm:$0xff] }
 0x1ba   :  { %4608 = vmatprep.subr.bf16.mxu0 %v5926_v15  ;;  %v5288_v35 = vcombine.high %v429_v30, %v433_v31  ;;  %v5287_v39 = vcombine.low %v429_v30, %v433_v31  ;;  %v505_v30 = vld [vmem:[#allocation9 + $0x668] sm:$0xff] }
 0x1bc   :  { %1975 = vmatpush1.bf16.msra.mxu1 %v5199_v33  ;;  %v5279_v33 = vcombine.low %v421_v21, %v425_v23  ;;  %v497_v21 = vld [vmem:[#allocation9 + $0x628] sm:$0xff]  ;;  %v5956_v23 = vld [vmem:[#allocation12 + $0x2d4] ss:$24 sps:$4 sm:$0xff]  }
 0x1bd   :  { %1976 = vmatprep.subr.bf16.mxu1 %v5208_v34  ;;  %4609 = vmatpush1.bf16.msra.mxu0 %v5924_v17  ;;  %v5930_v34 = vld [vmem:[#allocation12 + $0x150] ss:$24 sps:$4 sm:$0xff]  }
 0x1be   :  { %4610 = vmatprep.subr.bf16.mxu0 %v5929_v25 }
 0x1c0   :  { %1977 = vmatpush1.bf16.msra.mxu1 %v5207_v37  ;;  %v441_v37 = vld [vmem:[#allocation9 + $0x468] sm:$0xff] }
 0x1c1   :  { %1978 = vmatprep.subr.bf16.mxu1 %v5216_v38  ;;  %4611 = vmatpush1.bf16.msra.mxu0 %v5927_v28  ;;  %v5935_v38 = vld [vmem:[#allocation12 + $0x184] ss:$24 sps:$4 sm:$0xff]   ;;  %v5295_v45 = vcombine.low %v437_v36, %v441_v37 }
 0x1c2   :  { %4612 = vmatprep.subr.bf16.mxu0 %v5932_v32 }
 0x1c4   :  { %1979 = vmatpush1.bf16.msra.mxu1 %v5215_v41  ;;  %v5296_v41 = vcombine.high %v437_v36, %v441_v37  ;;  %v517_v37 = vld [vmem:[#allocation9 + $0x6c8] sm:$0xff] }
 0x1c5   :  { %1980 = vmatprep.subr.bf16.mxu1 %v5224_v42  ;;  %4613 = vmatpush1.bf16.msra.mxu0 %v5930_v34  ;;  %v445_v42 = vld [vmem:[#allocation9 + $0x488] sm:$0xff] }
 0x1c6   :  { %4614 = vmatprep.subr.bf16.mxu0 %v5935_v38  ;;  %v5304_v47 = vcombine.high %v445_v42, %v449_v43  ;;  %v5303_v52 = vcombine.low %v445_v42, %v449_v43  ;;  %v513_v34 = vld [vmem:[#allocation9 + $0x6a8] sm:$0xff] }
 0x1c7   :  { %v521_v38 = vld [vmem:[#allocation9 + $0x6e8] sm:$0xff] }
 0x1c8   :  { %1981 = vmatpush1.bf16.msra.mxu1 %v5223_v46  ;;  %v5936_v46 = vld [vmem:[#allocation12 + $0x1b0] ss:$24 sps:$4 sm:$0xff]   ;;  %v529_v42 = vld [vmem:[#allocation9 + $0x728] sm:$0xff]  ;;  %v5375_v43 = vcombine.low %v517_v37, %v521_v38 }
 0x1c9   :  { %1982 = vmatprep.subr.bf16.mxu1 %v5232_v48  ;;  %4615 = vmatpush1.bf16.msra.mxu0 %v5933_v40  ;;  %v453_v48 = vld [vmem:[#allocation9 + $0x4c8] sm:$0xff]  ;;  %v5376_v40 = vcombine.high %v517_v37, %v521_v38  ;;  %v375_v38 = vld [vmem:[#allocation9 + $0x258] sm:$0xff] }
 0x1ca   :  { %4616 = vmatprep.subr.bf16.mxu0 %v5938_v44  ;;  %v5312_v55 = vcombine.high %v453_v48, %v457_v49  ;;  %v5311_v59 = vcombine.low %v453_v48, %v457_v49  ;;  %v541_v49 = vld [vmem:[#allocation9 + $0x788] sm:$0xff] }
 0x1cb   :  { %v5983_v37 = vld [vmem:[#allocation12 + $0x304] ss:$24 sps:$4 sm:$0xff]  }
 0x1cc   :  { %1983 = vmatpush1.bf16.msra.mxu1 %v5231_v53  ;;  %v5939_v53 = vld [vmem:[#allocation12 + $0x1e0] ss:$24 sps:$4 sm:$0xff]  }
 0x1cd   :  { %1984 = vmatprep.subr.bf16.mxu1 %v5240_v56  ;;  %4617 = vmatpush1.bf16.msra.mxu0 %v5936_v46  ;;  %v461_v56 = vld [vmem:[#allocation9 + $0x508] sm:$0xff] }
 0x1ce   :  { %4618 = vmatprep.subr.bf16.mxu0 %v5941_v51  ;;  %v5320_v61 = vcombine.high %v461_v56, %v465_v57  ;;  %v5319_v2 = vcombine.low %v461_v56, %v465_v57  ;;  %v537_v46 = vld [vmem:[#allocation9 + $0x768] sm:$0xff] }
 0x1cf   :  { %v545_v51 = vld [vmem:[#allocation9 + $0x7a8] sm:$0xff] }
 0x1d0   :  { %1985 = vmatpush1.bf16.msra.mxu1 %v5239_v60  ;;  %v5942_v60 = vld [vmem:[#allocation12 + $0x210] ss:$24 sps:$4 sm:$0xff]   ;;  %v553_v56 = vld [vmem:[#allocation9 + $0x7e8] sm:$0xff]  ;;  %v5399_v57 = vcombine.low %v541_v49, %v545_v51 }
 0x1d1   :  { %1986 = vmatprep.subr.bf16.mxu1 %v5248_v62  ;;  %4619 = vmatpush1.bf16.msra.mxu0 %v5939_v53  ;;  %v469_v62 = vld [vmem:[#allocation9 + $0x548] sm:$0xff]  ;;  %v5400_v53 = vcombine.high %v541_v49, %v545_v51  ;;  %v399_v51 = vld [vmem:[#allocation9 + $0x318] sm:$0xff] }
 0x1d2   :  { %4620 = vmatprep.subr.bf16.mxu0 %v5944_v58  ;;  %v5328_v5 = vcombine.high %v469_v62, %v473_v63  ;;  %v5327_v9 = vcombine.low %v469_v62, %v473_v63  ;;  %v311_v63 = vld [vmem:[#allocation9 + $0x58] sm:$0xff] }
 0x1d4   :  { %1987 = vmatpush1.bf16.msra.mxu1 %v5247_v3  ;;  %v5945_v3 = vld [vmem:[#allocation12 + $0x240] ss:$24 sps:$4 sm:$0xff]  }
 0x1d5   :  { %1988 = vmatprep.subr.bf16.mxu1 %v5256_v6  ;;  %4621 = vmatpush1.bf16.msra.mxu0 %v5942_v60  ;;  %v477_v6 = vld [vmem:[#allocation9 + $0x588] sm:$0xff]  ;;  %v307_v60 = vld [vmem:[#allocation9 + $0x38] sm:$0xff] }
 0x1d6   :  { %4622 = vmatprep.subr.bf16.mxu0 %v5947_v0  ;;  %v5336_v11 = vcombine.high %v477_v6, %v481_v7  ;;  %v5335_v15 = vcombine.low %v477_v6, %v481_v7  ;;  %v315_v0 = vld [vmem:[#allocation9 + $0x78] sm:$0xff] }
 0x1d7   :  { %v323_v6 = vld [vmem:[#allocation9 + $0xb8] sm:$0xff]  ;;  %v5171_v7 = vcombine.low %v311_v63, %v315_v0 }
 0x1d8   :  { %1989 = vmatpush1.bf16.msra.mxu1 %v5255_v10  ;;  %v5948_v10 = vld [vmem:[#allocation12 + $0x270] ss:$24 sps:$4 sm:$0xff]  }
 0x1d9   :  { %1990 = vmatprep.subr.bf16.mxu1 %v5264_v12  ;;  %4623 = vmatpush1.bf16.msra.mxu0 %v5945_v3  ;;  %v485_v12 = vld [vmem:[#allocation9 + $0x5c8] sm:$0xff]  ;;  %v5172_v3 = vcombine.high %v311_v63, %v315_v0  ;;  %v423_v0 = vld [vmem:[#allocation9 + $0x3d8] sm:$0xff] }
 0x1da   :  { %4624 = vmatprep.subr.bf16.mxu0 %v5950_v8  ;;  %v5344_v17 = vcombine.high %v485_v12, %v489_v13  ;;  %v5343_v25 = vcombine.low %v485_v12, %v489_v13  ;;  %v335_v13 = vld [vmem:[#allocation9 + $0x118] sm:$0xff] }
 0x1dc   :  { %1991 = vmatpush1.bf16.msra.mxu1 %v5263_v16  ;;  %v5951_v16 = vld [vmem:[#allocation12 + $0x2a0] ss:$24 sps:$4 sm:$0xff]  }
 0x1dd   :  { %1992 = vmatprep.subr.bf16.mxu1 %v5272_v18  ;;  %4625 = vmatpush1.bf16.msra.mxu0 %v5948_v10  ;;  %v493_v18 = vld [vmem:[#allocation9 + $0x608] sm:$0xff]  ;;  %v331_v10 = vld [vmem:[#allocation9 + $0xf8] sm:$0xff] }
 0x1de   :  { %4626 = vmatprep.subr.bf16.mxu0 %v5953_v14  ;;  %v5352_v28 = vcombine.high %v493_v18, %v497_v21  ;;  %v5351_v31 = vcombine.low %v493_v18, %v497_v21  ;;  %v339_v14 = vld [vmem:[#allocation9 + $0x138] sm:$0xff] }
 0x1df   :  { %v347_v18 = vld [vmem:[#allocation9 + $0x178] sm:$0xff]  ;;  %v5195_v21 = vcombine.low %v335_v13, %v339_v14 }
 0x1e0   :  { %1993 = vmatpush1.bf16.msra.mxu1 %v5271_v27  ;;  %v5954_v27 = vld [vmem:[#allocation12 + $0x2d0] ss:$24 sps:$4 sm:$0xff]  }
 0x1e1   :  { %1994 = vmatprep.subr.bf16.mxu1 %v5280_v29  ;;  %4627 = vmatpush1.bf16.msra.mxu0 %v5951_v16  ;;  %v501_v29 = vld [vmem:[#allocation9 + $0x648] sm:$0xff]  ;;  %v5196_v16 = vcombine.high %v335_v13, %v339_v14  ;;  %v447_v14 = vld [vmem:[#allocation9 + $0x498] sm:$0xff] }
 0x1e2   :  { %4628 = vmatprep.subr.bf16.mxu0 %v5956_v23  ;;  %v5360_v32 = vcombine.high %v501_v29, %v505_v30  ;;  %v351_v23 = vld [vmem:[#allocation9 + $0x198] sm:$0xff] }
 0x1e4   :  { %1995 = vmatpush1.bf16.msra.mxu1 %v5279_v33  ;;  %v509_v33 = vld [vmem:[#allocation9 + $0x688] sm:$0xff] }
 0x1e5   :  { %2007 = vmatprep.subr.bf16.mxu1 %v5288_v35  ;;  %4629 = vmatpush1.bf16.msra.mxu0 %v5954_v27  ;;  %v5359_v35 = vcombine.low %v501_v29, %v505_v30  ;;  %v5368_v36 = vcombine.high %v509_v33, %v513_v34  ;;  %v359_v29 = vld [vmem:[#allocation9 + $0x1d8] sm:$0xff] }
 0x1e6   :  { %v363_v30 = vld [vmem:[#allocation9 + $0x1f8] sm:$0xff]  ;;  %4641 = vmatprep.subr.bf16.mxu0 %v5983_v37 }
 0x1e7   :  { %1997 = vmatmul.mubr.bf16.vlgmr.msra.gmra.mrb[8].mxu1 %v6839_v50 }
 0x1e8   :  { %2008 = vmatpush1.bf16.msra.mxu1 %v5287_v39  ;;  %2039 = vmatprep.mubr.bf16.mxu1 %v6849_v4  ;;  %v5367_v39 = vcombine.low %v509_v33, %v513_v34  ;;  %v367_v33 = vld [vmem:[#allocation9 + $0x218] sm:$0xff] }
 0x1e9   :  { %2009 = vmatprep.subr.bf16.mxu1 %v5296_v41  ;;  %v525_v41 = vld [vmem:[#allocation9 + $0x708] sm:$0xff]  ;;  %v371_v34 = vld [vmem:[#allocation9 + $0x238] sm:$0xff] }
 0x1ea   :  { %v5384_v44 = vcombine.high %v525_v41, %v529_v42 }
 0x1ec   :  { %2010 = vmatpush1.bf16.msra.mxu1 %v5295_v45  ;;  %v533_v45 = vld [vmem:[#allocation9 + $0x748] sm:$0xff] }
 0x1ed   :  { %2011 = vmatprep.subr.bf16.mxu1 %v5304_v47  ;;  %v5383_v47 = vcombine.low %v525_v41, %v529_v42  ;;  %v5392_v48 = vcombine.high %v533_v45, %v537_v46  ;;  %v383_v42 = vld [vmem:[#allocation9 + $0x298] sm:$0xff] }
 0x1f0   :  { %2012 = vmatpush1.bf16.msra.mxu1 %v5303_v52  ;;  %v5391_v52 = vcombine.low %v533_v45, %v537_v46  ;;  %v391_v46 = vld [vmem:[#allocation9 + $0x2d8] sm:$0xff] }
 0x1f1   :  { %2013 = vmatprep.subr.bf16.mxu1 %v5312_v55  ;;  %v549_v55 = vld [vmem:[#allocation9 + $0x7c8] sm:$0xff] }
 0x1f2   :  { %v5408_v58 = vcombine.high %v549_v55, %v553_v56 }
 0x1f4   :  { %2014 = vmatpush1.bf16.msra.mxu1 %v5311_v59  ;;  %v303_v59 = vld [vmem:[#allocation9 + $0x18] sm:$0xff] }
 0x1f5   :  { %2015 = vmatprep.subr.bf16.mxu1 %v5320_v61  ;;  %v5407_v61 = vcombine.low %v549_v55, %v553_v56  ;;  %v5164_v62 = vcombine.high %v303_v59, %v307_v60  ;;  %v407_v56 = vld [vmem:[#allocation9 + $0x358] sm:$0xff] }
 0x1f8   :  { %2016 = vmatpush1.bf16.msra.mxu1 %v5319_v2  ;;  %v5163_v2 = vcombine.low %v303_v59, %v307_v60  ;;  %v415_v60 = vld [vmem:[#allocation9 + $0x398] sm:$0xff] }
 0x1f9   :  { %2017 = vmatprep.subr.bf16.mxu1 %v5328_v5  ;;  %v319_v5 = vld [vmem:[#allocation9 + $0x98] sm:$0xff] }
 0x1fa   :  { %v5180_v8 = vcombine.high %v319_v5, %v323_v6 }
 0x1fc   :  { %2018 = vmatpush1.bf16.msra.mxu1 %v5327_v9  ;;  %v327_v9 = vld [vmem:[#allocation9 + $0xd8] sm:$0xff] }
 0x1fd   :  { %2019 = vmatprep.subr.bf16.mxu1 %v5336_v11  ;;  %v5179_v11 = vcombine.low %v319_v5, %v323_v6  ;;  %v5188_v12 = vcombine.high %v327_v9, %v331_v10  ;;  %v431_v6 = vld [vmem:[#allocation9 + $0x418] sm:$0xff] }
 0x200   :  { %2020 = vmatpush1.bf16.msra.mxu1 %v5335_v15  ;;  %v5187_v15 = vcombine.low %v327_v9, %v331_v10  ;;  %v439_v10 = vld [vmem:[#allocation9 + $0x458] sm:$0xff] }
 0x201   :  { %2021 = vmatprep.subr.bf16.mxu1 %v5344_v17  ;;  %v343_v17 = vld [vmem:[#allocation9 + $0x158] sm:$0xff] }
 0x202   :  { %v5203_v27 = vcombine.low %v343_v17, %v347_v18 }
 0x204   :  { %2022 = vmatpush1.bf16.msra.mxu1 %v5343_v25  ;;  %v355_v25 = vld [vmem:[#allocation9 + $0x1b8] sm:$0xff] }
 0x205   :  { %2023 = vmatprep.subr.bf16.mxu1 %v5352_v28  ;;  %v5212_v28 = vcombine.high %v351_v23, %v355_v25 }
 0x208   :  { %2024 = vmatpush1.bf16.msra.mxu1 %v5351_v31  ;;  %v5211_v31 = vcombine.low %v351_v23, %v355_v25  ;;  %v463_v25 = vld [vmem:[#allocation9 + $0x518] sm:$0xff] }
 0x209   :  { %2025 = vmatprep.subr.bf16.mxu1 %v5360_v32  ;;  %v5220_v32 = vcombine.high %v359_v29, %v363_v30 }
 0x20c   :  { %2026 = vmatpush1.bf16.msra.mxu1 %v5359_v35  ;;  %v5219_v35 = vcombine.low %v359_v29, %v363_v30  ;;  %v471_v30 = vld [vmem:[#allocation9 + $0x558] sm:$0xff] }
 0x20d   :  { %2027 = vmatprep.subr.bf16.mxu1 %v5368_v36  ;;  %v5228_v36 = vcombine.high %v367_v33, %v371_v34 }
 0x210   :  { %2028 = vmatpush1.bf16.msra.mxu1 %v5367_v39  ;;  %v379_v39 = vld [vmem:[#allocation9 + $0x278] sm:$0xff] }
 0x211   :  { %2029 = vmatprep.subr.bf16.mxu1 %v5376_v40  ;;  %v5227_v40 = vcombine.low %v367_v33, %v371_v34  ;;  %v5236_v41 = vcombine.high %v375_v38, %v379_v39  ;;  %v580_v33 = vsub.s32 5, %v6821_v19 }
 0x214   :  { %2030 = vmatpush1.bf16.msra.mxu1 %v5375_v43  ;;  %v387_v43 = vld [vmem:[#allocation9 + $0x2b8] sm:$0xff] }
 0x215   :  { %2031 = vmatprep.subr.bf16.mxu1 %v5384_v44  ;;  %v5235_v44 = vcombine.low %v375_v38, %v379_v39  ;;  %v5244_v45 = vcombine.high %v383_v42, %v387_v43 }
 0x218   :  { %2032 = vmatpush1.bf16.msra.mxu1 %v5383_v47  ;;  %v395_v47 = vld [vmem:[#allocation9 + $0x2f8] sm:$0xff] }
 0x219   :  { %2033 = vmatprep.subr.bf16.mxu1 %v5392_v48  ;;  %v5243_v48 = vcombine.low %v383_v42, %v387_v43  ;;  %v5252_v49 = vcombine.high %v391_v46, %v395_v47 }
 0x21c   :  { %2034 = vmatpush1.bf16.msra.mxu1 %v5391_v52  ;;  %v403_v52 = vld [vmem:[#allocation9 + $0x338] sm:$0xff] }
 0x21d   :  { %2035 = vmatprep.subr.bf16.mxu1 %v5400_v53  ;;  %v5251_v53 = vcombine.low %v391_v46, %v395_v47  ;;  %v5260_v55 = vcombine.high %v399_v51, %v403_v52  ;;  %v491_v46 = vld [vmem:[#allocation9 + $0x5f8] sm:$0xff] }
 0x220   :  { %2036 = vmatpush1.bf16.msra.mxu1 %v5399_v57  ;;  %v411_v57 = vld [vmem:[#allocation9 + $0x378] sm:$0xff] }
 0x221   :  { %2037 = vmatprep.subr.bf16.mxu1 %v5408_v58  ;;  %v5259_v58 = vcombine.low %v399_v51, %v403_v52  ;;  %v5268_v59 = vcombine.high %v407_v56, %v411_v57 }
 0x224   :  { %2038 = vmatpush1.bf16.msra.mxu1 %v5407_v61  ;;  %v419_v61 = vld [vmem:[#allocation9 + $0x3b8] sm:$0xff] }
 0x225   :  { %2136 = vmatprep.subr.bf16.mxu1 %v5164_v62  ;;  %v5267_v62 = vcombine.low %v407_v56, %v411_v57  ;;  %v5276_v63 = vcombine.high %v415_v60, %v419_v61 }
 0x227   :  { %2040 = vmatmul.mubr.bf16.vlgmr.msra.gmra.mrb[8].mxu1 %v6847_v1 }
 0x228   :  { %2137 = vmatpush1.bf16.msra.mxu1 %v5163_v2  ;;  %2168 = vmatprep.mubr.bf16.mxu1 %v6841_v54  ;;  %v5204_v54 = vcombine.high %v343_v17, %v347_v18  ;;  %v427_v2 = vld [vmem:[#allocation9 + $0x3f8] sm:$0xff] }
 0x229   :  { %2138 = vmatprep.subr.bf16.mxu1 %v5172_v3  ;;  %v5275_v3 = vcombine.low %v415_v60, %v419_v61  ;;  %v5284_v5 = vcombine.high %v423_v0, %v427_v2  ;;  %v455_v18 = vld [vmem:[#allocation9 + $0x4d8] sm:$0xff] }
 0x22c   :  { %2139 = vmatpush1.bf16.msra.mxu1 %v5171_v7  ;;  %v435_v7 = vld [vmem:[#allocation9 + $0x438] sm:$0xff] }
 0x22d   :  { %2140 = vmatprep.subr.bf16.mxu1 %v5180_v8  ;;  %v5283_v8 = vcombine.low %v423_v0, %v427_v2  ;;  %v5292_v9 = vcombine.high %v431_v6, %v435_v7 }
 0x230   :  { %2141 = vmatpush1.bf16.msra.mxu1 %v5179_v11  ;;  %v443_v11 = vld [vmem:[#allocation9 + $0x478] sm:$0xff] }
 0x231   :  { %2142 = vmatprep.subr.bf16.mxu1 %v5188_v12  ;;  %v5291_v12 = vcombine.low %v431_v6, %v435_v7  ;;  %v5300_v13 = vcombine.high %v439_v10, %v443_v11 }
 0x234   :  { %2143 = vmatpush1.bf16.msra.mxu1 %v5187_v15  ;;  %v451_v15 = vld [vmem:[#allocation9 + $0x4b8] sm:$0xff] }
 0x235   :  { %2144 = vmatprep.subr.bf16.mxu1 %v5196_v16  ;;  %v5299_v16 = vcombine.low %v439_v10, %v443_v11  ;;  %v5308_v17 = vcombine.high %v447_v14, %v451_v15 }
 0x238   :  { %2145 = vmatpush1.bf16.msra.mxu1 %v5195_v21  ;;  %v459_v21 = vld [vmem:[#allocation9 + $0x4f8] sm:$0xff] }
 0x239   :  { %2146 = vmatprep.subr.bf16.mxu1 %v5204_v54  ;;  %v5307_v54 = vcombine.low %v447_v14, %v451_v15  ;;  %v5316_v23 = vcombine.high %v455_v18, %v459_v21 }
 0x23c   :  { %2147 = vmatpush1.bf16.msra.mxu1 %v5203_v27  ;;  %v467_v27 = vld [vmem:[#allocation9 + $0x538] sm:$0xff] }
 0x23d   :  { %2148 = vmatprep.subr.bf16.mxu1 %v5212_v28  ;;  %v5315_v28 = vcombine.low %v455_v18, %v459_v21  ;;  %v5324_v29 = vcombine.high %v463_v25, %v467_v27  ;;  %v503_v21 = vld [vmem:[#allocation9 + $0x658] sm:$0xff] }
 0x240   :  { %2149 = vmatpush1.bf16.msra.mxu1 %v5211_v31  ;;  %v576_v31 = vsub.s32 4, %v6821_v19 }
 0x241   :  { %2150 = vmatprep.subr.bf16.mxu1 %v5220_v32  ;;  %v6863_v32 = vld [vmem:[#allocation11] sm:$0xff] }
 0x242   :  { %v561_v37 = vrot.slane %v6863_v32, %v6824_v20  ;;  %v577_v38 = vrot.slane %v6863_v32, %v576_v31  ;;  %v565_v39 = vrot.slane %v6863_v32, %v6827_v22 }
 0x244   :  { %2151 = vmatpush1.bf16.msra.mxu1 %v5219_v35  ;;  %v479_v35 = vld [vmem:[#allocation9 + $0x598] sm:$0xff] }
 0x245   :  { %2152 = vmatprep.subr.bf16.mxu1 %v5228_v36  ;;  %v483_v36 = vld [vmem:[#allocation9 + $0x5b8] sm:$0xff] }
 0x246   :  { %v5340_v42 = vcombine.high %v479_v35, %v483_v36  ;;  %v5339_v57 = vcombine.low %v479_v35, %v483_v36  ;;  %v519_v36 = vld [vmem:[#allocation9 + $0x6d8] sm:$0xff] }
 0x248   :  { %2153 = vmatpush1.bf16.msra.mxu1 %v5227_v40  ;;  %v581_v40 = vrot.slane %v6863_v32, %v580_v33 }
 0x249   :  { %2154 = vmatprep.subr.bf16.mxu1 %v5236_v41 }
 0x24c   :  { %2155 = vmatpush1.bf16.msra.mxu1 %v5235_v44 }
 0x24d   :  { %2156 = vmatprep.subr.bf16.mxu1 %v5244_v45  ;;  %v487_v45 = vld [vmem:[#allocation9 + $0x5d8] sm:$0xff] }
 0x24e   :  { %v5347_v2 = vcombine.low %v487_v45, %v491_v46 }
 0x250   :  { %2157 = vmatpush1.bf16.msra.mxu1 %v5243_v48 }
 0x251   :  { %2158 = vmatprep.subr.bf16.mxu1 %v5252_v49 }
 0x254   :  { %2159 = vmatpush1.bf16.msra.mxu1 %v5251_v53 }
 0x255   :  { %2160 = vmatprep.subr.bf16.mxu1 %v5260_v55 }
 0x258   :  { %2161 = vmatpush1.bf16.msra.mxu1 %v5259_v58 }
 0x259   :  { %2162 = vmatprep.subr.bf16.mxu1 %v5268_v59 }
 0x25c   :  { %2163 = vmatpush1.bf16.msra.mxu1 %v5267_v62  ;;  %v5348_v62 = vcombine.high %v487_v45, %v491_v46  ;;  %v6007_v45 = vld [vmem:[#allocation12 + $0x3c4] ss:$24 sps:$4 sm:$0xff]  }
 0x25d   :  { %2164 = vmatprep.subr.bf16.mxu1 %v5276_v63 }
 0x260   :  { %2165 = vmatpush1.bf16.msra.mxu1 %v5275_v3  ;;  %v495_v3 = vld [vmem:[#allocation9 + $0x618] sm:$0xff] }
 0x261   :  { %2166 = vmatprep.subr.bf16.mxu1 %v5284_v5  ;;  %v499_v5 = vld [vmem:[#allocation9 + $0x638] sm:$0xff] }
 0x264   :  { %2167 = vmatpush1.bf16.msra.mxu1 %v5283_v8 }
 0x265   :  { %2179 = vmatprep.subr.bf16.mxu1 %v5292_v9 }
 0x267   :  { %2169 = vmatmul.mubr.bf16.vlgmr.msra.gmra.mrb[12].mxu1 %v6839_v50  ;;  %v475_v50 = vld [vmem:[#allocation9 + $0x578] sm:$0xff] }
 0x268   :  { %2180 = vmatpush1.bf16.msra.mxu1 %v5291_v12  ;;  %2211 = vmatprep.mubr.bf16.mxu1 %v6849_v4  ;;  %v5323_v4 = vcombine.low %v463_v25, %v467_v27  ;;  %v5332_v34 = vcombine.high %v471_v30, %v475_v50  ;;  %v5331_v41 = vcombine.low %v471_v30, %v475_v50  ;;  %v5989_v25 = vld [vmem:[#allocation12 + $0x334] ss:$24 sps:$4 sm:$0xff]   ;;  %v5987_v50 = vld [vmem:[#allocation12 + $0x330] ss:$24 sps:$4 sm:$0xff]  }
 0x269   :  { %2181 = vmatprep.subr.bf16.mxu1 %v5300_v13  ;;  %v5355_v27 = vcombine.low %v495_v3, %v499_v5  ;;  %v515_v30 = vld [vmem:[#allocation9 + $0x6b8] sm:$0xff] }
 0x26c   :  { %2182 = vmatpush1.bf16.msra.mxu1 %v5299_v16  ;;  %v5356_v16 = vcombine.high %v495_v3, %v499_v5 }
 0x26d   :  { %2183 = vmatprep.subr.bf16.mxu1 %v5308_v17 }
 0x270   :  { %2184 = vmatpush1.bf16.msra.mxu1 %v5307_v54  ;;  %v507_v54 = vld [vmem:[#allocation9 + $0x678] sm:$0xff] }
 0x271   :  { %2185 = vmatprep.subr.bf16.mxu1 %v5316_v23  ;;  %v5981_v23 = vld [vmem:[#allocation12 + $0x300] ss:$24 sps:$4 sm:$0xff]  }
 0x274   :  { %2186 = vmatpush1.bf16.msra.mxu1 %v5315_v28  ;;  %v5364_v28 = vcombine.high %v503_v21, %v507_v54 }
 0x275   :  { %2187 = vmatprep.subr.bf16.mxu1 %v5324_v29  ;;  %v511_v29 = vld [vmem:[#allocation9 + $0x698] sm:$0xff] }
 0x276   :  { %v5372_v35 = vcombine.high %v511_v29, %v515_v30 }
 0x278   :  { %2188 = vmatpush1.bf16.msra.mxu1 %v5323_v4  ;;  %v5995_v4 = vld [vmem:[#allocation12 + $0x364] ss:$24 sps:$4 sm:$0xff]  }
 0x279   :  { %2189 = vmatprep.subr.bf16.mxu1 %v5332_v34  ;;  %v5363_v34 = vcombine.low %v503_v21, %v507_v54  ;;  %v6043_v21 = vld [vmem:[#allocation12 + $0x4e4] ss:$24 sps:$4 sm:$0xff]   ;;  %v5960_v54 = vld [vmem:[#allocation12 + $0x38] ss:$24 sps:$4 sm:$0xff]  }
 0x27a   :  { %v1955_v43 = vpop.f32.mrb[4].mxu1  ;;  %v2127_v44 = vpop.f32.mrb[4].mxu0 }
 0x27b   :  { %v5797_v47 = vadd.f32 %v1955_v43, %v561_v37  ;;  %v5805_v48 = vadd.f32 %v2127_v44, %v577_v38  ;;  %v1957_v49 = vpop.f32.mrb[5].mxu1  ;;  %v2129_v51 = vpop.f32.mrb[5].mxu0  ;;  %v531_v43 = vld [vmem:[#allocation9 + $0x738] sm:$0xff] }
 0x27c   :  { %v5798_v52 = vadd.f32 %v1957_v49, %v565_v39  ;;  %v5806_v53 = vadd.f32 %v2129_v51, %v581_v40  ;;  %v1959_v55 = vpop.f32.mrb[6].mxu1  ;;  %v2131_v56 = vpop.f32.mrb[6].mxu0  ;;  %2190 = vmatpush1.bf16.msra.mxu1 %v5331_v41  ;;  %v5999_v44 = vld [vmem:[#allocation12 + $0x390] ss:$24 sps:$4 sm:$0xff]   ;;  %v6005_v51 = vld [vmem:[#allocation12 + $0x3c0] ss:$24 sps:$4 sm:$0xff]  }
 0x27d   :  { %v5799_v58 = vadd.f32 %v1959_v55, %v561_v37  ;;  %v5807_v59 = vadd.f32 %v2131_v56, %v577_v38  ;;  %v1961_v60 = vpop.f32.mrb[7].mxu1  ;;  %v2133_v61 = vpop.f32.mrb[7].mxu0  ;;  %2191 = vmatprep.subr.bf16.mxu1 %v5340_v42  ;;  %v2222_v6 = vmax.f32 %v5797_v47, 0.0  ;;  %v2226_v7 = vmax.f32 %v5805_v48, 0.0  ;;  %v523_v37 = vld [vmem:[#allocation9 + $0x6f8] sm:$0xff] }
 0x27e   :  { %v5800_v63 = vadd.f32 %v1961_v60, %v565_v39  ;;  %v5808_v0 = vadd.f32 %v2133_v61, %v581_v40  ;;  %v2223_v10 = vmax.f32 %v5798_v52, 0.0  ;;  %v2227_v11 = vmax.f32 %v5806_v53, 0.0  ;;  %v5993_v38 = vld [vmem:[#allocation12 + $0x360] ss:$24 sps:$4 sm:$0xff]   ;;  %v6001_v39 = vld [vmem:[#allocation12 + $0x394] ss:$24 sps:$4 sm:$0xff]  }
 0x27f   :  { %v2230_v8 = vmax.f32 %v5799_v58, 0.0  ;;  %v2234_v9 = vmax.f32 %v5807_v59, 0.0  ;;  %v5371_v40 = vcombine.low %v511_v29, %v515_v30  ;;  %v5380_v41 = vcombine.high %v519_v36, %v523_v37  ;;  %v527_v42 = vld [vmem:[#allocation9 + $0x718] sm:$0xff]  ;;  %v6019_v59 = vld [vmem:[#allocation12 + $0x424] ss:$24 sps:$4 sm:$0xff]  }
 0x280   :  { %v2231_v12 = vmax.f32 %v5800_v63, 0.0  ;;  %v2235_v13 = vmax.f32 %v5808_v0, 0.0  ;;  %2192 = vmatpush1.bf16.msra.mxu1 %v5339_v57  ;;  %v5379_v46 = vcombine.low %v519_v36, %v523_v37  ;;  %v5388_v47 = vcombine.high %v527_v42, %v531_v43  ;;  %v535_v48 = vld [vmem:[#allocation9 + $0x758] sm:$0xff]  ;;  %v6017_v0 = vld [vmem:[#allocation12 + $0x420] ss:$24 sps:$4 sm:$0xff]  }
 0x281   :  { %v6876_v14 = vpack.c.bf16 %v2230_v8, %v2222_v6  ;;  %v6878_v15 = vpack.c.bf16 %v2234_v9, %v2226_v7  ;;  %2193 = vmatprep.subr.bf16.mxu1 %v5348_v62  ;;  %v539_v49 = vld [vmem:[#allocation9 + $0x778] sm:$0xff]  ;;  %v5387_v53 = vcombine.low %v527_v42, %v531_v43  ;;  %v6031_v7 = vld [vmem:[#allocation12 + $0x484] ss:$24 sps:$4 sm:$0xff]   ;;  %v5969_v36 = vld [vmem:[#allocation12 + $0xc8] ss:$24 sps:$4 sm:$0xff]  }
 0x282   :  { %v6880_v17 = vpack.c.bf16 %v2231_v12, %v2223_v10  ;;  %v6882_v18 = vpack.c.bf16 %v2235_v13, %v2227_v11  ;;  %v6013_v52 = vld [vmem:[#allocation12 + $0x3f4] ss:$24 sps:$4 sm:$0xff]   ;;  %v5396_v55 = vcombine.high %v535_v48, %v539_v49  ;;  %v6011_v58 = vld [vmem:[#allocation12 + $0x3f0] ss:$24 sps:$4 sm:$0xff]   ;;  %v5395_v60 = vcombine.low %v535_v48, %v539_v49  ;;  %v6029_v10 = vld [vmem:[#allocation12 + $0x480] ss:$24 sps:$4 sm:$0xff]  }
 0x283   :  { %v543_v56 = vld [vmem:[#allocation9 + $0x798] sm:$0xff]  ;;  %v5959_v9 = vld [vmem:[#allocation12 + $0xc] ss:$24 sps:$4 sm:$0xff]   ;;  %v5957_v12 = vld [vmem:[#allocation12 + $0x8] ss:$24 sps:$4 sm:$0xff]  }
 0x284   :  { %2194 = vmatpush1.bf16.msra.mxu1 %v5347_v2  ;;  %4630 = vmatprep.mubr.bf16.mxu0 %v6880_v17  ;;  %v547_v57 = vld [vmem:[#allocation9 + $0x7b8] sm:$0xff]  ;;  %v6065_v42 = vld [vmem:[#allocation12 + $0x5a0] ss:$24 sps:$4 sm:$0xff]   ;;  %v5986_v49 = vld [vmem:[#allocation12 + $0x18c] ss:$24 sps:$4 sm:$0xff]  }
 0x285   :  { %4631 = vmatmul.mubr.bf16.vlgmr.msra.gmra.mrb[8].mxu0 %v6876_v14  ;;  %2195 = vmatprep.subr.bf16.mxu1 %v5356_v16  ;;  %v5404_v61 = vcombine.high %v543_v56, %v547_v57  ;;  %v551_v62 = vld [vmem:[#allocation9 + $0x7d8] sm:$0xff]  ;;  %v5403_v3 = vcombine.low %v543_v56, %v547_v57  ;;  %v5996_v56 = vld [vmem:[#allocation12 + $0x1e8] ss:$24 sps:$4 sm:$0xff]  }
 0x286   :  { %4642 = vmatpush1.bf16.msra.mxu0 %v5981_v23  ;;  %v555_v63 = vld [vmem:[#allocation9 + $0x7f8] sm:$0xff]  ;;  %v5965_v23 = vld [vmem:[#allocation12 + $0x6c] ss:$24 sps:$4 sm:$0xff]  }
 0x287   :  { %4643 = vmatprep.subr.bf16.mxu0 %v5989_v25  ;;  %v6025_v2 = vld [vmem:[#allocation12 + $0x454] ss:$24 sps:$4 sm:$0xff]   ;;  %v5412_v5 = vcombine.high %v551_v62, %v555_v63  ;;  %v6023_v6 = vld [vmem:[#allocation12 + $0x450] ss:$24 sps:$4 sm:$0xff]   ;;  %v5411_v8 = vcombine.low %v551_v62, %v555_v63  ;;  %v6041_v25 = vld [vmem:[#allocation12 + $0x4e0] ss:$24 sps:$4 sm:$0xff]  }
 0x288   :  { %2196 = vmatpush1.bf16.msra.mxu1 %v5355_v27  ;;  %v6037_v11 = vld [vmem:[#allocation12 + $0x4b4] ss:$24 sps:$4 sm:$0xff]   ;;  %v6035_v16 = vld [vmem:[#allocation12 + $0x4b0] ss:$24 sps:$4 sm:$0xff]  }
 0x289   :  { %2197 = vmatprep.subr.bf16.mxu1 %v5364_v28  ;;  %v5962_v13 = vld [vmem:[#allocation12 + $0x3c] ss:$24 sps:$4 sm:$0xff]   ;;  %v5963_v28 = vld [vmem:[#allocation12 + $0x68] ss:$24 sps:$4 sm:$0xff]   ;;  %v5978_v48 = vld [vmem:[#allocation12 + $0x158] ss:$24 sps:$4 sm:$0xff]  }
 0x28a   :  { %4644 = vmatpush1.bf16.msra.mxu0 %v5987_v50  ;;  %v6049_v27 = vld [vmem:[#allocation12 + $0x514] ss:$24 sps:$4 sm:$0xff]   ;;  %v6047_v30 = vld [vmem:[#allocation12 + $0x510] ss:$24 sps:$4 sm:$0xff]  }
 0x28b   :  { %4645 = vmatprep.subr.bf16.mxu0 %v5995_v4  ;;  %v5968_v29 = vld [vmem:[#allocation12 + $0x9c] ss:$24 sps:$4 sm:$0xff]   ;;  %v5966_v50 = vld [vmem:[#allocation12 + $0x98] ss:$24 sps:$4 sm:$0xff]   ;;  %v5971_v4 = vld [vmem:[#allocation12 + $0xcc] ss:$24 sps:$4 sm:$0xff]  }
 0x28c   :  { %2198 = vmatpush1.bf16.msra.mxu1 %v5363_v34  ;;  %v6053_v34 = vld [vmem:[#allocation12 + $0x540] ss:$24 sps:$4 sm:$0xff]   ;;  %v5974_v37 = vld [vmem:[#allocation12 + $0xfc] ss:$24 sps:$4 sm:$0xff]   ;;  %v6022_v63 = vld [vmem:[#allocation12 + $0x2ac] ss:$24 sps:$4 sm:$0xff]  }
 0x28d   :  { %2199 = vmatprep.subr.bf16.mxu1 %v5372_v35  ;;  %v6061_v35 = vld [vmem:[#allocation12 + $0x574] ss:$24 sps:$4 sm:$0xff]   ;;  %v6014_v62 = vld [vmem:[#allocation12 + $0x278] ss:$24 sps:$4 sm:$0xff]  }
 0x28e   :  { %4646 = vmatpush1.bf16.msra.mxu0 %v5993_v38  ;;  %v6059_v38 = vld [vmem:[#allocation12 + $0x570] ss:$24 sps:$4 sm:$0xff]   ;;  %v6073_v43 = vld [vmem:[#allocation12 + $0x5d4] ss:$24 sps:$4 sm:$0xff]  }
 0x28f   :  { %4647 = vmatprep.subr.bf16.mxu0 %v6001_v39  ;;  %v6067_v39 = vld [vmem:[#allocation12 + $0x5a4] ss:$24 sps:$4 sm:$0xff]  }
 0x290   :  { %2200 = vmatpush1.bf16.msra.mxu1 %v5371_v40  ;;  %v5972_v40 = vld [vmem:[#allocation12 + $0xf8] ss:$24 sps:$4 sm:$0xff]   ;;  %v6004_v57 = vld [vmem:[#allocation12 + $0x21c] ss:$24 sps:$4 sm:$0xff]  }
 0x291   :  { %2201 = vmatprep.subr.bf16.mxu1 %v5380_v41  ;;  %v5977_v41 = vld [vmem:[#allocation12 + $0x12c] ss:$24 sps:$4 sm:$0xff]  }
 0x292   :  { %4648 = vmatpush1.bf16.msra.mxu0 %v5999_v44  ;;  %v5975_v44 = vld [vmem:[#allocation12 + $0x128] ss:$24 sps:$4 sm:$0xff]  }
 0x293   :  { %4649 = vmatprep.subr.bf16.mxu0 %v6007_v45  ;;  %v5980_v45 = vld [vmem:[#allocation12 + $0x15c] ss:$24 sps:$4 sm:$0xff]  }
 0x294   :  { %2202 = vmatpush1.bf16.msra.mxu1 %v5379_v46  ;;  %v6071_v46 = vld [vmem:[#allocation12 + $0x5d0] ss:$24 sps:$4 sm:$0xff]  }
 0x295   :  { %2203 = vmatprep.subr.bf16.mxu1 %v5388_v47  ;;  %v6079_v47 = vld [vmem:[#allocation12 + $0x604] ss:$24 sps:$4 sm:$0xff]  }
 0x296   :  { %4650 = vmatpush1.bf16.msra.mxu0 %v6005_v51  ;;  %v5984_v51 = vld [vmem:[#allocation12 + $0x188] ss:$24 sps:$4 sm:$0xff]  }
 0x297   :  { %4651 = vmatprep.subr.bf16.mxu0 %v6013_v52  ;;  %v5992_v52 = vld [vmem:[#allocation12 + $0x1bc] ss:$24 sps:$4 sm:$0xff]  }
 0x298   :  { %2204 = vmatpush1.bf16.msra.mxu1 %v5387_v53  ;;  %v5990_v53 = vld [vmem:[#allocation12 + $0x1b8] ss:$24 sps:$4 sm:$0xff]  }
 0x299   :  { %2205 = vmatprep.subr.bf16.mxu1 %v5396_v55  ;;  %v5998_v55 = vld [vmem:[#allocation12 + $0x1ec] ss:$24 sps:$4 sm:$0xff]  }
 0x29a   :  { %4652 = vmatpush1.bf16.msra.mxu0 %v6011_v58  ;;  %v6002_v58 = vld [vmem:[#allocation12 + $0x218] ss:$24 sps:$4 sm:$0xff]  }
 0x29b   :  { %4653 = vmatprep.subr.bf16.mxu0 %v6019_v59  ;;  %v6010_v59 = vld [vmem:[#allocation12 + $0x24c] ss:$24 sps:$4 sm:$0xff]  }
 0x29c   :  { %2206 = vmatpush1.bf16.msra.mxu1 %v5395_v60  ;;  %v6008_v60 = vld [vmem:[#allocation12 + $0x248] ss:$24 sps:$4 sm:$0xff]  }
 0x29d   :  { %2207 = vmatprep.subr.bf16.mxu1 %v5404_v61  ;;  %v6016_v61 = vld [vmem:[#allocation12 + $0x27c] ss:$24 sps:$4 sm:$0xff]  }
 0x29e   :  { %4654 = vmatpush1.bf16.msra.mxu0 %v6017_v0  ;;  %v6020_v0 = vld [vmem:[#allocation12 + $0x2a8] ss:$24 sps:$4 sm:$0xff]  }
 0x29f   :  { %4655 = vmatprep.subr.bf16.mxu0 %v6025_v2  ;;  %v6028_v2 = vld [vmem:[#allocation12 + $0x2dc] ss:$24 sps:$4 sm:$0xff]  }
 0x2a0   :  { %2208 = vmatpush1.bf16.msra.mxu1 %v5403_v3  ;;  %v6026_v3 = vld [vmem:[#allocation12 + $0x2d8] ss:$24 sps:$4 sm:$0xff]  }
 0x2a1   :  { %2209 = vmatprep.subr.bf16.mxu1 %v5412_v5  ;;  %v6034_v5 = vld [vmem:[#allocation12 + $0x30c] ss:$24 sps:$4 sm:$0xff]  }
 0x2a2   :  { %4656 = vmatpush1.bf16.msra.mxu0 %v6023_v6  ;;  %v6032_v6 = vld [vmem:[#allocation12 + $0x308] ss:$24 sps:$4 sm:$0xff]  }
 0x2a3   :  { %4657 = vmatprep.subr.bf16.mxu0 %v6031_v7  ;;  %v6040_v7 = vld [vmem:[#allocation12 + $0x33c] ss:$24 sps:$4 sm:$0xff]  }
 0x2a4   :  { %2210 = vmatpush1.bf16.msra.mxu1 %v5411_v8  ;;  %v6038_v8 = vld [vmem:[#allocation12 + $0x338] ss:$24 sps:$4 sm:$0xff]  }
 0x2a5   :  { %4770 = vmatprep.subr.bf16.mxu1 %v5959_v9  ;;  %v6046_v9 = vld [vmem:[#allocation12 + $0x36c] ss:$24 sps:$4 sm:$0xff]  }
 0x2a6   :  { %4658 = vmatpush1.bf16.msra.mxu0 %v6029_v10  ;;  %v6044_v10 = vld [vmem:[#allocation12 + $0x368] ss:$24 sps:$4 sm:$0xff]  }
 0x2a7   :  { %2212 = vmatmul.mubr.bf16.vlgmr.msra.gmra.mrb[12].mxu1 %v6847_v1  ;;  %4659 = vmatprep.subr.bf16.mxu0 %v6037_v11  ;;  %v6055_v1 = vld [vmem:[#allocation12 + $0x544] ss:$24 sps:$4 sm:$0xff]  }
 0x2a8   :  { %4771 = vmatpush1.bf16.msra.mxu1 %v5957_v12  ;;  %4802 = vmatprep.mubr.bf16.mxu1 %v6880_v17  ;;  %v6052_v11 = vld [vmem:[#allocation12 + $0x39c] ss:$24 sps:$4 sm:$0xff]   ;;  %v6050_v12 = vld [vmem:[#allocation12 + $0x398] ss:$24 sps:$4 sm:$0xff]  }
 0x2a9   :  { %4772 = vmatprep.subr.bf16.mxu1 %v5962_v13  ;;  %v6058_v13 = vld [vmem:[#allocation12 + $0x3cc] ss:$24 sps:$4 sm:$0xff]  }
 0x2aa   :  { %4660 = vmatpush1.bf16.msra.mxu0 %v6035_v16  ;;  %v6056_v16 = vld [vmem:[#allocation12 + $0x3c8] ss:$24 sps:$4 sm:$0xff]  }
 0x2ab   :  { %4661 = vmatprep.subr.bf16.mxu0 %v6043_v21  ;;  %v6064_v21 = vld [vmem:[#allocation12 + $0x3fc] ss:$24 sps:$4 sm:$0xff]  }
 0x2ac   :  { %4773 = vmatpush1.bf16.msra.mxu1 %v5960_v54  ;;  %v569_v54 = vrot.slane %v6863_v32, %v6831_v24 }
 0x2ad   :  { %4774 = vmatprep.subr.bf16.mxu1 %v5965_v23  ;;  %v573_v23 = vrot.slane %v6863_v32, %v6835_v26  ;;  %v6074_v32 = vld [vmem:[#allocation12 + $0x458] ss:$24 sps:$4 sm:$0xff]  }
 0x2ae   :  { %4662 = vmatpush1.bf16.msra.mxu0 %v6041_v25  ;;  %v6062_v25 = vld [vmem:[#allocation12 + $0x3f8] ss:$24 sps:$4 sm:$0xff]  }
 0x2af   :  { %4663 = vmatprep.subr.bf16.mxu0 %v6049_v27  ;;  %v6070_v27 = vld [vmem:[#allocation12 + $0x42c] ss:$24 sps:$4 sm:$0xff]  }
 0x2b0   :  { %4775 = vmatpush1.bf16.msra.mxu1 %v5963_v28 }
 0x2b1   :  { %4776 = vmatprep.subr.bf16.mxu1 %v5968_v29 }
 0x2b2   :  { %4664 = vmatpush1.bf16.msra.mxu0 %v6047_v30 }
 0x2b3   :  { %4665 = vmatprep.subr.bf16.mxu0 %v6055_v1 }
 0x2b4   :  { %4777 = vmatpush1.bf16.msra.mxu1 %v5966_v50 }
 0x2b5   :  { %4778 = vmatprep.subr.bf16.mxu1 %v5971_v4  ;;  %v6068_v4 = vld [vmem:[#allocation12 + $0x428] ss:$24 sps:$4 sm:$0xff]  }
 0x2b6   :  { %4666 = vmatpush1.bf16.msra.mxu0 %v6053_v34 }
 0x2b7   :  { %4667 = vmatprep.subr.bf16.mxu0 %v6061_v35 }
 0x2b8   :  { %4779 = vmatpush1.bf16.msra.mxu1 %v5969_v36  ;;  %v6076_v36 = vld [vmem:[#allocation12 + $0x45c] ss:$24 sps:$4 sm:$0xff]  }
 0x2b9   :  { %4780 = vmatprep.subr.bf16.mxu1 %v5974_v37 }
 0x2ba   :  { %4668 = vmatpush1.bf16.msra.mxu0 %v6059_v38 }
 0x2bb   :  { %4669 = vmatprep.subr.bf16.mxu0 %v6067_v39 }
 0x2bc   :  { %4781 = vmatpush1.bf16.msra.mxu1 %v5972_v40 }
 0x2bd   :  { %4782 = vmatprep.subr.bf16.mxu1 %v5977_v41 }
 0x2be   :  { %4670 = vmatpush1.bf16.msra.mxu0 %v6065_v42 }
 0x2bf   :  { %4671 = vmatprep.subr.bf16.mxu0 %v6073_v43 }
 0x2c0   :  { %4783 = vmatpush1.bf16.msra.mxu1 %v5975_v44  ;;  %v6077_v44 = vld [vmem:[#allocation12 + $0x600] ss:$24 sps:$4 sm:$0xff]  }
 0x2c1   :  { %4784 = vmatprep.subr.bf16.mxu1 %v5980_v45  ;;  %v6082_v45 = vld [vmem:[#allocation12 + $0x48c] ss:$24 sps:$4 sm:$0xff]  }
 0x2c2   :  { %4672 = vmatpush1.bf16.msra.mxu0 %v6071_v46  ;;  %v6085_v46 = vld [vmem:[#allocation12 + $0x634] ss:$24 sps:$4 sm:$0xff]  }
 0x2c3   :  { %4684 = vmatprep.subr.bf16.mxu0 %v6079_v47  ;;  %v6080_v47 = vld [vmem:[#allocation12 + $0x488] ss:$24 sps:$4 sm:$0xff]  }
 0x2c4   :  { %4785 = vmatpush1.bf16.msra.mxu1 %v5978_v48  ;;  %v6088_v48 = vld [vmem:[#allocation12 + $0x4bc] ss:$24 sps:$4 sm:$0xff]  }
 0x2c5   :  { %4786 = vmatprep.subr.bf16.mxu1 %v5986_v49  ;;  %v6083_v49 = vld [vmem:[#allocation12 + $0x630] ss:$24 sps:$4 sm:$0xff]  }
 0x2c8   :  { %4787 = vmatpush1.bf16.msra.mxu1 %v5984_v51  ;;  %v6091_v51 = vld [vmem:[#allocation12 + $0x664] ss:$24 sps:$4 sm:$0xff]  }
 0x2c9   :  { %4788 = vmatprep.subr.bf16.mxu1 %v5992_v52  ;;  %v6086_v52 = vld [vmem:[#allocation12 + $0x4b8] ss:$24 sps:$4 sm:$0xff]  }
 0x2cc   :  { %4789 = vmatpush1.bf16.msra.mxu1 %v5990_v53  ;;  %v6094_v53 = vld [vmem:[#allocation12 + $0x4ec] ss:$24 sps:$4 sm:$0xff]  }
 0x2cd   :  { %4790 = vmatprep.subr.bf16.mxu1 %v5998_v55  ;;  %v6089_v55 = vld [vmem:[#allocation12 + $0x660] ss:$24 sps:$4 sm:$0xff]  }
 0x2d0   :  { %4791 = vmatpush1.bf16.msra.mxu1 %v5996_v56  ;;  %v6097_v56 = vld [vmem:[#allocation12 + $0x694] ss:$24 sps:$4 sm:$0xff]  }
 0x2d1   :  { %4792 = vmatprep.subr.bf16.mxu1 %v6004_v57  ;;  %v6092_v57 = vld [vmem:[#allocation12 + $0x4e8] ss:$24 sps:$4 sm:$0xff]  }
 0x2d4   :  { %4793 = vmatpush1.bf16.msra.mxu1 %v6002_v58  ;;  %v6100_v58 = vld [vmem:[#allocation12 + $0x51c] ss:$24 sps:$4 sm:$0xff]  }
 0x2d5   :  { %4794 = vmatprep.subr.bf16.mxu1 %v6010_v59  ;;  %v6095_v59 = vld [vmem:[#allocation12 + $0x690] ss:$24 sps:$4 sm:$0xff]  }
 0x2d8   :  { %4795 = vmatpush1.bf16.msra.mxu1 %v6008_v60  ;;  %v6103_v60 = vld [vmem:[#allocation12 + $0x6c4] ss:$24 sps:$4 sm:$0xff]  }
 0x2d9   :  { %4796 = vmatprep.subr.bf16.mxu1 %v6016_v61  ;;  %v6098_v61 = vld [vmem:[#allocation12 + $0x518] ss:$24 sps:$4 sm:$0xff]  }
 0x2dc   :  { %4797 = vmatpush1.bf16.msra.mxu1 %v6014_v62  ;;  %v6106_v62 = vld [vmem:[#allocation12 + $0x54c] ss:$24 sps:$4 sm:$0xff]  }
 0x2dd   :  { %4798 = vmatprep.subr.bf16.mxu1 %v6022_v63  ;;  %v6101_v63 = vld [vmem:[#allocation12 + $0x6c0] ss:$24 sps:$4 sm:$0xff]  }
 0x2e0   :  { %4799 = vmatpush1.bf16.msra.mxu1 %v6020_v0  ;;  %v6109_v0 = vld [vmem:[#allocation12 + $0x6f4] ss:$24 sps:$4 sm:$0xff]  }
 0x2e1   :  { %4800 = vmatprep.subr.bf16.mxu1 %v6028_v2  ;;  %v6104_v2 = vld [vmem:[#allocation12 + $0x548] ss:$24 sps:$4 sm:$0xff]  }
 0x2e4   :  { %4801 = vmatpush1.bf16.msra.mxu1 %v6026_v3  ;;  %v6112_v3 = vld [vmem:[#allocation12 + $0x57c] ss:$24 sps:$4 sm:$0xff]  }
 0x2e5   :  { %4813 = vmatprep.subr.bf16.mxu1 %v6034_v5  ;;  %v6107_v5 = vld [vmem:[#allocation12 + $0x6f0] ss:$24 sps:$4 sm:$0xff]  }
 0x2e7   :  { %4803 = vmatmul.mubr.bf16.vlgmr.msra.gmra.mrb[16].mxu1 %v6876_v14 }
 0x2e8   :  { %4814 = vmatpush1.bf16.msra.mxu1 %v6032_v6  ;;  %v6115_v6 = vld [vmem:[#allocation12 + $0x724] ss:$24 sps:$4 sm:$0xff]  }
 0x2e9   :  { %4815 = vmatprep.subr.bf16.mxu1 %v6040_v7  ;;  %v6110_v7 = vld [vmem:[#allocation12 + $0x578] ss:$24 sps:$4 sm:$0xff]  }
 0x2ec   :  { %4816 = vmatpush1.bf16.msra.mxu1 %v6038_v8  ;;  %v6118_v8 = vld [vmem:[#allocation12 + $0x5ac] ss:$24 sps:$4 sm:$0xff]  }
 0x2ed   :  { %4817 = vmatprep.subr.bf16.mxu1 %v6046_v9  ;;  %v6113_v9 = vld [vmem:[#allocation12 + $0x720] ss:$24 sps:$4 sm:$0xff]  }
 0x2f0   :  { %4818 = vmatpush1.bf16.msra.mxu1 %v6044_v10  ;;  %v6121_v10 = vld [vmem:[#allocation12 + $0x754] ss:$24 sps:$4 sm:$0xff]  }
 0x2f1   :  { %4819 = vmatprep.subr.bf16.mxu1 %v6052_v11  ;;  %v6116_v11 = vld [vmem:[#allocation12 + $0x5a8] ss:$24 sps:$4 sm:$0xff]  }
 0x2f4   :  { %4820 = vmatpush1.bf16.msra.mxu1 %v6050_v12  ;;  %v6124_v12 = vld [vmem:[#allocation12 + $0x5dc] ss:$24 sps:$4 sm:$0xff]  }
 0x2f5   :  { %4821 = vmatprep.subr.bf16.mxu1 %v6058_v13  ;;  %v6119_v13 = vld [vmem:[#allocation12 + $0x750] ss:$24 sps:$4 sm:$0xff]  }
 0x2f8   :  { %4822 = vmatpush1.bf16.msra.mxu1 %v6056_v16  ;;  %v6127_v16 = vld [vmem:[#allocation12 + $0x784] ss:$24 sps:$4 sm:$0xff]  }
 0x2f9   :  { %4823 = vmatprep.subr.bf16.mxu1 %v6064_v21  ;;  %v6122_v21 = vld [vmem:[#allocation12 + $0x5d8] ss:$24 sps:$4 sm:$0xff]  }
 0x2fa   :  { %v2041_v28 = vpop.f32.mrb[8].mxu1 }
 0x2fb   :  { %v5801_v29 = vadd.f32 %v2041_v28, %v569_v54  ;;  %v2043_v30 = vpop.f32.mrb[9].mxu1  ;;  %v6136_v28 = vld [vmem:[#allocation12 + $0x63c] ss:$24 sps:$4 sm:$0xff]  }
 0x2fc   :  { %v5802_v1 = vadd.f32 %v2043_v30, %v573_v23  ;;  %v2045_v50 = vpop.f32.mrb[10].mxu1  ;;  %4824 = vmatpush1.bf16.msra.mxu1 %v6062_v25  ;;  %v6133_v25 = vld [vmem:[#allocation12 + $0x7b4] ss:$24 sps:$4 sm:$0xff]   ;;  %v6139_v30 = vld [vmem:[#allocation12 + $0x7e4] ss:$24 sps:$4 sm:$0xff]  }
 0x2fd   :  { %v5803_v34 = vadd.f32 %v2045_v50, %v569_v54  ;;  %v2047_v35 = vpop.f32.mrb[11].mxu1  ;;  %4825 = vmatprep.subr.bf16.mxu1 %v6070_v27  ;;  %v2224_v38 = vmax.f32 %v5801_v29, 0.0  ;;  %v6130_v54 = vld [vmem:[#allocation12 + $0x60c] ss:$24 sps:$4 sm:$0xff]   ;;  %v6128_v27 = vld [vmem:[#allocation12 + $0x608] ss:$24 sps:$4 sm:$0xff]  }
 0x2fe   :  { %v5804_v37 = vadd.f32 %v2047_v35, %v573_v23  ;;  %v2225_v40 = vmax.f32 %v5802_v1, 0.0  ;;  %v6125_v23 = vld [vmem:[#allocation12 + $0x780] ss:$24 sps:$4 sm:$0xff]   ;;  %v6131_v29 = vld [vmem:[#allocation12 + $0x7b0] ss:$24 sps:$4 sm:$0xff]  }
 0x2ff   :  { %v2232_v39 = vmax.f32 %v5803_v34, 0.0  ;;  %v6134_v1 = vld [vmem:[#allocation12 + $0x638] ss:$24 sps:$4 sm:$0xff]   ;;  %v6142_v50 = vld [vmem:[#allocation12 + $0x66c] ss:$24 sps:$4 sm:$0xff]  }
 0x300   :  { %v2233_v41 = vmax.f32 %v5804_v37, 0.0  ;;  %4826 = vmatpush1.bf16.msra.mxu1 %v6068_v4  ;;  %v6137_v4 = vld [vmem:[#allocation12 + $0x7e0] ss:$24 sps:$4 sm:$0xff]   ;;  %v6145_v34 = vld [vmem:[#allocation12 + $0x814] ss:$24 sps:$4 sm:$0xff]  }
 0x301   :  { %v6893_v42 = vpack.c.bf16 %v2232_v39, %v2224_v38  ;;  %4827 = vmatprep.subr.bf16.mxu1 %v6076_v36  ;;  %v6140_v35 = vld [vmem:[#allocation12 + $0x668] ss:$24 sps:$4 sm:$0xff]   ;;  %v6148_v36 = vld [vmem:[#allocation12 + $0x69c] ss:$24 sps:$4 sm:$0xff]   ;;  %v6146_v39 = vld [vmem:[#allocation12 + $0x698] ss:$24 sps:$4 sm:$0xff]  }
 0x302   :  { %v6895_v43 = vpack.c.bf16 %v2233_v41, %v2225_v40  ;;  %v6143_v37 = vld [vmem:[#allocation12 + $0x810] ss:$24 sps:$4 sm:$0xff]   ;;  %v6151_v38 = vld [vmem:[#allocation12 + $0x844] ss:$24 sps:$4 sm:$0xff]   ;;  %v6149_v41 = vld [vmem:[#allocation12 + $0x840] ss:$24 sps:$4 sm:$0xff]  }
 0x303   :  { %v6154_v40 = vld [vmem:[#allocation12 + $0x6cc] ss:$24 sps:$4 sm:$0xff]  }
 0x304   :  { %4673 = vmatprep.mubr.bf16.mxu0 %v6895_v43  ;;  %4828 = vmatpush1.bf16.msra.mxu1 %v6074_v32  ;;  %v6157_v32 = vld [vmem:[#allocation12 + $0x874] ss:$24 sps:$4 sm:$0xff]  }
 0x305   :  { %4845 = vmatprep.mubr.bf16.mxu1 %v6895_v43  ;;  %4674 = vmatmul.mubr.bf16.vlgmr.msra.gmra.mrb[8].mxu0 %v6893_v42 }
 0x306   :  { %4685 = vmatpush1.bf16.msra.mxu0 %v6077_v44  ;;  %4716 = vmatprep.mubr.bf16.mxu0 %v6882_v18  ;;  %v6152_v44 = vld [vmem:[#allocation12 + $0x6c8] ss:$24 sps:$4 sm:$0xff]  }
 0x307   :  { %4829 = vmatprep.subr.bf16.mxu1 %v6082_v45  ;;  %4686 = vmatprep.subr.bf16.mxu0 %v6085_v46  ;;  %v6160_v45 = vld [vmem:[#allocation12 + $0x6fc] ss:$24 sps:$4 sm:$0xff]   ;;  %v6155_v46 = vld [vmem:[#allocation12 + $0x870] ss:$24 sps:$4 sm:$0xff]  }
 0x308   :  { %4830 = vmatpush1.bf16.msra.mxu1 %v6080_v47  ;;  %v6163_v47 = vld [vmem:[#allocation12 + $0x8a4] ss:$24 sps:$4 sm:$0xff]  }
 0x309   :  { %4831 = vmatprep.subr.bf16.mxu1 %v6088_v48  ;;  %v6158_v48 = vld [vmem:[#allocation12 + $0x6f8] ss:$24 sps:$4 sm:$0xff]  }
 0x30a   :  { %4687 = vmatpush1.bf16.msra.mxu0 %v6083_v49  ;;  %v6166_v49 = vld [vmem:[#allocation12 + $0x72c] ss:$24 sps:$4 sm:$0xff]  }
 0x30b   :  { %4688 = vmatprep.subr.bf16.mxu0 %v6091_v51  ;;  %v6161_v51 = vld [vmem:[#allocation12 + $0x8a0] ss:$24 sps:$4 sm:$0xff]  }
 0x30c   :  { %4832 = vmatpush1.bf16.msra.mxu1 %v6086_v52  ;;  %v6169_v52 = vld [vmem:[#allocation12 + $0x8d4] ss:$24 sps:$4 sm:$0xff]  }
 0x30d   :  { %4833 = vmatprep.subr.bf16.mxu1 %v6094_v53  ;;  %v6164_v53 = vld [vmem:[#allocation12 + $0x728] ss:$24 sps:$4 sm:$0xff]  }
 0x30e   :  { %4689 = vmatpush1.bf16.msra.mxu0 %v6089_v55  ;;  %v6172_v55 = vld [vmem:[#allocation12 + $0x75c] ss:$24 sps:$4 sm:$0xff]  }
 0x30f   :  { %4690 = vmatprep.subr.bf16.mxu0 %v6097_v56  ;;  %v6167_v56 = vld [vmem:[#allocation12 + $0x8d0] ss:$24 sps:$4 sm:$0xff]  }
 0x310   :  { %4834 = vmatpush1.bf16.msra.mxu1 %v6092_v57  ;;  %v6175_v57 = vld [vmem:[#allocation12 + $0x904] ss:$24 sps:$4 sm:$0xff]  }
 0x311   :  { %4835 = vmatprep.subr.bf16.mxu1 %v6100_v58  ;;  %v6170_v58 = vld [vmem:[#allocation12 + $0x758] ss:$24 sps:$4 sm:$0xff]  }
 0x312   :  { %4691 = vmatpush1.bf16.msra.mxu0 %v6095_v59  ;;  %v6178_v59 = vld [vmem:[#allocation12 + $0x78c] ss:$24 sps:$4 sm:$0xff]  }
 0x313   :  { %4692 = vmatprep.subr.bf16.mxu0 %v6103_v60  ;;  %v6173_v60 = vld [vmem:[#allocation12 + $0x900] ss:$24 sps:$4 sm:$0xff]  }
 0x314   :  { %4836 = vmatpush1.bf16.msra.mxu1 %v6098_v61  ;;  %v6181_v61 = vld [vmem:[#allocation12 + $0x934] ss:$24 sps:$4 sm:$0xff]  }
 0x315   :  { %4837 = vmatprep.subr.bf16.mxu1 %v6106_v62  ;;  %v6176_v62 = vld [vmem:[#allocation12 + $0x788] ss:$24 sps:$4 sm:$0xff]  }
 0x316   :  { %4693 = vmatpush1.bf16.msra.mxu0 %v6101_v63  ;;  %v6184_v63 = vld [vmem:[#allocation12 + $0x7bc] ss:$24 sps:$4 sm:$0xff]  }
 0x317   :  { %4694 = vmatprep.subr.bf16.mxu0 %v6109_v0  ;;  %v6179_v0 = vld [vmem:[#allocation12 + $0x930] ss:$24 sps:$4 sm:$0xff]  }
 0x318   :  { %4838 = vmatpush1.bf16.msra.mxu1 %v6104_v2  ;;  %v6187_v2 = vld [vmem:[#allocation12 + $0x964] ss:$24 sps:$4 sm:$0xff]  }
 0x319   :  { %4839 = vmatprep.subr.bf16.mxu1 %v6112_v3  ;;  %v6182_v3 = vld [vmem:[#allocation12 + $0x7b8] ss:$24 sps:$4 sm:$0xff]  }
 0x31a   :  { %4695 = vmatpush1.bf16.msra.mxu0 %v6107_v5  ;;  %v6190_v5 = vld [vmem:[#allocation12 + $0x7ec] ss:$24 sps:$4 sm:$0xff]  }
 0x31b   :  { %4696 = vmatprep.subr.bf16.mxu0 %v6115_v6  ;;  %v6185_v6 = vld [vmem:[#allocation12 + $0x960] ss:$24 sps:$4 sm:$0xff]  }
 0x31c   :  { %4840 = vmatpush1.bf16.msra.mxu1 %v6110_v7  ;;  %v6193_v7 = vld [vmem:[#allocation12 + $0x994] ss:$24 sps:$4 sm:$0xff]  }
 0x31d   :  { %4841 = vmatprep.subr.bf16.mxu1 %v6118_v8  ;;  %v6188_v8 = vld [vmem:[#allocation12 + $0x7e8] ss:$24 sps:$4 sm:$0xff]  }
 0x31e   :  { %4697 = vmatpush1.bf16.msra.mxu0 %v6113_v9  ;;  %v6196_v9 = vld [vmem:[#allocation12 + $0x81c] ss:$24 sps:$4 sm:$0xff]  }
 0x31f   :  { %4698 = vmatprep.subr.bf16.mxu0 %v6121_v10  ;;  %v6191_v10 = vld [vmem:[#allocation12 + $0x990] ss:$24 sps:$4 sm:$0xff]  }
 0x320   :  { %4842 = vmatpush1.bf16.msra.mxu1 %v6116_v11  ;;  %v6199_v11 = vld [vmem:[#allocation12 + $0x9c4] ss:$24 sps:$4 sm:$0xff]  }
 0x321   :  { %4843 = vmatprep.subr.bf16.mxu1 %v6124_v12  ;;  %v6194_v12 = vld [vmem:[#allocation12 + $0x818] ss:$24 sps:$4 sm:$0xff]  }
 0x322   :  { %4699 = vmatpush1.bf16.msra.mxu0 %v6119_v13  ;;  %v6202_v13 = vld [vmem:[#allocation12 + $0x84c] ss:$24 sps:$4 sm:$0xff]  }
 0x323   :  { %4700 = vmatprep.subr.bf16.mxu0 %v6127_v16  ;;  %v6197_v16 = vld [vmem:[#allocation12 + $0x9c0] ss:$24 sps:$4 sm:$0xff]  }
 0x324   :  { %4844 = vmatpush1.bf16.msra.mxu1 %v6122_v21  ;;  %v6205_v21 = vld [vmem:[#allocation12 + $0x9f4] ss:$24 sps:$4 sm:$0xff]  }
 0x325   :  { %4856 = vmatprep.subr.bf16.mxu1 %v6130_v54  ;;  %v6200_v54 = vld [vmem:[#allocation12 + $0x848] ss:$24 sps:$4 sm:$0xff]  }
 0x326   :  { %4701 = vmatpush1.bf16.msra.mxu0 %v6125_v23  ;;  %v6208_v23 = vld [vmem:[#allocation12 + $0x87c] ss:$24 sps:$4 sm:$0xff]  }
 0x327   :  { %4846 = vmatmul.mubr.bf16.vlgmr.msra.gmra.mrb[16].mxu1 %v6893_v42  ;;  %4702 = vmatprep.subr.bf16.mxu0 %v6133_v25  ;;  %v6203_v25 = vld [vmem:[#allocation12 + $0x9f0] ss:$24 sps:$4 sm:$0xff]  }
 0x328   :  { %4857 = vmatpush1.bf16.msra.mxu1 %v6128_v27  ;;  %4888 = vmatprep.mubr.bf16.mxu1 %v6882_v18  ;;  %v6211_v27 = vld [vmem:[#allocation12 + $0xa24] ss:$24 sps:$4 sm:$0xff]  }
 0x329   :  { %4858 = vmatprep.subr.bf16.mxu1 %v6136_v28  ;;  %v6206_v28 = vld [vmem:[#allocation12 + $0x878] ss:$24 sps:$4 sm:$0xff]  }
 0x32a   :  { %4703 = vmatpush1.bf16.msra.mxu0 %v6131_v29  ;;  %v6214_v29 = vld [vmem:[#allocation12 + $0x8ac] ss:$24 sps:$4 sm:$0xff]  }
 0x32b   :  { %4704 = vmatprep.subr.bf16.mxu0 %v6139_v30  ;;  %v6209_v30 = vld [vmem:[#allocation12 + $0xa20] ss:$24 sps:$4 sm:$0xff]  }
 0x32c   :  { %4859 = vmatpush1.bf16.msra.mxu1 %v6134_v1  ;;  %v6217_v1 = vld [vmem:[#allocation12 + $0xa54] ss:$24 sps:$4 sm:$0xff]  }
 0x32d   :  { %4860 = vmatprep.subr.bf16.mxu1 %v6142_v50  ;;  %v6212_v50 = vld [vmem:[#allocation12 + $0x8a8] ss:$24 sps:$4 sm:$0xff]  }
 0x32e   :  { %4705 = vmatpush1.bf16.msra.mxu0 %v6137_v4  ;;  %v6220_v4 = vld [vmem:[#allocation12 + $0x8dc] ss:$24 sps:$4 sm:$0xff]  }
 0x32f   :  { %4706 = vmatprep.subr.bf16.mxu0 %v6145_v34  ;;  %v6215_v34 = vld [vmem:[#allocation12 + $0xa50] ss:$24 sps:$4 sm:$0xff]  }
 0x330   :  { %4861 = vmatpush1.bf16.msra.mxu1 %v6140_v35  ;;  %v6223_v35 = vld [vmem:[#allocation12 + $0xa84] ss:$24 sps:$4 sm:$0xff]  }
 0x331   :  { %4862 = vmatprep.subr.bf16.mxu1 %v6148_v36  ;;  %v6218_v36 = vld [vmem:[#allocation12 + $0x8d8] ss:$24 sps:$4 sm:$0xff]  }
 0x332   :  { %4707 = vmatpush1.bf16.msra.mxu0 %v6143_v37  ;;  %v6226_v37 = vld [vmem:[#allocation12 + $0x90c] ss:$24 sps:$4 sm:$0xff]  }
 0x333   :  { %4708 = vmatprep.subr.bf16.mxu0 %v6151_v38  ;;  %v6221_v38 = vld [vmem:[#allocation12 + $0xa80] ss:$24 sps:$4 sm:$0xff]  }
 0x334   :  { %4863 = vmatpush1.bf16.msra.mxu1 %v6146_v39  ;;  %v6229_v39 = vld [vmem:[#allocation12 + $0xab4] ss:$24 sps:$4 sm:$0xff]  }
 0x335   :  { %4864 = vmatprep.subr.bf16.mxu1 %v6154_v40  ;;  %v6224_v40 = vld [vmem:[#allocation12 + $0x908] ss:$24 sps:$4 sm:$0xff]  }
 0x336   :  { %4709 = vmatpush1.bf16.msra.mxu0 %v6149_v41  ;;  %v6232_v41 = vld [vmem:[#allocation12 + $0x93c] ss:$24 sps:$4 sm:$0xff]  }
 0x337   :  { %4710 = vmatprep.subr.bf16.mxu0 %v6157_v32  ;;  %v6227_v32 = vld [vmem:[#allocation12 + $0xab0] ss:$24 sps:$4 sm:$0xff]  }
 0x338   :  { %4865 = vmatpush1.bf16.msra.mxu1 %v6152_v44  ;;  %v6235_v44 = vld [vmem:[#allocation12 + $0xae4] ss:$24 sps:$4 sm:$0xff]  }
 0x339   :  { %4866 = vmatprep.subr.bf16.mxu1 %v6160_v45  ;;  %v6230_v45 = vld [vmem:[#allocation12 + $0x938] ss:$24 sps:$4 sm:$0xff]  }
 0x33a   :  { %4711 = vmatpush1.bf16.msra.mxu0 %v6155_v46  ;;  %v6238_v46 = vld [vmem:[#allocation12 + $0x96c] ss:$24 sps:$4 sm:$0xff]  }
 0x33b   :  { %4712 = vmatprep.subr.bf16.mxu0 %v6163_v47  ;;  %v6233_v47 = vld [vmem:[#allocation12 + $0xae0] ss:$24 sps:$4 sm:$0xff]  }
 0x33c   :  { %4867 = vmatpush1.bf16.msra.mxu1 %v6158_v48  ;;  %v6241_v48 = vld [vmem:[#allocation12 + $0xb14] ss:$24 sps:$4 sm:$0xff]  }
 0x33d   :  { %4868 = vmatprep.subr.bf16.mxu1 %v6166_v49  ;;  %v6236_v49 = vld [vmem:[#allocation12 + $0x968] ss:$24 sps:$4 sm:$0xff]  }
 0x33e   :  { %4713 = vmatpush1.bf16.msra.mxu0 %v6161_v51  ;;  %v6244_v51 = vld [vmem:[#allocation12 + $0x99c] ss:$24 sps:$4 sm:$0xff]  }
 0x33f   :  { %4714 = vmatprep.subr.bf16.mxu0 %v6169_v52  ;;  %v6239_v52 = vld [vmem:[#allocation12 + $0xb10] ss:$24 sps:$4 sm:$0xff]  }
 0x340   :  { %4869 = vmatpush1.bf16.msra.mxu1 %v6164_v53  ;;  %v6247_v53 = vld [vmem:[#allocation12 + $0xb44] ss:$24 sps:$4 sm:$0xff]  }
 0x341   :  { %4870 = vmatprep.subr.bf16.mxu1 %v6172_v55  ;;  %v6242_v55 = vld [vmem:[#allocation12 + $0x998] ss:$24 sps:$4 sm:$0xff]  }
 0x342   :  { %4715 = vmatpush1.bf16.msra.mxu0 %v6167_v56  ;;  %v6250_v56 = vld [vmem:[#allocation12 + $0x9cc] ss:$24 sps:$4 sm:$0xff]  }
 0x343   :  { %4727 = vmatprep.subr.bf16.mxu0 %v6175_v57  ;;  %v6245_v57 = vld [vmem:[#allocation12 + $0xb40] ss:$24 sps:$4 sm:$0xff]  }
 0x344   :  { %4871 = vmatpush1.bf16.msra.mxu1 %v6170_v58  ;;  %v6253_v58 = vld [vmem:[#allocation12 + $0xb74] ss:$24 sps:$4 sm:$0xff]  }
 0x345   :  { %4717 = vmatmul.mubr.bf16.vlgmr.msra.gmra.mrb[8].mxu0 %v6878_v15  ;;  %4872 = vmatprep.subr.bf16.mxu1 %v6178_v59  ;;  %v584_v59 = vsub.s32 6, %v6821_v19 }
 0x346   :  { %4728 = vmatpush1.bf16.msra.mxu0 %v6173_v60  ;;  %v6248_v60 = vld [vmem:[#allocation12 + $0x9c8] ss:$24 sps:$4 sm:$0xff]  }
 0x347   :  { %4729 = vmatprep.subr.bf16.mxu0 %v6181_v61  ;;  %v588_v61 = vsub.s32 7, %v6821_v19 }
 0x348   :  { %4873 = vmatpush1.bf16.msra.mxu1 %v6176_v62  ;;  %v6256_v62 = vld [vmem:[#allocation12 + $0x9fc] ss:$24 sps:$4 sm:$0xff]  }
 0x349   :  { %4874 = vmatprep.subr.bf16.mxu1 %v6184_v63  ;;  %v6251_v63 = vld [vmem:[#allocation12 + $0xb70] ss:$24 sps:$4 sm:$0xff]  }
 0x34a   :  { %4730 = vmatpush1.bf16.msra.mxu0 %v6179_v0  ;;  %v6485_v0 = vld [vmem:[#allocation11] sm:$0xff] }
 0x34b   :  { %4731 = vmatprep.subr.bf16.mxu0 %v6187_v2  ;;  %v585_v2 = vrot.slane %v6485_v0, %v584_v59  ;;  %v6304_v59 = vld [vmem:[#allocation12 + $0xb7c] ss:$24 sps:$4 sm:$0xff]  }
 0x34c   :  { %4875 = vmatpush1.bf16.msra.mxu1 %v6182_v3  ;;  %v6259_v3 = vld [vmem:[#allocation12 + $0xba4] ss:$24 sps:$4 sm:$0xff]  }
 0x34d   :  { %4876 = vmatprep.subr.bf16.mxu1 %v6190_v5  ;;  %v589_v5 = vrot.slane %v6485_v0, %v588_v61  ;;  %v6307_v61 = vld [vmem:[#allocation12 + $0x134] ss:$24 sps:$4 sm:$0xff]   ;;  %v6305_v0 = vld [vmem:[#allocation12 + $0x130] ss:$24 sps:$4 sm:$0xff]  }
 0x34e   :  { %4732 = vmatpush1.bf16.msra.mxu0 %v6185_v6  ;;  %v6254_v6 = vld [vmem:[#allocation12 + $0x9f8] ss:$24 sps:$4 sm:$0xff]  }
 0x34f   :  { %4733 = vmatprep.subr.bf16.mxu0 %v6193_v7  ;;  %v6262_v7 = vld [vmem:[#allocation12 + $0xa2c] ss:$24 sps:$4 sm:$0xff]  }
 0x350   :  { %4877 = vmatpush1.bf16.msra.mxu1 %v6188_v8 }
 0x351   :  { %4878 = vmatprep.subr.bf16.mxu1 %v6196_v9  ;;  %v6257_v9 = vld [vmem:[#allocation12 + $0xba0] ss:$24 sps:$4 sm:$0xff]  }
 0x352   :  { %4734 = vmatpush1.bf16.msra.mxu0 %v6191_v10 }
 0x353   :  { %4735 = vmatprep.subr.bf16.mxu0 %v6199_v11 }
 0x354   :  { %4879 = vmatpush1.bf16.msra.mxu1 %v6194_v12  ;;  %v6265_v12 = vld [vmem:[#allocation12 + $0xbd4] ss:$24 sps:$4 sm:$0xff]  }
 0x355   :  { %4880 = vmatprep.subr.bf16.mxu1 %v6202_v13 }
 0x356   :  { %4736 = vmatpush1.bf16.msra.mxu0 %v6197_v16 }
 0x357   :  { %4737 = vmatprep.subr.bf16.mxu0 %v6205_v21  ;;  %v6260_v21 = vld [vmem:[#allocation12 + $0xa28] ss:$24 sps:$4 sm:$0xff]  }
 0x358   :  { %4881 = vmatpush1.bf16.msra.mxu1 %v6200_v54 }
 0x359   :  { %4882 = vmatprep.subr.bf16.mxu1 %v6208_v23 }
 0x35a   :  { %4738 = vmatpush1.bf16.msra.mxu0 %v6203_v25  ;;  %v6268_v25 = vld [vmem:[#allocation12 + $0xa5c] ss:$24 sps:$4 sm:$0xff]  }
 0x35b   :  { %4739 = vmatprep.subr.bf16.mxu0 %v6211_v27 }
 0x35c   :  { %4883 = vmatpush1.bf16.msra.mxu1 %v6206_v28  ;;  %v6263_v28 = vld [vmem:[#allocation12 + $0xbd0] ss:$24 sps:$4 sm:$0xff]  }
 0x35d   :  { %4884 = vmatprep.subr.bf16.mxu1 %v6214_v29 }
 0x35e   :  { %4740 = vmatpush1.bf16.msra.mxu0 %v6209_v30 }
 0x35f   :  { %4741 = vmatprep.subr.bf16.mxu0 %v6217_v1  ;;  %v6271_v1 = vld [vmem:[#allocation12 + $0x14] ss:$24 sps:$4 sm:$0xff]  }
 0x360   :  { %4885 = vmatpush1.bf16.msra.mxu1 %v6212_v50 }
 0x361   :  { %4886 = vmatprep.subr.bf16.mxu1 %v6220_v4 }
 0x362   :  { %4742 = vmatpush1.bf16.msra.mxu0 %v6215_v34  ;;  %v6266_v34 = vld [vmem:[#allocation12 + $0xa58] ss:$24 sps:$4 sm:$0xff]  }
 0x363   :  { %4743 = vmatprep.subr.bf16.mxu0 %v6223_v35 }
 0x364   :  { %4887 = vmatpush1.bf16.msra.mxu1 %v6218_v36 }
 0x365   :  { %4899 = vmatprep.subr.bf16.mxu1 %v6226_v37  ;;  %v6269_v37 = vld [vmem:[#allocation12 + $0x10] ss:$24 sps:$4 sm:$0xff]  }
 0x366   :  { %4744 = vmatpush1.bf16.msra.mxu0 %v6221_v38  ;;  %v6274_v38 = vld [vmem:[#allocation12 + $0xa8c] ss:$24 sps:$4 sm:$0xff]  }
 0x367   :  { %4889 = vmatmul.mubr.bf16.vlgmr.msra.gmra.mrb[16].mxu1 %v6878_v15  ;;  %4745 = vmatprep.subr.bf16.mxu0 %v6229_v39  ;;  %v6277_v39 = vld [vmem:[#allocation12 + $0x44] ss:$24 sps:$4 sm:$0xff]  }
 0x368   :  { %4900 = vmatpush1.bf16.msra.mxu1 %v6224_v40  ;;  %v6272_v40 = vld [vmem:[#allocation12 + $0xa88] ss:$24 sps:$4 sm:$0xff]  }
 0x369   :  { %4901 = vmatprep.subr.bf16.mxu1 %v6232_v41  ;;  %v6280_v41 = vld [vmem:[#allocation12 + $0xabc] ss:$24 sps:$4 sm:$0xff]  }
 0x36a   :  { %4746 = vmatpush1.bf16.msra.mxu0 %v6227_v32  ;;  %v6275_v32 = vld [vmem:[#allocation12 + $0x40] ss:$24 sps:$4 sm:$0xff]  }
 0x36b   :  { %4747 = vmatprep.subr.bf16.mxu0 %v6235_v44  ;;  %v6283_v44 = vld [vmem:[#allocation12 + $0x74] ss:$24 sps:$4 sm:$0xff]  }
 0x36c   :  { %4902 = vmatpush1.bf16.msra.mxu1 %v6230_v45  ;;  %v6278_v45 = vld [vmem:[#allocation12 + $0xab8] ss:$24 sps:$4 sm:$0xff]  }
 0x36d   :  { %4903 = vmatprep.subr.bf16.mxu1 %v6238_v46  ;;  %v6286_v46 = vld [vmem:[#allocation12 + $0xaec] ss:$24 sps:$4 sm:$0xff]  }
 0x36e   :  { %4748 = vmatpush1.bf16.msra.mxu0 %v6233_v47  ;;  %v6281_v47 = vld [vmem:[#allocation12 + $0x70] ss:$24 sps:$4 sm:$0xff]  }
 0x36f   :  { %4749 = vmatprep.subr.bf16.mxu0 %v6241_v48  ;;  %v6289_v48 = vld [vmem:[#allocation12 + $0xa4] ss:$24 sps:$4 sm:$0xff]  }
 0x370   :  { %4904 = vmatpush1.bf16.msra.mxu1 %v6236_v49  ;;  %v6284_v49 = vld [vmem:[#allocation12 + $0xae8] ss:$24 sps:$4 sm:$0xff]  }
 0x371   :  { %4905 = vmatprep.subr.bf16.mxu1 %v6244_v51  ;;  %v6292_v51 = vld [vmem:[#allocation12 + $0xb1c] ss:$24 sps:$4 sm:$0xff]  }
 0x372   :  { %4750 = vmatpush1.bf16.msra.mxu0 %v6239_v52  ;;  %v6287_v52 = vld [vmem:[#allocation12 + $0xa0] ss:$24 sps:$4 sm:$0xff]  }
 0x373   :  { %4751 = vmatprep.subr.bf16.mxu0 %v6247_v53  ;;  %v6290_v53 = vld [vmem:[#allocation12 + $0xb18] ss:$24 sps:$4 sm:$0xff]  }
 0x374   :  { %4906 = vmatpush1.bf16.msra.mxu1 %v6242_v55  ;;  %v6298_v55 = vld [vmem:[#allocation12 + $0xb4c] ss:$24 sps:$4 sm:$0xff]  }
 0x375   :  { %4907 = vmatprep.subr.bf16.mxu1 %v6250_v56  ;;  %v6293_v56 = vld [vmem:[#allocation12 + $0xd0] ss:$24 sps:$4 sm:$0xff]  }
 0x376   :  { %4752 = vmatpush1.bf16.msra.mxu0 %v6245_v57  ;;  %v6301_v57 = vld [vmem:[#allocation12 + $0x104] ss:$24 sps:$4 sm:$0xff]  }
 0x377   :  { %4753 = vmatprep.subr.bf16.mxu0 %v6253_v58  ;;  %v6296_v58 = vld [vmem:[#allocation12 + $0xb48] ss:$24 sps:$4 sm:$0xff]  }
 0x378   :  { %4908 = vmatpush1.bf16.msra.mxu1 %v6248_v60  ;;  %v6299_v60 = vld [vmem:[#allocation12 + $0x100] ss:$24 sps:$4 sm:$0xff]  }
 0x379   :  { %4909 = vmatprep.subr.bf16.mxu1 %v6256_v62  ;;  %v6302_v62 = vld [vmem:[#allocation12 + $0xb78] ss:$24 sps:$4 sm:$0xff]  }
 0x37a   :  { %4754 = vmatpush1.bf16.msra.mxu0 %v6251_v63  ;;  %v2213_v8 = vpop.f32.mrb[12].mxu1  ;;  %v6310_v63 = vld [vmem:[#allocation12 + $0xbac] ss:$24 sps:$4 sm:$0xff]  }
 0x37b   :  { %v5809_v10 = vadd.f32 %v2213_v8, %v585_v2  ;;  %v2215_v11 = vpop.f32.mrb[13].mxu1  ;;  %4755 = vmatprep.subr.bf16.mxu0 %v6259_v3  ;;  %v6308_v3 = vld [vmem:[#allocation12 + $0xba8] ss:$24 sps:$4 sm:$0xff]   ;;  %v6314_v8 = vld [vmem:[#allocation12 + $0xbd8] ss:$24 sps:$4 sm:$0xff]  }
 0x37c   :  { %v5810_v13 = vadd.f32 %v2215_v11, %v589_v5  ;;  %v2217_v16 = vpop.f32.mrb[14].mxu1  ;;  %4910 = vmatpush1.bf16.msra.mxu1 %v6254_v6  ;;  %v6311_v6 = vld [vmem:[#allocation12 + $0x160] ss:$24 sps:$4 sm:$0xff]  }
 0x37d   :  { %v5811_v54 = vadd.f32 %v2217_v16, %v585_v2  ;;  %v2219_v23 = vpop.f32.mrb[15].mxu1  ;;  %4911 = vmatprep.subr.bf16.mxu1 %v6262_v7  ;;  %v2228_v29 = vmax.f32 %v5809_v10, 0.0  ;;  %v6313_v2 = vld [vmem:[#allocation12 + $0x164] ss:$24 sps:$4 sm:$0xff]   ;;  %v6319_v7 = vld [vmem:[#allocation12 + $0x194] ss:$24 sps:$4 sm:$0xff]  }
 0x37e   :  { %v5812_v27 = vadd.f32 %v2219_v23, %v589_v5  ;;  %4756 = vmatpush1.bf16.msra.mxu0 %v6257_v9  ;;  %v2229_v50 = vmax.f32 %v5810_v13, 0.0  ;;  %v6316_v5 = vld [vmem:[#allocation12 + $0xbdc] ss:$24 sps:$4 sm:$0xff]   ;;  %v6317_v9 = vld [vmem:[#allocation12 + $0x190] ss:$24 sps:$4 sm:$0xff]  }
 0x37f   :  { %v2236_v30 = vmax.f32 %v5811_v54, 0.0  ;;  %4757 = vmatprep.subr.bf16.mxu0 %v6265_v12  ;;  %v6322_v10 = vld [vmem:[#allocation12 + $0x1c4] ss:$24 sps:$4 sm:$0xff]   ;;  %v6320_v11 = vld [vmem:[#allocation12 + $0x1c0] ss:$24 sps:$4 sm:$0xff]  }
 0x380   :  { %v2237_v4 = vmax.f32 %v5812_v27, 0.0  ;;  %4912 = vmatpush1.bf16.msra.mxu1 %v6260_v21  ;;  %v6325_v12 = vld [vmem:[#allocation12 + $0x1f4] ss:$24 sps:$4 sm:$0xff]   ;;  %v6323_v13 = vld [vmem:[#allocation12 + $0x1f0] ss:$24 sps:$4 sm:$0xff]  }
 0x381   :  { %v6907_v35 = vpack.c.bf16 %v2236_v30, %v2228_v29  ;;  %4913 = vmatprep.subr.bf16.mxu1 %v6268_v25  ;;  %v6328_v16 = vld [vmem:[#allocation12 + $0x224] ss:$24 sps:$4 sm:$0xff]   ;;  %v6326_v21 = vld [vmem:[#allocation12 + $0x220] ss:$24 sps:$4 sm:$0xff]   ;;  %v6331_v54 = vld [vmem:[#allocation12 + $0x254] ss:$24 sps:$4 sm:$0xff]  }
 0x382   :  { %v6909_v36 = vpack.c.bf16 %v2237_v4, %v2229_v50  ;;  %4758 = vmatpush1.bf16.msra.mxu0 %v6263_v28  ;;  %v6329_v23 = vld [vmem:[#allocation12 + $0x250] ss:$24 sps:$4 sm:$0xff]   ;;  %v6334_v25 = vld [vmem:[#allocation12 + $0x284] ss:$24 sps:$4 sm:$0xff]   ;;  %v6332_v27 = vld [vmem:[#allocation12 + $0x280] ss:$24 sps:$4 sm:$0xff]  }
 0x383   :  { %4942 = vmatprep.subr.bf16.mxu0 %v6271_v1  ;;  %v6337_v28 = vld [vmem:[#allocation12 + $0x2b4] ss:$24 sps:$4 sm:$0xff]   ;;  %v6335_v29 = vld [vmem:[#allocation12 + $0x2b0] ss:$24 sps:$4 sm:$0xff]   ;;  %v6340_v30 = vld [vmem:[#allocation12 + $0x2e4] ss:$24 sps:$4 sm:$0xff]  }
 0x384   :  { %4759 = vmatprep.mubr.bf16.mxu0 %v6909_v36  ;;  %4914 = vmatpush1.bf16.msra.mxu1 %v6266_v34  ;;  %v6338_v1 = vld [vmem:[#allocation12 + $0x2e0] ss:$24 sps:$4 sm:$0xff]   ;;  %v6343_v50 = vld [vmem:[#allocation12 + $0x314] ss:$24 sps:$4 sm:$0xff]   ;;  %v6341_v4 = vld [vmem:[#allocation12 + $0x310] ss:$24 sps:$4 sm:$0xff]  }
 0x385   :  { %4931 = vmatprep.mubr.bf16.mxu1 %v6909_v36  ;;  %4760 = vmatmul.mubr.bf16.vlgmr.msra.gmra.mrb[8].mxu0 %v6907_v35  ;;  %v6346_v34 = vld [vmem:[#allocation12 + $0x344] ss:$24 sps:$4 sm:$0xff]  }
 0x386   :  { %4943 = vmatpush1.bf16.msra.mxu0 %v6269_v37  ;;  %4974 = vmatprep.mubr.bf16.mxu0 %v6880_v17  ;;  %v6295_v17 = vld [vmem:[#allocation12 + $0xd4] ss:$24 sps:$4 sm:$0xff]   ;;  %v6344_v37 = vld [vmem:[#allocation12 + $0x340] ss:$24 sps:$4 sm:$0xff]  }
 0x387   :  { %4915 = vmatprep.subr.bf16.mxu1 %v6274_v38  ;;  %4944 = vmatprep.subr.bf16.mxu0 %v6277_v39  ;;  %v6349_v38 = vld [vmem:[#allocation12 + $0x374] ss:$24 sps:$4 sm:$0xff]   ;;  %v6347_v39 = vld [vmem:[#allocation12 + $0x370] ss:$24 sps:$4 sm:$0xff]  }
 0x388   :  { %4916 = vmatpush1.bf16.msra.mxu1 %v6272_v40  ;;  %v6352_v40 = vld [vmem:[#allocation12 + $0x3a4] ss:$24 sps:$4 sm:$0xff]  }
 0x389   :  { %4917 = vmatprep.subr.bf16.mxu1 %v6280_v41  ;;  %v6350_v41 = vld [vmem:[#allocation12 + $0x3a0] ss:$24 sps:$4 sm:$0xff]  }
 0x38a   :  { %4945 = vmatpush1.bf16.msra.mxu0 %v6275_v32  ;;  %v6355_v32 = vld [vmem:[#allocation12 + $0x3d4] ss:$24 sps:$4 sm:$0xff]  }
 0x38b   :  { %4946 = vmatprep.subr.bf16.mxu0 %v6283_v44  ;;  %v6353_v44 = vld [vmem:[#allocation12 + $0x3d0] ss:$24 sps:$4 sm:$0xff]  }
 0x38c   :  { %4918 = vmatpush1.bf16.msra.mxu1 %v6278_v45  ;;  %v6358_v45 = vld [vmem:[#allocation12 + $0x404] ss:$24 sps:$4 sm:$0xff]  }
 0x38d   :  { %4919 = vmatprep.subr.bf16.mxu1 %v6286_v46  ;;  %v6361_v46 = vld [vmem:[#allocation12 + $0x434] ss:$24 sps:$4 sm:$0xff]  }
 0x38e   :  { %4947 = vmatpush1.bf16.msra.mxu0 %v6281_v47  ;;  %v6364_v47 = vld [vmem:[#allocation12 + $0x464] ss:$24 sps:$4 sm:$0xff]  }
 0x38f   :  { %4948 = vmatprep.subr.bf16.mxu0 %v6289_v48  ;;  %v6362_v48 = vld [vmem:[#allocation12 + $0x460] ss:$24 sps:$4 sm:$0xff]  }
 0x390   :  { %4920 = vmatpush1.bf16.msra.mxu1 %v6284_v49  ;;  %v6367_v49 = vld [vmem:[#allocation12 + $0x494] ss:$24 sps:$4 sm:$0xff]  }
 0x391   :  { %4921 = vmatprep.subr.bf16.mxu1 %v6292_v51  ;;  %v6365_v51 = vld [vmem:[#allocation12 + $0x490] ss:$24 sps:$4 sm:$0xff]  }
 0x392   :  { %4949 = vmatpush1.bf16.msra.mxu0 %v6287_v52  ;;  %v6370_v52 = vld [vmem:[#allocation12 + $0x4c4] ss:$24 sps:$4 sm:$0xff]  }
 0x393   :  { %4950 = vmatprep.subr.bf16.mxu0 %v6295_v17  ;;  %v6368_v17 = vld [vmem:[#allocation12 + $0x4c0] ss:$24 sps:$4 sm:$0xff]  }
 0x394   :  { %4922 = vmatpush1.bf16.msra.mxu1 %v6290_v53  ;;  %v6373_v53 = vld [vmem:[#allocation12 + $0x4f4] ss:$24 sps:$4 sm:$0xff]  }
 0x395   :  { %4923 = vmatprep.subr.bf16.mxu1 %v6298_v55  ;;  %v6371_v55 = vld [vmem:[#allocation12 + $0x4f0] ss:$24 sps:$4 sm:$0xff]  }
 0x396   :  { %4951 = vmatpush1.bf16.msra.mxu0 %v6293_v56  ;;  %v6376_v56 = vld [vmem:[#allocation12 + $0x524] ss:$24 sps:$4 sm:$0xff]  }
 0x397   :  { %4952 = vmatprep.subr.bf16.mxu0 %v6301_v57  ;;  %v6374_v57 = vld [vmem:[#allocation12 + $0x520] ss:$24 sps:$4 sm:$0xff]  }
 0x398   :  { %4924 = vmatpush1.bf16.msra.mxu1 %v6296_v58  ;;  %v6379_v58 = vld [vmem:[#allocation12 + $0x554] ss:$24 sps:$4 sm:$0xff]  }
 0x399   :  { %4925 = vmatprep.subr.bf16.mxu1 %v6304_v59  ;;  %v6377_v59 = vld [vmem:[#allocation12 + $0x550] ss:$24 sps:$4 sm:$0xff]  }
 0x39a   :  { %4953 = vmatpush1.bf16.msra.mxu0 %v6299_v60  ;;  %v6382_v60 = vld [vmem:[#allocation12 + $0x584] ss:$24 sps:$4 sm:$0xff]  }
 0x39b   :  { %4954 = vmatprep.subr.bf16.mxu0 %v6307_v61  ;;  %v6380_v61 = vld [vmem:[#allocation12 + $0x580] ss:$24 sps:$4 sm:$0xff]  }
 0x39c   :  { %4926 = vmatpush1.bf16.msra.mxu1 %v6302_v62  ;;  %v6385_v62 = vld [vmem:[#allocation12 + $0x5b4] ss:$24 sps:$4 sm:$0xff]  }
 0x39d   :  { %4927 = vmatprep.subr.bf16.mxu1 %v6310_v63  ;;  %v6383_v63 = vld [vmem:[#allocation12 + $0x5b0] ss:$24 sps:$4 sm:$0xff]  }
 0x39e   :  { %4955 = vmatpush1.bf16.msra.mxu0 %v6305_v0  ;;  %v6388_v0 = vld [vmem:[#allocation12 + $0x5e4] ss:$24 sps:$4 sm:$0xff]  }
 0x39f   :  { %4956 = vmatprep.subr.bf16.mxu0 %v6313_v2  ;;  %v6386_v2 = vld [vmem:[#allocation12 + $0x5e0] ss:$24 sps:$4 sm:$0xff]  }
 0x3a0   :  { %4928 = vmatpush1.bf16.msra.mxu1 %v6308_v3  ;;  %v6391_v3 = vld [vmem:[#allocation12 + $0x614] ss:$24 sps:$4 sm:$0xff]  }
 0x3a1   :  { %4929 = vmatprep.subr.bf16.mxu1 %v6316_v5  ;;  %v6389_v5 = vld [vmem:[#allocation12 + $0x610] ss:$24 sps:$4 sm:$0xff]  }
 0x3a2   :  { %4957 = vmatpush1.bf16.msra.mxu0 %v6311_v6  ;;  %v6394_v6 = vld [vmem:[#allocation12 + $0x644] ss:$24 sps:$4 sm:$0xff]  }
 0x3a3   :  { %4958 = vmatprep.subr.bf16.mxu0 %v6319_v7  ;;  %v6392_v7 = vld [vmem:[#allocation12 + $0x640] ss:$24 sps:$4 sm:$0xff]  }
 0x3a4   :  { %4930 = vmatpush1.bf16.msra.mxu1 %v6314_v8  ;;  %v6397_v8 = vld [vmem:[#allocation12 + $0x674] ss:$24 sps:$4 sm:$0xff]  }
 0x3a6   :  { %4959 = vmatpush1.bf16.msra.mxu0 %v6317_v9  ;;  %v6395_v9 = vld [vmem:[#allocation12 + $0x670] ss:$24 sps:$4 sm:$0xff]  }
 0x3a7   :  { %4932 = vmatmul.mubr.bf16.vlgmr.msra.gmra.mrb[16].mxu1 %v6907_v35  ;;  %4960 = vmatprep.subr.bf16.mxu0 %v6322_v10  ;;  %v6400_v10 = vld [vmem:[#allocation12 + $0x6a4] ss:$24 sps:$4 sm:$0xff]  }
 0x3aa   :  { %4961 = vmatpush1.bf16.msra.mxu0 %v6320_v11  ;;  %v6398_v11 = vld [vmem:[#allocation12 + $0x6a0] ss:$24 sps:$4 sm:$0xff]  }
 0x3ab   :  { %4962 = vmatprep.subr.bf16.mxu0 %v6325_v12  ;;  %v6403_v12 = vld [vmem:[#allocation12 + $0x6d4] ss:$24 sps:$4 sm:$0xff]  }
 0x3ae   :  { %4963 = vmatpush1.bf16.msra.mxu0 %v6323_v13  ;;  %v6401_v13 = vld [vmem:[#allocation12 + $0x6d0] ss:$24 sps:$4 sm:$0xff]  }
 0x3af   :  { %4964 = vmatprep.subr.bf16.mxu0 %v6328_v16  ;;  %v6406_v16 = vld [vmem:[#allocation12 + $0x704] ss:$24 sps:$4 sm:$0xff]  }
 0x3b2   :  { %4965 = vmatpush1.bf16.msra.mxu0 %v6326_v21  ;;  %v6409_v21 = vld [vmem:[#allocation12 + $0x734] ss:$24 sps:$4 sm:$0xff]  }
 0x3b3   :  { %4966 = vmatprep.subr.bf16.mxu0 %v6331_v54  ;;  %v6412_v54 = vld [vmem:[#allocation12 + $0x764] ss:$24 sps:$4 sm:$0xff]  }
 0x3b6   :  { %4967 = vmatpush1.bf16.msra.mxu0 %v6329_v23  ;;  %v6410_v23 = vld [vmem:[#allocation12 + $0x760] ss:$24 sps:$4 sm:$0xff]  }
 0x3b7   :  { %4968 = vmatprep.subr.bf16.mxu0 %v6334_v25  ;;  %v6415_v25 = vld [vmem:[#allocation12 + $0x794] ss:$24 sps:$4 sm:$0xff]  }
 0x3ba   :  { %4969 = vmatpush1.bf16.msra.mxu0 %v6332_v27  ;;  %v6413_v27 = vld [vmem:[#allocation12 + $0x790] ss:$24 sps:$4 sm:$0xff]  }
 0x3bb   :  { %4970 = vmatprep.subr.bf16.mxu0 %v6337_v28  ;;  %v6418_v28 = vld [vmem:[#allocation12 + $0x7c4] ss:$24 sps:$4 sm:$0xff]  }
 0x3be   :  { %4971 = vmatpush1.bf16.msra.mxu0 %v6335_v29  ;;  %v6416_v29 = vld [vmem:[#allocation12 + $0x7c0] ss:$24 sps:$4 sm:$0xff]  }
 0x3bf   :  { %4972 = vmatprep.subr.bf16.mxu0 %v6340_v30  ;;  %v6421_v30 = vld [vmem:[#allocation12 + $0x7f4] ss:$24 sps:$4 sm:$0xff]  }
 0x3c2   :  { %4973 = vmatpush1.bf16.msra.mxu0 %v6338_v1  ;;  %v6419_v1 = vld [vmem:[#allocation12 + $0x7f0] ss:$24 sps:$4 sm:$0xff]  }
 0x3c3   :  { %4985 = vmatprep.subr.bf16.mxu0 %v6343_v50  ;;  %v6424_v50 = vld [vmem:[#allocation12 + $0x824] ss:$24 sps:$4 sm:$0xff]  }
 0x3c5   :  { %4975 = vmatmul.mubr.bf16.vlgmr.msra.gmra.mrb[12].mxu0 %v6876_v14  ;;  %v6356_v14 = vld [vmem:[#allocation12 + $0x400] ss:$24 sps:$4 sm:$0xff]  }
 0x3c6   :  { %4986 = vmatpush1.bf16.msra.mxu0 %v6341_v4  ;;  %5017 = vmatprep.mubr.bf16.mxu0 %v6895_v43  ;;  %v6359_v43 = vld [vmem:[#allocation12 + $0x430] ss:$24 sps:$4 sm:$0xff]   ;;  %v6422_v4 = vld [vmem:[#allocation12 + $0x820] ss:$24 sps:$4 sm:$0xff]  }
 0x3c7   :  { %4987 = vmatprep.subr.bf16.mxu0 %v6346_v34  ;;  %v6427_v34 = vld [vmem:[#allocation12 + $0x854] ss:$24 sps:$4 sm:$0xff]  }
 0x3ca   :  { %4988 = vmatpush1.bf16.msra.mxu0 %v6344_v37  ;;  %v6425_v37 = vld [vmem:[#allocation12 + $0x850] ss:$24 sps:$4 sm:$0xff]  }
 0x3cb   :  { %4989 = vmatprep.subr.bf16.mxu0 %v6349_v38  ;;  %v6430_v38 = vld [vmem:[#allocation12 + $0x884] ss:$24 sps:$4 sm:$0xff]  }
 0x3ce   :  { %4990 = vmatpush1.bf16.msra.mxu0 %v6347_v39  ;;  %v6428_v39 = vld [vmem:[#allocation12 + $0x880] ss:$24 sps:$4 sm:$0xff]  }
 0x3cf   :  { %4991 = vmatprep.subr.bf16.mxu0 %v6352_v40  ;;  %v6433_v40 = vld [vmem:[#allocation12 + $0x8b4] ss:$24 sps:$4 sm:$0xff]  }
 0x3d2   :  { %4992 = vmatpush1.bf16.msra.mxu0 %v6350_v41  ;;  %v6431_v41 = vld [vmem:[#allocation12 + $0x8b0] ss:$24 sps:$4 sm:$0xff]  }
 0x3d3   :  { %4993 = vmatprep.subr.bf16.mxu0 %v6355_v32  ;;  %v6436_v32 = vld [vmem:[#allocation12 + $0x8e4] ss:$24 sps:$4 sm:$0xff]  }
 0x3d6   :  { %4994 = vmatpush1.bf16.msra.mxu0 %v6353_v44  ;;  %v6434_v44 = vld [vmem:[#allocation12 + $0x8e0] ss:$24 sps:$4 sm:$0xff]  }
 0x3d7   :  { %4995 = vmatprep.subr.bf16.mxu0 %v6358_v45  ;;  %v6439_v45 = vld [vmem:[#allocation12 + $0x914] ss:$24 sps:$4 sm:$0xff]  }
 0x3da   :  { %4996 = vmatpush1.bf16.msra.mxu0 %v6356_v14  ;;  %v6437_v14 = vld [vmem:[#allocation12 + $0x910] ss:$24 sps:$4 sm:$0xff]  }
 0x3db   :  { %4997 = vmatprep.subr.bf16.mxu0 %v6361_v46  ;;  %v6442_v46 = vld [vmem:[#allocation12 + $0x944] ss:$24 sps:$4 sm:$0xff]  }
 0x3de   :  { %4998 = vmatpush1.bf16.msra.mxu0 %v6359_v43  ;;  %v6440_v43 = vld [vmem:[#allocation12 + $0x940] ss:$24 sps:$4 sm:$0xff]  }
 0x3df   :  { %4999 = vmatprep.subr.bf16.mxu0 %v6364_v47  ;;  %v6445_v47 = vld [vmem:[#allocation12 + $0x974] ss:$24 sps:$4 sm:$0xff]  }
 0x3e2   :  { %5000 = vmatpush1.bf16.msra.mxu0 %v6362_v48  ;;  %v6443_v48 = vld [vmem:[#allocation12 + $0x970] ss:$24 sps:$4 sm:$0xff]  }
 0x3e3   :  { %5001 = vmatprep.subr.bf16.mxu0 %v6367_v49  ;;  %v6448_v49 = vld [vmem:[#allocation12 + $0x9a4] ss:$24 sps:$4 sm:$0xff]  }
 0x3e6   :  { %5002 = vmatpush1.bf16.msra.mxu0 %v6365_v51  ;;  %v6446_v51 = vld [vmem:[#allocation12 + $0x9a0] ss:$24 sps:$4 sm:$0xff]  }
 0x3e7   :  { %5003 = vmatprep.subr.bf16.mxu0 %v6370_v52  ;;  %v6451_v52 = vld [vmem:[#allocation12 + $0x9d4] ss:$24 sps:$4 sm:$0xff]  }
 0x3ea   :  { %5004 = vmatpush1.bf16.msra.mxu0 %v6368_v17  ;;  %v6449_v17 = vld [vmem:[#allocation12 + $0x9d0] ss:$24 sps:$4 sm:$0xff]  }
 0x3eb   :  { %5005 = vmatprep.subr.bf16.mxu0 %v6373_v53  ;;  %v6922_v53 = vld [vmem:[#allocation14] sm:$0x3f] }
 0x3ee   :  { %5006 = vmatpush1.bf16.msra.mxu0 %v6371_v55  ;;  %v6452_v55 = vld [vmem:[#allocation12 + $0xa00] ss:$24 sps:$4 sm:$0xff]  }
 0x3ef   :  { %5007 = vmatprep.subr.bf16.mxu0 %v6376_v56  ;;  %v2655_v56 = vrot.slane %v6922_v53, %v6827_v22  ;;  %v6458_v22 = vld [vmem:[#allocation12 + $0xa60] ss:$24 sps:$4 sm:$0xff]  }
 0x3f2   :  { %5008 = vmatpush1.bf16.msra.mxu0 %v6374_v57  ;;  %v6457_v57 = vld [vmem:[#allocation12 + $0xa34] ss:$24 sps:$4 sm:$0xff]  }
 0x3f3   :  { %5009 = vmatprep.subr.bf16.mxu0 %v6379_v58 }
 0x3f6   :  { %5010 = vmatpush1.bf16.msra.mxu0 %v6377_v59 }
 0x3f7   :  { %5011 = vmatprep.subr.bf16.mxu0 %v6382_v60 }
 0x3fa   :  { %5012 = vmatpush1.bf16.msra.mxu0 %v6380_v61 }
 0x3fb   :  { %5013 = vmatprep.subr.bf16.mxu0 %v6385_v62 }
 0x3fe   :  { %5014 = vmatpush1.bf16.msra.mxu0 %v6383_v63  ;;  %v6455_v63 = vld [vmem:[#allocation12 + $0xa30] ss:$24 sps:$4 sm:$0xff]  }
 0x3ff   :  { %5015 = vmatprep.subr.bf16.mxu0 %v6388_v0 }
 0x402   :  { %5016 = vmatpush1.bf16.msra.mxu0 %v6386_v2 }
 0x403   :  { %5028 = vmatprep.subr.bf16.mxu0 %v6391_v3  ;;  %v6460_v3 = vld [vmem:[#allocation12 + $0xa64] ss:$24 sps:$4 sm:$0xff]  }
 0x405   :  { %5018 = vmatmul.mubr.bf16.vlgmr.msra.gmra.mrb[12].mxu0 %v6893_v42  ;;  %v6404_v42 = vld [vmem:[#allocation12 + $0x700] ss:$24 sps:$4 sm:$0xff]  }
 0x406   :  { %5029 = vmatpush1.bf16.msra.mxu0 %v6389_v5  ;;  %5060 = vmatprep.mubr.bf16.mxu0 %v6882_v18  ;;  %v6407_v18 = vld [vmem:[#allocation12 + $0x730] ss:$24 sps:$4 sm:$0xff]   ;;  %v6463_v5 = vld [vmem:[#allocation12 + $0xa94] ss:$24 sps:$4 sm:$0xff]  }
 0x407   :  { %5030 = vmatprep.subr.bf16.mxu0 %v6394_v6  ;;  %v6461_v6 = vld [vmem:[#allocation12 + $0xa90] ss:$24 sps:$4 sm:$0xff]  }
 0x40a   :  { %5031 = vmatpush1.bf16.msra.mxu0 %v6392_v7  ;;  %v6466_v7 = vld [vmem:[#allocation12 + $0xac4] ss:$24 sps:$4 sm:$0xff]  }
 0x40b   :  { %5032 = vmatprep.subr.bf16.mxu0 %v6397_v8  ;;  %v6464_v8 = vld [vmem:[#allocation12 + $0xac0] ss:$24 sps:$4 sm:$0xff]  }
 0x40e   :  { %5033 = vmatpush1.bf16.msra.mxu0 %v6395_v9  ;;  %v6469_v9 = vld [vmem:[#allocation12 + $0xaf4] ss:$24 sps:$4 sm:$0xff]  }
 0x40f   :  { %5034 = vmatprep.subr.bf16.mxu0 %v6400_v10  ;;  %v6467_v10 = vld [vmem:[#allocation12 + $0xaf0] ss:$24 sps:$4 sm:$0xff]  }
 0x412   :  { %5035 = vmatpush1.bf16.msra.mxu0 %v6398_v11  ;;  %v6472_v11 = vld [vmem:[#allocation12 + $0xb24] ss:$24 sps:$4 sm:$0xff]  }
 0x413   :  { %5036 = vmatprep.subr.bf16.mxu0 %v6403_v12  ;;  %v6470_v12 = vld [vmem:[#allocation12 + $0xb20] ss:$24 sps:$4 sm:$0xff]  }
 0x416   :  { %5037 = vmatpush1.bf16.msra.mxu0 %v6401_v13  ;;  %v6475_v13 = vld [vmem:[#allocation12 + $0xb54] ss:$24 sps:$4 sm:$0xff]  }
 0x417   :  { %5038 = vmatprep.subr.bf16.mxu0 %v6406_v16  ;;  %v6473_v16 = vld [vmem:[#allocation12 + $0xb50] ss:$24 sps:$4 sm:$0xff]  }
 0x41a   :  { %5039 = vmatpush1.bf16.msra.mxu0 %v6404_v42  ;;  %v6478_v42 = vld [vmem:[#allocation12 + $0xb84] ss:$24 sps:$4 sm:$0xff]  }
 0x41b   :  { %5040 = vmatprep.subr.bf16.mxu0 %v6409_v21  ;;  %v6476_v21 = vld [vmem:[#allocation12 + $0xb80] ss:$24 sps:$4 sm:$0xff]  }
 0x41e   :  { %5041 = vmatpush1.bf16.msra.mxu0 %v6407_v18  ;;  %v2659_v18 = vrot.slane %v6922_v53, %v6831_v24  ;;  %v6482_v24 = vld [vmem:[#allocation12 + $0xbe0] ss:$24 sps:$4 sm:$0xff]  }
 0x41f   :  { %5042 = vmatprep.subr.bf16.mxu0 %v6412_v54  ;;  %v6481_v54 = vld [vmem:[#allocation12 + $0xbb4] ss:$24 sps:$4 sm:$0xff]  }
 0x422   :  { %5043 = vmatpush1.bf16.msra.mxu0 %v6410_v23  ;;  %v2663_v23 = vrot.slane %v6922_v53, %v6835_v26  ;;  %v2667_v26 = vrot.slane %v6922_v53, %v576_v31 }
 0x423   :  { %5044 = vmatprep.subr.bf16.mxu0 %v6415_v25 }
 0x426   :  { %5045 = vmatpush1.bf16.msra.mxu0 %v6413_v27  ;;  %v6479_v27 = vld [vmem:[#allocation12 + $0xbb0] ss:$24 sps:$4 sm:$0xff]  }
 0x427   :  { %5046 = vmatprep.subr.bf16.mxu0 %v6418_v28 }
 0x42a   :  { %5047 = vmatpush1.bf16.msra.mxu0 %v6416_v29 }
 0x42b   :  { %5048 = vmatprep.subr.bf16.mxu0 %v6421_v30  ;;  %v6484_v30 = vld [vmem:[#allocation12 + $0xbe4] ss:$24 sps:$4 sm:$0xff]  }
 0x42e   :  { %5049 = vmatpush1.bf16.msra.mxu0 %v6419_v1 }
 0x42f   :  { %5050 = vmatprep.subr.bf16.mxu0 %v6424_v50 }
 0x432   :  { %5051 = vmatpush1.bf16.msra.mxu0 %v6422_v4 }
 0x433   :  { %5052 = vmatprep.subr.bf16.mxu0 %v6427_v34 }
 0x436   :  { %5053 = vmatpush1.bf16.msra.mxu0 %v6425_v37 }
 0x437   :  { %5054 = vmatprep.subr.bf16.mxu0 %v6430_v38  ;;  %v2671_v38 = vrot.slane %v6922_v53, %v580_v33 }
 0x43a   :  { %5055 = vmatpush1.bf16.msra.mxu0 %v6428_v39 }
 0x43b   :  { %5056 = vmatprep.subr.bf16.mxu0 %v6433_v40 }
 0x43e   :  { %5057 = vmatpush1.bf16.msra.mxu0 %v6431_v41 }
 0x43f   :  { %5058 = vmatprep.subr.bf16.mxu0 %v6436_v32 }
 0x442   :  { %5059 = vmatpush1.bf16.msra.mxu0 %v6434_v44 }
 0x443   :  { %5071 = vmatprep.subr.bf16.mxu0 %v6439_v45 }
 0x445   :  { %5061 = vmatmul.mubr.bf16.vlgmr.msra.gmra.mrb[12].mxu0 %v6878_v15  ;;  %v6454_v15 = vld [vmem:[#allocation12 + $0xa04] ss:$24 sps:$4 sm:$0xff]  }
 0x446   :  { %5072 = vmatpush1.bf16.msra.mxu0 %v6437_v14  ;;  %5103 = vmatprep.mubr.bf16.mxu0 %v6909_v36  ;;  %v2651_v36 = vrot.slane %v6922_v53, %v6824_v20 }
 0x447   :  { %5073 = vmatprep.subr.bf16.mxu0 %v6442_v46 }
 0x44a   :  { %5074 = vmatpush1.bf16.msra.mxu0 %v6440_v43 }
 0x44b   :  { %5075 = vmatprep.subr.bf16.mxu0 %v6445_v47 }
 0x44e   :  { %5076 = vmatpush1.bf16.msra.mxu0 %v6443_v48 }
 0x44f   :  { %5077 = vmatprep.subr.bf16.mxu0 %v6448_v49 }
 0x452   :  { %5078 = vmatpush1.bf16.msra.mxu0 %v6446_v51 }
 0x453   :  { %5079 = vmatprep.subr.bf16.mxu0 %v6451_v52 }
 0x456   :  { %5080 = vmatpush1.bf16.msra.mxu0 %v6449_v17 }
 0x457   :  { %5081 = vmatprep.subr.bf16.mxu0 %v6454_v15 }
 0x458   :  { %v4761_v58 = vpop.f32.mrb[8].mxu0 }
 0x459   :  { %v5813_v59 = vadd.f32 %v4761_v58, %v2651_v36  ;;  %v4763_v60 = vpop.f32.mrb[9].mxu0 }
 0x45a   :  { %v5814_v61 = vadd.f32 %v4763_v60, %v2655_v56  ;;  %5082 = vmatpush1.bf16.msra.mxu0 %v6452_v55  ;;  %v4765_v62 = vpop.f32.mrb[10].mxu0 }
 0x45b   :  { %5114 = vst [vmem:[#allocation15] sm:$0xff] %v5813_v59  ;;  %v5815_v0 = vadd.f32 %v4765_v62, %v2651_v36  ;;  %v4767_v2 = vpop.f32.mrb[11].mxu0  ;;  %5083 = vmatprep.subr.bf16.mxu0 %v6457_v57 }
 0x45c   :  { %5115 = vst [vmem:[#allocation15 + $0x8] sm:$0xff] %v5814_v61  ;;  %v5816_v20 = vadd.f32 %v4767_v2, %v2655_v56 }
 0x45d   :  { %5120 = vst [vmem:[#allocation15 + $0x30] sm:$0xff] %v5815_v0 }
 0x45e   :  { %5121 = vst [vmem:[#allocation15 + $0x38] sm:$0xff] %v5816_v20  ;;  %5084 = vmatpush1.bf16.msra.mxu0 %v6455_v63 }
 0x45f   :  { %5085 = vmatprep.subr.bf16.mxu0 %v6460_v3 }
 0x462   :  { %5086 = vmatpush1.bf16.msra.mxu0 %v6458_v22 }
 0x463   :  { %5087 = vmatprep.subr.bf16.mxu0 %v6463_v5 }
 0x466   :  { %5088 = vmatpush1.bf16.msra.mxu0 %v6461_v6 }
 0x467   :  { %5089 = vmatprep.subr.bf16.mxu0 %v6466_v7 }
 0x46a   :  { %5090 = vmatpush1.bf16.msra.mxu0 %v6464_v8 }
 0x46b   :  { %5091 = vmatprep.subr.bf16.mxu0 %v6469_v9 }
 0x46e   :  { %5092 = vmatpush1.bf16.msra.mxu0 %v6467_v10 }
 0x46f   :  { %5093 = vmatprep.subr.bf16.mxu0 %v6472_v11 }
 0x472   :  { %5094 = vmatpush1.bf16.msra.mxu0 %v6470_v12 }
 0x473   :  { %5095 = vmatprep.subr.bf16.mxu0 %v6475_v13 }
 0x476   :  { %5096 = vmatpush1.bf16.msra.mxu0 %v6473_v16 }
 0x477   :  { %5097 = vmatprep.subr.bf16.mxu0 %v6478_v42 }
 0x47a   :  { %5098 = vmatpush1.bf16.msra.mxu0 %v6476_v21  ;;  %v4933_v25 = vpop.f32.mrb[16].mxu1 }
 0x47b   :  { %v5817_v28 = vadd.f32 %v4933_v25, %v2659_v18  ;;  %v4935_v29 = vpop.f32.mrb[17].mxu1  ;;  %5099 = vmatprep.subr.bf16.mxu0 %v6481_v54 }
 0x47c   :  { %v5818_v1 = vadd.f32 %v4935_v29, %v2663_v23  ;;  %v4937_v50 = vpop.f32.mrb[18].mxu1 }
 0x47d   :  { %5116 = vst [vmem:[#allocation15 + $0x10] sm:$0xff] %v5817_v28  ;;  %v5819_v4 = vadd.f32 %v4937_v50, %v2659_v18  ;;  %v4939_v34 = vpop.f32.mrb[19].mxu1 }
 0x47e   :  { %5117 = vst [vmem:[#allocation15 + $0x18] sm:$0xff] %v5818_v1  ;;  %v5820_v37 = vadd.f32 %v4939_v34, %v2663_v23  ;;  %5100 = vmatpush1.bf16.msra.mxu0 %v6479_v27 }
 0x47f   :  { %5122 = vst [vmem:[#allocation15 + $0x40] sm:$0xff] %v5819_v4  ;;  %5101 = vmatprep.subr.bf16.mxu0 %v6484_v30 }
 0x480   :  { %5123 = vst [vmem:[#allocation15 + $0x48] sm:$0xff] %v5820_v37 }
 0x482   :  { %5102 = vmatpush1.bf16.msra.mxu0 %v6482_v24 }
 0x485   :  { %5104 = vmatmul.mubr.bf16.vlgmr.msra.gmra.mrb[12].mxu0 %v6907_v35 }
 0x558   :  { %v5105_v39 = vpop.f32.mrb[12].mxu0 }
 0x559   :  { %v5821_v40 = vadd.f32 %v5105_v39, %v2667_v26  ;;  %v5107_v41 = vpop.f32.mrb[13].mxu0 }
 0x55a   :  { %v5822_v32 = vadd.f32 %v5107_v41, %v2671_v38  ;;  %v5109_v44 = vpop.f32.mrb[14].mxu0 }
 0x55b   :  { %5118 = vst [vmem:[#allocation15 + $0x20] sm:$0xff] %v5821_v40  ;;  %v5823_v45 = vadd.f32 %v5109_v44, %v2667_v26  ;;  %v5111_v14 = vpop.f32.mrb[15].mxu0 }
 0x55c   :  { %5119 = vst [vmem:[#allocation15 + $0x28] sm:$0xff] %v5822_v32  ;;  %v5824_v35 = vadd.f32 %v5111_v14, %v2671_v38 }
 0x55d   :  { %5124 = vst [vmem:[#allocation15 + $0x50] sm:$0xff] %v5823_v45 }
 0x55e   :  { %5125 = vst [vmem:[#allocation15 + $0x58] sm:$0xff] %v5824_v35 }
 0x55f   :  { %6651 = shalt.err (!%p6648_p4)
}
 0x560   :  { %s6652_s0 = scalar_lea.hbm %s6958_s7, 1536 }
 0x561   :  { %p6653_p5 = scmp.ne.s32.totalorder %s6958_s7, %s6652_s0  ;;  %p6656_p6 = scmp.lt.u32.totalorder %s6652_s0, %s6958_s7 }
 0x563   :  { %p6658_p7 = pnand %p6656_p6, %p6653_p5 }
 0x565   :  { %6661 = shalt.err (!%p6658_p7)
}
 0x566   :  { %s6689_s21 = smov 768   ;;  %s6690_s22 = smov 48  }
 0x567   :  { %5137 = dma.vmem_to_hbm [thread:$0]  %s5132_s14, 1536, %s6958_s7, [#allocation5], %s6689_s21, %s6689_s21, %s6690_s22  }
 0x568   :  { %6670 = dma.done.wait [#allocation5], 1536  }
 0x569   :  { %6671 = vsyncadd [#allocation5], 4294965760 }
 0x56a   :  { %5141 = vsyncpa [#allocation4], 1 }
 0x56b   :  { %5142 = vsyncpa [#allocation7], 1 }
 0x56c   :  { %5143 = vsyncpa [#allocation10], 1 }
 0x56d   :  { %5144 = vsyncpa [#allocation13], 1 }
 0x56e   :  { %5145 = vsyncpa [#allocation5], 1 }

</bundles_post_ra>
